<compile_context>
chip_gen: v7x
topology: tpu7x:2x2x1
jax: 0.10.0
libtpu: 0.0.40
codegen_flags: <defaults>
</compile_context>

<pallas_src>
import functools

import jax
import jax.numpy as jnp
from jax import lax
from jax.experimental import pallas as pl
from jax.experimental.pallas import tpu as pltpu

_NEG_SLOPE = 0.01   # nn.LeakyReLU() default negative_slope
_PADL = 8           # left halo width (in W) inside the scratch -> 8-aligned interior store


def _stage_interaction_kernel(inp_ref, enc_ref, dec_ref,
                              enc_top_ref, dec_top_ref, enc_bot_ref, dec_bot_ref,
                              w1_ref, wphi_ref, wgam_ref,
                              o_ref, x_ref, pad_ref, *, TH, W, C, RB):
    h = pl.program_id(1)
    n_h = pl.num_programs(1)

    # ---- assemble the (TH+2)-row x 2C activation via cheap lane/sublane-offset copies ----
    #   x rows [0, W)              : top halo row  (image row h*TH-1, clamped at the edge)
    #   x rows [W, (TH+1)*W)       : this tile's TH rows
    #   x rows [(TH+1)*W, (TH+2)*W): bottom halo row (image row (h+1)*TH, clamped)
    x_ref[0:W, 0:C] = enc_top_ref[0]
    x_ref[0:W, C:2 * C] = dec_top_ref[0]
    x_ref[W:(TH + 1) * W, 0:C] = enc_ref[0]
    x_ref[W:(TH + 1) * W, C:2 * C] = dec_ref[0]
    x_ref[(TH + 1) * W:(TH + 2) * W, 0:C] = enc_bot_ref[0]
    x_ref[(TH + 1) * W:(TH + 2) * W, C:2 * C] = dec_bot_ref[0]

    # ---- fused 1x1 convs: ONE K=2C MXU GEMM (body + the 2 recomputed halo rows), f32 acc ----
    # operands are bf16 by construction (intended precision); accumulation stays f32.
    acc = jnp.dot(x_ref[...], w1_ref[...], preferred_element_type=jnp.float32)
    skip = jnp.where(acc >= 0, acc, _NEG_SLOPE * acc)            # LeakyReLU(0.01)

    # ---- zero only the pad strips the taps actually read (interior is fully overwritten) ----
    zcol = jnp.zeros((TH + 2, 1, C), jnp.float32)
    pad_ref[:, _PADL - 1:_PADL, :] = zcol                        # left image border column
    pad_ref[:, _PADL + W:_PADL + W + 1, :] = zcol                # right image border column

    # ---- sublane-aligned store of skip (halo rows included) into the padded scratch ----
    pad_ref[:, _PADL:_PADL + W, :] = skip.reshape(TH + 2, W, C)

    # ---- image-edge tiles: the halo row lies outside the image -> zero it ----
    @pl.when(h == 0)
    def _():
        pad_ref[0, _PADL:_PADL + W, :] = jnp.zeros((W, C), jnp.float32)

    @pl.when(h == n_h - 1)
    def _():
        pad_ref[TH + 1, _PADL:_PADL + W, :] = jnp.zeros((W, C), jnp.float32)

    # ---- depthwise 3x3 (phi & gamma share the 9 taps) + sigmoid gating, RB rows at a time ----
    # tap weights hoisted out of the row loop (JAX does not CSE broadcast_in_dim).
    wp = wphi_ref[...]
    wg = wgam_ref[...]
    wp_taps = [wp[kh, kw].reshape(1, 1, C) for kh in range(3) for kw in range(3)]
    wg_taps = [wg[kh, kw].reshape(1, 1, C) for kh in range(3) for kw in range(3)]

    def row_block(rb, carry):
        r0 = pl.multiple_of(rb * RB, RB)
        phi = jnp.zeros((RB, W, C), jnp.float32)
        gam = jnp.zeros((RB, W, C), jnp.float32)
        for k in range(9):
            kh, kw = divmod(k, 3)
            c0 = _PADL - 1 + kw
            tap = pad_ref[pl.ds(r0 + kh, RB), c0:c0 + W, :]       # one tap, two FMAs
            phi = phi + tap * wp_taps[k]
            gam = gam + tap * wg_taps[k]
        out = jax.nn.sigmoid(phi) * inp_ref[0, pl.ds(r0, RB)] + gam
        o_ref[0, pl.ds(r0, RB)] = out.astype(o_ref.dtype)
        return carry

    lax.fori_loop(0, TH // RB, row_block, 0)


def _pick_tile_h(H):
    # ~16 rows is the v7x-safe default; v6e can take 32-64 (pass tile_h explicitly).
    for cand in (16, 8):
        if H % cand == 0 and H > cand:
            return cand
    return H


def stage_interaction_fused_nhwc(inp_nhwc, enc_nhwc, dec_nhwc, params, *,
                                 tile_h=None,
                                 matmul_dtype=jnp.bfloat16,
                                 vmem_limit_bytes=48 * 1024 * 1024):
    """inp/enc/dec: (B, H, W, C) NHWC. Returns (B, H, W, C)."""
    B, H, W, C = inp_nhwc.shape
    if tile_h is None:
        tile_h = _pick_tile_h(H)
    assert H % tile_h == 0, f"H={H} must be divisible by tile_h={tile_h}"
    # TODO(synk): W not a multiple of 8 is still correct but pays sublane relayouts.
    assert W % 8 == 0, f"W={W} must be a multiple of 8 (sublane tile)"
    TH = tile_h
    nH = H // TH
    RB = 8 if TH % 8 == 0 else TH          # dwconv/epilogue row-block size

    # bf16 MXU operands (halves HBM bytes of the two largest inputs); residual `inp` stays f32.
    enc2 = enc_nhwc.reshape(B, H * W, C).astype(matmul_dtype)
    dec2 = dec_nhwc.reshape(B, H * W, C).astype(matmul_dtype)
    w1 = jnp.concatenate([params["w_enc"], params["w_dec"]], axis=0).astype(matmul_dtype)
    w_phi = params["w_phi"].astype(jnp.float32)
    w_gam = params["w_gamma"].astype(jnp.float32)

    kernel = functools.partial(_stage_interaction_kernel, TH=TH, W=W, C=C, RB=RB)

    img_spec = pl.BlockSpec((1, TH, W, C), lambda b, h: (b, h, 0, 0))
    body_spec = pl.BlockSpec((1, TH * W, C), lambda b, h: (b, h, 0))
    # 1-row halo blocks: block size W along the flattened (H*W) dim -> block index == image row.
    top_spec = pl.BlockSpec((1, W, C), lambda b, h: (b, jnp.maximum(h * TH - 1, 0), 0))
    bot_spec = pl.BlockSpec((1, W, C), lambda b, h: (b, jnp.minimum((h + 1) * TH, H - 1), 0))

    return pl.pallas_call(
        kernel,
        out_shape=jax.ShapeDtypeStruct((B, H, W, C), inp_nhwc.dtype),
        grid_spec=pltpu.PrefetchScalarGridSpec(
            num_scalar_prefetch=0,
            grid=(B, nH),
            in_specs=[
                img_spec,                                             # inp (residual, f32)
                body_spec,                                            # pre_enc body rows
                body_spec,                                            # pre_dec body rows
                top_spec,                                             # pre_enc top halo row
                top_spec,                                             # pre_dec top halo row
                bot_spec,                                             # pre_enc bottom halo row
                bot_spec,                                             # pre_dec bottom halo row
                pl.BlockSpec((2 * C, C), lambda b, h: (0, 0)),        # stacked 1x1 weight
                pl.BlockSpec((3, 3, C), lambda b, h: (0, 0, 0)),      # w_phi
                pl.BlockSpec((3, 3, C), lambda b, h: (0, 0, 0)),      # w_gamma
            ],
            out_specs=pl.BlockSpec((1, TH, W, C), lambda b, h: (b, h, 0, 0)),
            scratch_shapes=[
                pltpu.VMEM(((TH + 2) * W, 2 * C), matmul_dtype),      # assembled GEMM activation
                pltpu.VMEM((TH + 2, W + 2 * _PADL, C), jnp.float32),  # padded skip (halo rows incl.)
            ],
        ),
        compiler_params=pltpu.CompilerParams(
            dimension_semantics=("parallel", "parallel"),
            vmem_limit_bytes=vmem_limit_bytes),
    )(inp_nhwc, enc2, dec2, enc2, dec2, enc2, dec2, w1, w_phi, w_gam)


def stage_interaction(inp, pre_enc, pre_dec, params, **kwargs):
    """Forward pass of StageInteraction. inp/pre_enc/pre_dec: (B, C, H, W) NCHW."""
    to_nhwc = lambda t: jnp.transpose(t, (0, 2, 3, 1))
    out = stage_interaction_fused_nhwc(
        to_nhwc(inp), to_nhwc(pre_enc), to_nhwc(pre_dec), params, **kwargs)
    return jnp.transpose(out, (0, 3, 1, 2))


def init_params(key, dim, dtype=jnp.float32):
    """Random parameters.
       w_enc / w_dec  : (Cin, Cout)  == torch 1x1 conv weight[:, :, 0, 0].T
       w_phi / w_gamma: (3, 3, C)    == torch depthwise weight[:, 0].permute(1, 2, 0)
    """
    ks = jax.random.split(key, 4)
    return {
        "w_enc":   (0.1 * jax.random.normal(ks[0], (dim, dim))).astype(dtype),
        "w_dec":   (0.1 * jax.random.normal(ks[1], (dim, dim))).astype(dtype),
        "w_phi":   (0.1 * jax.random.normal(ks[2], (3, 3, dim))).astype(dtype),
        "w_gamma": (0.1 * jax.random.normal(ks[3], (3, 3, dim))).astype(dtype),
    }


def _reference(inp, pre_enc, pre_dec, params):
    """Pure-JAX NCHW reference of the PyTorch forward (full f32)."""
    B, C, H, W = inp.shape
    hp = jax.lax.Precision.HIGHEST
    out = (jnp.einsum('bchw,cd->bdhw', pre_enc, params["w_enc"], precision=hp) +
           jnp.einsum('bchw,cd->bdhw', pre_dec, params["w_dec"], precision=hp))
    skip = jnp.where(out >= 0, out, _NEG_SLOPE * out)

    def dwconv(x, w):  # x: (B,C,H,W), w: (3,3,C); stride 1, pad 1, groups=C
        xp = jnp.pad(x, ((0, 0), (0, 0), (1, 1), (1, 1)))
        acc = jnp.zeros_like(x)
        for kh in range(3):
            for kw in range(3):
                acc = acc + xp[:, :, kh:kh + H, kw:kw + W] * w[kh, kw][None, :, None, None]
        return acc

    phi = jax.nn.sigmoid(dwconv(skip, params["w_phi"]))
    gamma = dwconv(skip, params["w_gamma"])
    return phi * inp + gamma


if __name__ == "__main__":
    key = jax.random.PRNGKey(0)
    # H=32 with TILE_H=16 -> 2 H-tiles per image, so the halo path is actually exercised.
    B, dim, H, W = 2, 64, 32, 32

    k_inp, k_enc, k_dec, k_par = jax.random.split(key, 4)
    inp = jax.random.normal(k_inp, (B, dim, H, W), dtype=jnp.float32)
    pre_enc = jax.random.normal(k_enc, (B, dim, H, W), dtype=jnp.float32)
    pre_dec = jax.random.normal(k_dec, (B, dim, H, W), dtype=jnp.float32)
    params = init_params(k_par, dim)

    out = jax.jit(stage_interaction)(inp, pre_enc, pre_dec, params)
    out = jax.block_until_ready(out)
    assert out.shape == (B, dim, H, W), out.shape

    ref = _reference(inp, pre_enc, pre_dec, params)
    max_err = float(jnp.max(jnp.abs(out - ref)))
    # bf16 MXU operands for the 1x1 convs dominate the error; dwconv/epilogue stay f32.
    assert max_err < 5e-2, f"mismatch vs pure-JAX reference: {max_err}"

    print("KERNEL_OK")
</pallas_src>

<mosaic_0001>
module attributes {stable_mosaic.version = 11 : i64} {
  func.func @_stage_interaction_kernel(%arg0: i32, %arg1: i32, %arg2: memref<1x16x32x64xf32, #tpu.memory_space<vmem>>, %arg3: memref<1x512x64xbf16, #tpu.memory_space<vmem>>, %arg4: memref<1x512x64xbf16, #tpu.memory_space<vmem>>, %arg5: memref<1x32x64xbf16, #tpu.memory_space<vmem>>, %arg6: memref<1x32x64xbf16, #tpu.memory_space<vmem>>, %arg7: memref<1x32x64xbf16, #tpu.memory_space<vmem>>, %arg8: memref<1x32x64xbf16, #tpu.memory_space<vmem>>, %arg9: memref<128x64xbf16, #tpu.memory_space<vmem>>, %arg10: memref<3x3x64xf32, #tpu.memory_space<vmem>>, %arg11: memref<3x3x64xf32, #tpu.memory_space<vmem>>, %arg12: memref<1x16x32x64xf32, #tpu.memory_space<vmem>>, %arg13: memref<576x128xbf16, #tpu.memory_space<vmem>>, %arg14: memref<18x48x64xf32, #tpu.memory_space<vmem>>) attributes {dimension_semantics = [#tpu.dimension_semantics<parallel>, #tpu.dimension_semantics<parallel>], iteration_bounds = array<i64: 2, 2>, scalar_prefetch = 0 : i64, scratch_operands = 2 : i64, tpu.core_type = #tpu.core_type<tc>, window_params = [{transform_indices = @transform_0, window_bounds = array<i64: 1, 16, 32, 64>}, {transform_indices = @transform_1, window_bounds = array<i64: 1, 512, 64>}, {transform_indices = @transform_2, window_bounds = array<i64: 1, 512, 64>}, {transform_indices = @transform_3, window_bounds = array<i64: 1, 32, 64>}, {transform_indices = @transform_4, window_bounds = array<i64: 1, 32, 64>}, {transform_indices = @transform_5, window_bounds = array<i64: 1, 32, 64>}, {transform_indices = @transform_6, window_bounds = array<i64: 1, 32, 64>}, {pipeline_mode = #tpu.pipeline_mode<synchronous>, transform_indices = @transform_7, window_bounds = array<i64: 128, 64>}, {pipeline_mode = #tpu.pipeline_mode<synchronous>, transform_indices = @transform_8, window_bounds = array<i64: 3, 3, 64>}, {pipeline_mode = #tpu.pipeline_mode<synchronous>, transform_indices = @transform_9, window_bounds = array<i64: 3, 3, 64>}, {transform_indices = @transform_10, window_bounds = array<i64: 1, 16, 32, 64>}]} {
    %c0 = arith.constant 0 : index
    %c0_0 = arith.constant 0 : index
    %c0_1 = arith.constant 0 : index
    %0 = vector.load %arg5[%c0, %c0_0, %c0_1] : memref<1x32x64xbf16, #tpu.memory_space<vmem>>, vector<1x32x64xbf16>
    %1 = vector.shape_cast %0 : vector<1x32x64xbf16> to vector<32x64xbf16>
    %c0_2 = arith.constant 0 : index
    %c0_3 = arith.constant 0 : index
    %2 = vector.load %arg13[%c0_2, %c0_3] : memref<576x128xbf16, #tpu.memory_space<vmem>>, vector<32x64xbf16>
    tpu.vector_store %arg13[%c0_2, %c0_3], %1 {strides = array<i32>} : memref<576x128xbf16, #tpu.memory_space<vmem>>, vector<32x64xbf16>,
    %c0_4 = arith.constant 0 : index
    %c0_5 = arith.constant 0 : index
    %c0_6 = arith.constant 0 : index
    %3 = vector.load %arg6[%c0_4, %c0_5, %c0_6] : memref<1x32x64xbf16, #tpu.memory_space<vmem>>, vector<1x32x64xbf16>
    %4 = vector.shape_cast %3 : vector<1x32x64xbf16> to vector<32x64xbf16>
    %c0_7 = arith.constant 0 : index
    %c64 = arith.constant 64 : index
    %5 = vector.load %arg13[%c0_7, %c64] : memref<576x128xbf16, #tpu.memory_space<vmem>>, vector<32x64xbf16>
    tpu.vector_store %arg13[%c0_7, %c64], %4 {strides = array<i32>} : memref<576x128xbf16, #tpu.memory_space<vmem>>, vector<32x64xbf16>,
    %c0_8 = arith.constant 0 : index
    %c0_9 = arith.constant 0 : index
    %c0_10 = arith.constant 0 : index
    %6 = vector.load %arg3[%c0_8, %c0_9, %c0_10] : memref<1x512x64xbf16, #tpu.memory_space<vmem>>, vector<1x512x64xbf16>
    %7 = vector.shape_cast %6 : vector<1x512x64xbf16> to vector<512x64xbf16>
    %c32 = arith.constant 32 : index
    %c0_11 = arith.constant 0 : index
    %8 = vector.load %arg13[%c32, %c0_11] : memref<576x128xbf16, #tpu.memory_space<vmem>>, vector<512x64xbf16>
    tpu.vector_store %arg13[%c32, %c0_11], %7 {strides = array<i32>} : memref<576x128xbf16, #tpu.memory_space<vmem>>, vector<512x64xbf16>,
    %c0_12 = arith.constant 0 : index
    %c0_13 = arith.constant 0 : index
    %c0_14 = arith.constant 0 : index
    %9 = vector.load %arg4[%c0_12, %c0_13, %c0_14] : memref<1x512x64xbf16, #tpu.memory_space<vmem>>, vector<1x512x64xbf16>
    %10 = vector.shape_cast %9 : vector<1x512x64xbf16> to vector<512x64xbf16>
    %c32_15 = arith.constant 32 : index
    %c64_16 = arith.constant 64 : index
    %11 = vector.load %arg13[%c32_15, %c64_16] : memref<576x128xbf16, #tpu.memory_space<vmem>>, vector<512x64xbf16>
    tpu.vector_store %arg13[%c32_15, %c64_16], %10 {strides = array<i32>} : memref<576x128xbf16, #tpu.memory_space<vmem>>, vector<512x64xbf16>,
    %c0_17 = arith.constant 0 : index
    %c0_18 = arith.constant 0 : index
    %c0_19 = arith.constant 0 : index
    %12 = vector.load %arg7[%c0_17, %c0_18, %c0_19] : memref<1x32x64xbf16, #tpu.memory_space<vmem>>, vector<1x32x64xbf16>
    %13 = vector.shape_cast %12 : vector<1x32x64xbf16> to vector<32x64xbf16>
    %c544 = arith.constant 544 : index
    %c0_20 = arith.constant 0 : index
    %14 = vector.load %arg13[%c544, %c0_20] : memref<576x128xbf16, #tpu.memory_space<vmem>>, vector<32x64xbf16>
    tpu.vector_store %arg13[%c544, %c0_20], %13 {strides = array<i32>} : memref<576x128xbf16, #tpu.memory_space<vmem>>, vector<32x64xbf16>,
    %c0_21 = arith.constant 0 : index
    %c0_22 = arith.constant 0 : index
    %c0_23 = arith.constant 0 : index
    %15 = vector.load %arg8[%c0_21, %c0_22, %c0_23] : memref<1x32x64xbf16, #tpu.memory_space<vmem>>, vector<1x32x64xbf16>
    %16 = vector.shape_cast %15 : vector<1x32x64xbf16> to vector<32x64xbf16>
    %c544_24 = arith.constant 544 : index
    %c64_25 = arith.constant 64 : index
    %17 = vector.load %arg13[%c544_24, %c64_25] : memref<576x128xbf16, #tpu.memory_space<vmem>>, vector<32x64xbf16>
    tpu.vector_store %arg13[%c544_24, %c64_25], %16 {strides = array<i32>} : memref<576x128xbf16, #tpu.memory_space<vmem>>, vector<32x64xbf16>,
    %c0_26 = arith.constant 0 : index
    %c0_27 = arith.constant 0 : index
    %18 = vector.load %arg13[%c0_26, %c0_27] : memref<576x128xbf16, #tpu.memory_space<vmem>>, vector<576x128xbf16>
    %c0_28 = arith.constant 0 : index
    %c0_29 = arith.constant 0 : index
    %19 = vector.load %arg9[%c0_28, %c0_29] : memref<128x64xbf16, #tpu.memory_space<vmem>>, vector<128x64xbf16>
    %cst = arith.constant dense<0.000000e+00> : vector<576x64xf32>
    %20 = tpu.matmul %18, %19, %cst {dimension_numbers = #tpu.dot_dimension_numbers<[1], [0], [0], [1], [0, 0, 1, 1], [], []>} : vector<576x128xbf16>, vector<128x64xbf16>, vector<576x64xf32> -> vector<576x64xf32>
    %cst_30 = arith.constant 0.000000e+00 : f32
    %21 = vector.broadcast %cst_30 : f32 to vector<576x64xf32>
    %22 = arith.cmpf oge, %20, %21 : vector<576x64xf32>
    %cst_31 = arith.constant 0.00999999977 : f32
    %23 = vector.broadcast %cst_31 : f32 to vector<576x64xf32>
    %24 = arith.mulf %23, %20 : vector<576x64xf32>
    %25 = arith.select %22, %20, %24 : vector<576x64xi1>, vector<576x64xf32>
    %cst_32 = arith.constant 0.000000e+00 : f32
    %26 = vector.broadcast %cst_32 : f32 to vector<18x1x64xf32>
    %c0_33 = arith.constant 0 : index
    %c7 = arith.constant 7 : index
    %c0_34 = arith.constant 0 : index
    %27 = vector.load %arg14[%c0_33, %c7, %c0_34] : memref<18x48x64xf32, #tpu.memory_space<vmem>>, vector<18x1x64xf32>
    tpu.vector_store %arg14[%c0_33, %c7, %c0_34], %26 {strides = array<i32>} : memref<18x48x64xf32, #tpu.memory_space<vmem>>, vector<18x1x64xf32>,
    %c0_35 = arith.constant 0 : index
    %c40 = arith.constant 40 : index
    %c0_36 = arith.constant 0 : index
    %28 = vector.load %arg14[%c0_35, %c40, %c0_36] : memref<18x48x64xf32, #tpu.memory_space<vmem>>, vector<18x1x64xf32>
    tpu.vector_store %arg14[%c0_35, %c40, %c0_36], %26 {strides = array<i32>} : memref<18x48x64xf32, #tpu.memory_space<vmem>>, vector<18x1x64xf32>,
    %29 = vector.shape_cast %25 : vector<576x64xf32> to vector<18x32x64xf32>
    %c0_37 = arith.constant 0 : index
    %c8 = arith.constant 8 : index
    %c0_38 = arith.constant 0 : index
    %30 = vector.load %arg14[%c0_37, %c8, %c0_38] : memref<18x48x64xf32, #tpu.memory_space<vmem>>, vector<18x32x64xf32>
    tpu.vector_store %arg14[%c0_37, %c8, %c0_38], %29 {strides = array<i32>} : memref<18x48x64xf32, #tpu.memory_space<vmem>>, vector<18x32x64xf32>,
    %c0_i32 = arith.constant 0 : i32
    %31 = arith.cmpi eq, %arg1, %c0_i32 : i32
    %32 = arith.extui %31 : i1 to i32
    %c0_i32_39 = arith.constant 0 : i32
    %33 = arith.cmpi ne, %32, %c0_i32_39 : i32
    scf.if %33 {
      %cst_50 = arith.constant 0.000000e+00 : f32
      %94 = vector.broadcast %cst_50 : f32 to vector<32x64xf32>
      %c0_51 = arith.constant 0 : index
      %c8_52 = arith.constant 8 : index
      %c0_53 = arith.constant 0 : index
      %95 = vector.load %arg14[%c0_51, %c8_52, %c0_53] : memref<18x48x64xf32, #tpu.memory_space<vmem>>, vector<1x32x64xf32>
      %96 = vector.shape_cast %95 : vector<1x32x64xf32> to vector<32x64xf32>
      %97 = vector.shape_cast %94 : vector<32x64xf32> to vector<1x32x64xf32>
      tpu.vector_store %arg14[%c0_51, %c8_52, %c0_53], %97 {strides = array<i32>} : memref<18x48x64xf32, #tpu.memory_space<vmem>>, vector<1x32x64xf32>,
    } else {
    }
    %c1_i32 = arith.constant 1 : i32
    %34 = arith.cmpi eq, %arg1, %c1_i32 : i32
    %35 = arith.extui %34 : i1 to i32
    %c0_i32_40 = arith.constant 0 : i32
    %36 = arith.cmpi ne, %35, %c0_i32_40 : i32
    scf.if %36 {
      %cst_50 = arith.constant 0.000000e+00 : f32
      %94 = vector.broadcast %cst_50 : f32 to vector<32x64xf32>
      %c17 = arith.constant 17 : index
      %c8_51 = arith.constant 8 : index
      %c0_52 = arith.constant 0 : index
      %95 = vector.load %arg14[%c17, %c8_51, %c0_52] : memref<18x48x64xf32, #tpu.memory_space<vmem>>, vector<1x32x64xf32>
      %96 = vector.shape_cast %95 : vector<1x32x64xf32> to vector<32x64xf32>
      %97 = vector.shape_cast %94 : vector<32x64xf32> to vector<1x32x64xf32>
      tpu.vector_store %arg14[%c17, %c8_51, %c0_52], %97 {strides = array<i32>} : memref<18x48x64xf32, #tpu.memory_space<vmem>>, vector<1x32x64xf32>,
    } else {
    }
    %c0_41 = arith.constant 0 : index
    %c0_42 = arith.constant 0 : index
    %c0_43 = arith.constant 0 : index
    %37 = vector.load %arg10[%c0_41, %c0_42, %c0_43] : memref<3x3x64xf32, #tpu.memory_space<vmem>>, vector<3x3x64xf32>
    %c0_44 = arith.constant 0 : index
    %c0_45 = arith.constant 0 : index
    %c0_46 = arith.constant 0 : index
    %38 = vector.load %arg11[%c0_44, %c0_45, %c0_46] : memref<3x3x64xf32, #tpu.memory_space<vmem>>, vector<3x3x64xf32>
    %39 = vector.extract_strided_slice %37 {offsets = [0, 0, 0], sizes = [1, 1, 64], strides = [1, 1, 1]} : vector<3x3x64xf32> to vector<1x1x64xf32>
    %40 = vector.shape_cast %39 : vector<1x1x64xf32> to vector<64xf32>
    %41 = vector.shape_cast %40 : vector<64xf32> to vector<1x1x64xf32>
    %42 = vector.extract_strided_slice %37 {offsets = [0, 1, 0], sizes = [1, 1, 64], strides = [1, 1, 1]} : vector<3x3x64xf32> to vector<1x1x64xf32>
    %43 = vector.shape_cast %42 : vector<1x1x64xf32> to vector<64xf32>
    %44 = vector.shape_cast %43 : vector<64xf32> to vector<1x1x64xf32>
    %45 = vector.extract_strided_slice %37 {offsets = [0, 2, 0], sizes = [1, 1, 64], strides = [1, 1, 1]} : vector<3x3x64xf32> to vector<1x1x64xf32>
    %46 = vector.shape_cast %45 : vector<1x1x64xf32> to vector<64xf32>
    %47 = vector.shape_cast %46 : vector<64xf32> to vector<1x1x64xf32>
    %48 = vector.extract_strided_slice %37 {offsets = [1, 0, 0], sizes = [1, 1, 64], strides = [1, 1, 1]} : vector<3x3x64xf32> to vector<1x1x64xf32>
    %49 = vector.shape_cast %48 : vector<1x1x64xf32> to vector<64xf32>
    %50 = vector.shape_cast %49 : vector<64xf32> to vector<1x1x64xf32>
    %51 = vector.extract_strided_slice %37 {offsets = [1, 1, 0], sizes = [1, 1, 64], strides = [1, 1, 1]} : vector<3x3x64xf32> to vector<1x1x64xf32>
    %52 = vector.shape_cast %51 : vector<1x1x64xf32> to vector<64xf32>
    %53 = vector.shape_cast %52 : vector<64xf32> to vector<1x1x64xf32>
    %54 = vector.extract_strided_slice %37 {offsets = [1, 2, 0], sizes = [1, 1, 64], strides = [1, 1, 1]} : vector<3x3x64xf32> to vector<1x1x64xf32>
    %55 = vector.shape_cast %54 : vector<1x1x64xf32> to vector<64xf32>
    %56 = vector.shape_cast %55 : vector<64xf32> to vector<1x1x64xf32>
    %57 = vector.extract_strided_slice %37 {offsets = [2, 0, 0], sizes = [1, 1, 64], strides = [1, 1, 1]} : vector<3x3x64xf32> to vector<1x1x64xf32>
    %58 = vector.shape_cast %57 : vector<1x1x64xf32> to vector<64xf32>
    %59 = vector.shape_cast %58 : vector<64xf32> to vector<1x1x64xf32>
    %60 = vector.extract_strided_slice %37 {offsets = [2, 1, 0], sizes = [1, 1, 64], strides = [1, 1, 1]} : vector<3x3x64xf32> to vector<1x1x64xf32>
    %61 = vector.shape_cast %60 : vector<1x1x64xf32> to vector<64xf32>
    %62 = vector.shape_cast %61 : vector<64xf32> to vector<1x1x64xf32>
    %63 = vector.extract_strided_slice %37 {offsets = [2, 2, 0], sizes = [1, 1, 64], strides = [1, 1, 1]} : vector<3x3x64xf32> to vector<1x1x64xf32>
    %64 = vector.shape_cast %63 : vector<1x1x64xf32> to vector<64xf32>
    %65 = vector.shape_cast %64 : vector<64xf32> to vector<1x1x64xf32>
    %66 = vector.extract_strided_slice %38 {offsets = [0, 0, 0], sizes = [1, 1, 64], strides = [1, 1, 1]} : vector<3x3x64xf32> to vector<1x1x64xf32>
    %67 = vector.shape_cast %66 : vector<1x1x64xf32> to vector<64xf32>
    %68 = vector.shape_cast %67 : vector<64xf32> to vector<1x1x64xf32>
    %69 = vector.extract_strided_slice %38 {offsets = [0, 1, 0], sizes = [1, 1, 64], strides = [1, 1, 1]} : vector<3x3x64xf32> to vector<1x1x64xf32>
    %70 = vector.shape_cast %69 : vector<1x1x64xf32> to vector<64xf32>
    %71 = vector.shape_cast %70 : vector<64xf32> to vector<1x1x64xf32>
    %72 = vector.extract_strided_slice %38 {offsets = [0, 2, 0], sizes = [1, 1, 64], strides = [1, 1, 1]} : vector<3x3x64xf32> to vector<1x1x64xf32>
    %73 = vector.shape_cast %72 : vector<1x1x64xf32> to vector<64xf32>
    %74 = vector.shape_cast %73 : vector<64xf32> to vector<1x1x64xf32>
    %75 = vector.extract_strided_slice %38 {offsets = [1, 0, 0], sizes = [1, 1, 64], strides = [1, 1, 1]} : vector<3x3x64xf32> to vector<1x1x64xf32>
    %76 = vector.shape_cast %75 : vector<1x1x64xf32> to vector<64xf32>
    %77 = vector.shape_cast %76 : vector<64xf32> to vector<1x1x64xf32>
    %78 = vector.extract_strided_slice %38 {offsets = [1, 1, 0], sizes = [1, 1, 64], strides = [1, 1, 1]} : vector<3x3x64xf32> to vector<1x1x64xf32>
    %79 = vector.shape_cast %78 : vector<1x1x64xf32> to vector<64xf32>
    %80 = vector.shape_cast %79 : vector<64xf32> to vector<1x1x64xf32>
    %81 = vector.extract_strided_slice %38 {offsets = [1, 2, 0], sizes = [1, 1, 64], strides = [1, 1, 1]} : vector<3x3x64xf32> to vector<1x1x64xf32>
    %82 = vector.shape_cast %81 : vector<1x1x64xf32> to vector<64xf32>
    %83 = vector.shape_cast %82 : vector<64xf32> to vector<1x1x64xf32>
    %84 = vector.extract_strided_slice %38 {offsets = [2, 0, 0], sizes = [1, 1, 64], strides = [1, 1, 1]} : vector<3x3x64xf32> to vector<1x1x64xf32>
    %85 = vector.shape_cast %84 : vector<1x1x64xf32> to vector<64xf32>
    %86 = vector.shape_cast %85 : vector<64xf32> to vector<1x1x64xf32>
    %87 = vector.extract_strided_slice %38 {offsets = [2, 1, 0], sizes = [1, 1, 64], strides = [1, 1, 1]} : vector<3x3x64xf32> to vector<1x1x64xf32>
    %88 = vector.shape_cast %87 : vector<1x1x64xf32> to vector<64xf32>
    %89 = vector.shape_cast %88 : vector<64xf32> to vector<1x1x64xf32>
    %90 = vector.extract_strided_slice %38 {offsets = [2, 2, 0], sizes = [1, 1, 64], strides = [1, 1, 1]} : vector<3x3x64xf32> to vector<1x1x64xf32>
    %91 = vector.shape_cast %90 : vector<1x1x64xf32> to vector<64xf32>
    %92 = vector.shape_cast %91 : vector<64xf32> to vector<1x1x64xf32>
    %c0_i32_47 = arith.constant 0 : i32
    %c2_i32 = arith.constant 2 : i32
    %93 = arith.addi %c0_i32_47, %c2_i32 : i32
    %c1_i32_48 = arith.constant 1 : i32
    scf.for %arg15 = %c0_i32_47 to %93 step %c1_i32_48  : i32 {
      %c8_i32 = arith.constant 8 : i32
      %94 = arith.muli %arg15, %c8_i32 : i32
      %95 = tpu.assume_multiple %94, 8 : i32
      %cst_50 = arith.constant 0.000000e+00 : f32
      %96 = vector.broadcast %cst_50 : f32 to vector<8x32x64xf32>
      %cst_51 = arith.constant 0.000000e+00 : f32
      %97 = vector.broadcast %cst_51 : f32 to vector<8x32x64xf32>
      %c0_i32_52 = arith.constant 0 : i32
      %98 = arith.addi %95, %c0_i32_52 : i32
      %99 = arith.index_cast %98 : i32 to index
      %c7_53 = arith.constant 7 : index
      %c0_54 = arith.constant 0 : index
      %100 = vector.load %arg14[%99, %c7_53, %c0_54] : memref<18x48x64xf32, #tpu.memory_space<vmem>>, vector<8x32x64xf32>
      %101 = vector.broadcast %41 : vector<1x1x64xf32> to vector<8x32x64xf32>
      %102 = arith.mulf %100, %101 : vector<8x32x64xf32>
      %103 = arith.addf %96, %102 : vector<8x32x64xf32>
      %104 = vector.broadcast %68 : vector<1x1x64xf32> to vector<8x32x64xf32>
      %105 = arith.mulf %100, %104 : vector<8x32x64xf32>
      %106 = arith.addf %97, %105 : vector<8x32x64xf32>
      %c0_i32_55 = arith.constant 0 : i32
      %107 = arith.addi %95, %c0_i32_55 : i32
      %108 = arith.index_cast %107 : i32 to index
      %c8_56 = arith.constant 8 : index
      %c0_57 = arith.constant 0 : index
      %109 = vector.load %arg14[%108, %c8_56, %c0_57] : memref<18x48x64xf32, #tpu.memory_space<vmem>>, vector<8x32x64xf32>
      %110 = vector.broadcast %44 : vector<1x1x64xf32> to vector<8x32x64xf32>
      %111 = arith.mulf %109, %110 : vector<8x32x64xf32>
      %112 = arith.addf %103, %111 : vector<8x32x64xf32>
      %113 = vector.broadcast %71 : vector<1x1x64xf32> to vector<8x32x64xf32>
      %114 = arith.mulf %109, %113 : vector<8x32x64xf32>
      %115 = arith.addf %106, %114 : vector<8x32x64xf32>
      %c0_i32_58 = arith.constant 0 : i32
      %116 = arith.addi %95, %c0_i32_58 : i32
      %117 = arith.index_cast %116 : i32 to index
      %c9 = arith.constant 9 : index
      %c0_59 = arith.constant 0 : index
      %118 = vector.load %arg14[%117, %c9, %c0_59] : memref<18x48x64xf32, #tpu.memory_space<vmem>>, vector<8x32x64xf32>
      %119 = vector.broadcast %47 : vector<1x1x64xf32> to vector<8x32x64xf32>
      %120 = arith.mulf %118, %119 : vector<8x32x64xf32>
      %121 = arith.addf %112, %120 : vector<8x32x64xf32>
      %122 = vector.broadcast %74 : vector<1x1x64xf32> to vector<8x32x64xf32>
      %123 = arith.mulf %118, %122 : vector<8x32x64xf32>
      %124 = arith.addf %115, %123 : vector<8x32x64xf32>
      %c1_i32_60 = arith.constant 1 : i32
      %125 = arith.addi %95, %c1_i32_60 : i32
      %126 = arith.index_cast %125 : i32 to index
      %c7_61 = arith.constant 7 : index
      %c0_62 = arith.constant 0 : index
      %127 = vector.load %arg14[%126, %c7_61, %c0_62] : memref<18x48x64xf32, #tpu.memory_space<vmem>>, vector<8x32x64xf32>
      %128 = vector.broadcast %50 : vector<1x1x64xf32> to vector<8x32x64xf32>
      %129 = arith.mulf %127, %128 : vector<8x32x64xf32>
      %130 = arith.addf %121, %129 : vector<8x32x64xf32>
      %131 = vector.broadcast %77 : vector<1x1x64xf32> to vector<8x32x64xf32>
      %132 = arith.mulf %127, %131 : vector<8x32x64xf32>
      %133 = arith.addf %124, %132 : vector<8x32x64xf32>
      %c1_i32_63 = arith.constant 1 : i32
      %134 = arith.addi %95, %c1_i32_63 : i32
      %135 = arith.index_cast %134 : i32 to index
      %c8_64 = arith.constant 8 : index
      %c0_65 = arith.constant 0 : index
      %136 = vector.load %arg14[%135, %c8_64, %c0_65] : memref<18x48x64xf32, #tpu.memory_space<vmem>>, vector<8x32x64xf32>
      %137 = vector.broadcast %53 : vector<1x1x64xf32> to vector<8x32x64xf32>
      %138 = arith.mulf %136, %137 : vector<8x32x64xf32>
      %139 = arith.addf %130, %138 : vector<8x32x64xf32>
      %140 = vector.broadcast %80 : vector<1x1x64xf32> to vector<8x32x64xf32>
      %141 = arith.mulf %136, %140 : vector<8x32x64xf32>
      %142 = arith.addf %133, %141 : vector<8x32x64xf32>
      %c1_i32_66 = arith.constant 1 : i32
      %143 = arith.addi %95, %c1_i32_66 : i32
      %144 = arith.index_cast %143 : i32 to index
      %c9_67 = arith.constant 9 : index
      %c0_68 = arith.constant 0 : index
      %145 = vector.load %arg14[%144, %c9_67, %c0_68] : memref<18x48x64xf32, #tpu.memory_space<vmem>>, vector<8x32x64xf32>
      %146 = vector.broadcast %56 : vector<1x1x64xf32> to vector<8x32x64xf32>
      %147 = arith.mulf %145, %146 : vector<8x32x64xf32>
      %148 = arith.addf %139, %147 : vector<8x32x64xf32>
      %149 = vector.broadcast %83 : vector<1x1x64xf32> to vector<8x32x64xf32>
      %150 = arith.mulf %145, %149 : vector<8x32x64xf32>
      %151 = arith.addf %142, %150 : vector<8x32x64xf32>
      %c2_i32_69 = arith.constant 2 : i32
      %152 = arith.addi %95, %c2_i32_69 : i32
      %153 = arith.index_cast %152 : i32 to index
      %c7_70 = arith.constant 7 : index
      %c0_71 = arith.constant 0 : index
      %154 = vector.load %arg14[%153, %c7_70, %c0_71] : memref<18x48x64xf32, #tpu.memory_space<vmem>>, vector<8x32x64xf32>
      %155 = vector.broadcast %59 : vector<1x1x64xf32> to vector<8x32x64xf32>
      %156 = arith.mulf %154, %155 : vector<8x32x64xf32>
      %157 = arith.addf %148, %156 : vector<8x32x64xf32>
      %158 = vector.broadcast %86 : vector<1x1x64xf32> to vector<8x32x64xf32>
      %159 = arith.mulf %154, %158 : vector<8x32x64xf32>
      %160 = arith.addf %151, %159 : vector<8x32x64xf32>
      %c2_i32_72 = arith.constant 2 : i32
      %161 = arith.addi %95, %c2_i32_72 : i32
      %162 = arith.index_cast %161 : i32 to index
      %c8_73 = arith.constant 8 : index
      %c0_74 = arith.constant 0 : index
      %163 = vector.load %arg14[%162, %c8_73, %c0_74] : memref<18x48x64xf32, #tpu.memory_space<vmem>>, vector<8x32x64xf32>
      %164 = vector.broadcast %62 : vector<1x1x64xf32> to vector<8x32x64xf32>
      %165 = arith.mulf %163, %164 : vector<8x32x64xf32>
      %166 = arith.addf %157, %165 : vector<8x32x64xf32>
      %167 = vector.broadcast %89 : vector<1x1x64xf32> to vector<8x32x64xf32>
      %168 = arith.mulf %163, %167 : vector<8x32x64xf32>
      %169 = arith.addf %160, %168 : vector<8x32x64xf32>
      %c2_i32_75 = arith.constant 2 : i32
      %170 = arith.addi %95, %c2_i32_75 : i32
      %171 = arith.index_cast %170 : i32 to index
      %c9_76 = arith.constant 9 : index
      %c0_77 = arith.constant 0 : index
      %172 = vector.load %arg14[%171, %c9_76, %c0_77] : memref<18x48x64xf32, #tpu.memory_space<vmem>>, vector<8x32x64xf32>
      %173 = vector.broadcast %65 : vector<1x1x64xf32> to vector<8x32x64xf32>
      %174 = arith.mulf %172, %173 : vector<8x32x64xf32>
      %175 = arith.addf %166, %174 : vector<8x32x64xf32>
      %176 = vector.broadcast %92 : vector<1x1x64xf32> to vector<8x32x64xf32>
      %177 = arith.mulf %172, %176 : vector<8x32x64xf32>
      %178 = arith.addf %169, %177 : vector<8x32x64xf32>
      %179 = arith.negf %175 : vector<8x32x64xf32>
      %180 = math.exp %179 : vector<8x32x64xf32>
      %cst_78 = arith.constant 1.000000e+00 : f32
      %181 = vector.broadcast %cst_78 : f32 to vector<8x32x64xf32>
      %182 = arith.addf %181, %180 : vector<8x32x64xf32>
      %183 = arith.divf %181, %182 : vector<8x32x64xf32>
      %c0_79 = arith.constant 0 : index
      %184 = arith.index_cast %95 : i32 to index
      %c0_80 = arith.constant 0 : index
      %c0_81 = arith.constant 0 : index
      %185 = vector.load %arg2[%c0_79, %184, %c0_80, %c0_81] : memref<1x16x32x64xf32, #tpu.memory_space<vmem>>, vector<1x8x32x64xf32>
      %186 = vector.shape_cast %185 : vector<1x8x32x64xf32> to vector<8x32x64xf32>
      %187 = arith.mulf %183, %186 : vector<8x32x64xf32>
      %188 = arith.addf %187, %178 : vector<8x32x64xf32>
      %c0_82 = arith.constant 0 : index
      %189 = arith.index_cast %95 : i32 to index
      %c0_83 = arith.constant 0 : index
      %c0_84 = arith.constant 0 : index
      %190 = vector.load %arg12[%c0_82, %189, %c0_83, %c0_84] : memref<1x16x32x64xf32, #tpu.memory_space<vmem>>, vector<1x8x32x64xf32>
      %191 = vector.shape_cast %190 : vector<1x8x32x64xf32> to vector<8x32x64xf32>
      %192 = vector.shape_cast %188 : vector<8x32x64xf32> to vector<1x8x32x64xf32>
      tpu.vector_store %arg12[%c0_82, %189, %c0_83, %c0_84], %192 {strides = array<i32>} : memref<1x16x32x64xf32, #tpu.memory_space<vmem>>, vector<1x8x32x64xf32>,
    }
    %c2_i32_49 = arith.constant 2 : i32
    return
  }
  func.func @transform_0(%arg0: i32, %arg1: i32) -> (i32, i32, i32, i32) {
    %c0_i32 = arith.constant 0 : i32
    %c0_i32_0 = arith.constant 0 : i32
    %c0_i32_1 = arith.constant 0 : i32
    return %arg0, %arg1, %c0_i32, %c0_i32_0 : i32, i32, i32, i32
  }
  func.func @transform_1(%arg0: i32, %arg1: i32) -> (i32, i32, i32) {
    %c0_i32 = arith.constant 0 : i32
    %c0_i32_0 = arith.constant 0 : i32
    return %arg0, %arg1, %c0_i32 : i32, i32, i32
  }
  func.func @transform_2(%arg0: i32, %arg1: i32) -> (i32, i32, i32) {
    %c0_i32 = arith.constant 0 : i32
    %c0_i32_0 = arith.constant 0 : i32
    return %arg0, %arg1, %c0_i32 : i32, i32, i32
  }
  func.func @transform_3(%arg0: i32, %arg1: i32) -> (i32, i32, i32) {
    %c16_i32 = arith.constant 16 : i32
    %0 = arith.muli %arg1, %c16_i32 : i32
    %c1_i32 = arith.constant 1 : i32
    %1 = arith.subi %0, %c1_i32 : i32
    %c0_i32 = arith.constant 0 : i32
    %2 = arith.maxsi %1, %c0_i32 : i32
    %c0_i32_0 = arith.constant 0 : i32
    %c0_i32_1 = arith.constant 0 : i32
    return %arg0, %2, %c0_i32_0 : i32, i32, i32
  }
  func.func @transform_4(%arg0: i32, %arg1: i32) -> (i32, i32, i32) {
    %c16_i32 = arith.constant 16 : i32
    %0 = arith.muli %arg1, %c16_i32 : i32
    %c1_i32 = arith.constant 1 : i32
    %1 = arith.subi %0, %c1_i32 : i32
    %c0_i32 = arith.constant 0 : i32
    %2 = arith.maxsi %1, %c0_i32 : i32
    %c0_i32_0 = arith.constant 0 : i32
    %c0_i32_1 = arith.constant 0 : i32
    return %arg0, %2, %c0_i32_0 : i32, i32, i32
  }
  func.func @transform_5(%arg0: i32, %arg1: i32) -> (i32, i32, i32) {
    %c1_i32 = arith.constant 1 : i32
    %0 = arith.addi %arg1, %c1_i32 : i32
    %c16_i32 = arith.constant 16 : i32
    %1 = arith.muli %0, %c16_i32 : i32
    %c31_i32 = arith.constant 31 : i32
    %2 = arith.minsi %1, %c31_i32 : i32
    %c0_i32 = arith.constant 0 : i32
    %c0_i32_0 = arith.constant 0 : i32
    return %arg0, %2, %c0_i32 : i32, i32, i32
  }
  func.func @transform_6(%arg0: i32, %arg1: i32) -> (i32, i32, i32) {
    %c1_i32 = arith.constant 1 : i32
    %0 = arith.addi %arg1, %c1_i32 : i32
    %c16_i32 = arith.constant 16 : i32
    %1 = arith.muli %0, %c16_i32 : i32
    %c31_i32 = arith.constant 31 : i32
    %2 = arith.minsi %1, %c31_i32 : i32
    %c0_i32 = arith.constant 0 : i32
    %c0_i32_0 = arith.constant 0 : i32
    return %arg0, %2, %c0_i32 : i32, i32, i32
  }
  func.func @transform_7(%arg0: i32, %arg1: i32) -> (i32, i32) {
    %c0_i32 = arith.constant 0 : i32
    %c0_i32_0 = arith.constant 0 : i32
    %c0_i32_1 = arith.constant 0 : i32
    return %c0_i32, %c0_i32_0 : i32, i32
  }
  func.func @transform_8(%arg0: i32, %arg1: i32) -> (i32, i32, i32) {
    %c0_i32 = arith.constant 0 : i32
    %c0_i32_0 = arith.constant 0 : i32
    %c0_i32_1 = arith.constant 0 : i32
    %c0_i32_2 = arith.constant 0 : i32
    return %c0_i32, %c0_i32_0, %c0_i32_1 : i32, i32, i32
  }
  func.func @transform_9(%arg0: i32, %arg1: i32) -> (i32, i32, i32) {
    %c0_i32 = arith.constant 0 : i32
    %c0_i32_0 = arith.constant 0 : i32
    %c0_i32_1 = arith.constant 0 : i32
    %c0_i32_2 = arith.constant 0 : i32
    return %c0_i32, %c0_i32_0, %c0_i32_1 : i32, i32, i32
  }
  func.func @transform_10(%arg0: i32, %arg1: i32) -> (i32, i32, i32, i32) {
    %c0_i32 = arith.constant 0 : i32
    %c0_i32_0 = arith.constant 0 : i32
    %c0_i32_1 = arith.constant 0 : i32
    return %arg0, %arg1, %c0_i32, %c0_i32_0 : i32, i32, i32, i32
  }
}

</mosaic_0001>

<bundles_post_ra>
// kernel: stage_interaction.1
= control target key start
LH: loop header
LB: loop body
LE: loop exit
PB: predicated region body
PF: predicated region fallthrough
CT: control target
= control target key end

     0   :  { %s7487_s0 = inlined_call_operand.vmem [shape: f32[2,32,32,64], index: 0, kind: input, shape index: {}]   ;;  %s7488_s1 = inlined_call_operand.vmem [shape: bf16[2,1024,64], index: 1, kind: input, shape index: {}, may-alias: {1,3,5}]   ;;  %s7489_s2 = inlined_call_operand.vmem [shape: bf16[2,1024,64], index: 2, kind: input, shape index: {}, may-alias: {2,4,6}]   ;;  %s7490_s3 = inlined_call_operand.vmem [shape: bf16[2,1024,64], index: 3, kind: input, shape index: {}, may-alias: {1,3,5}]   ;;  %s7491_s4 = inlined_call_operand.vmem [shape: bf16[2,1024,64], index: 4, kind: input, shape index: {}, may-alias: {2,4,6}]   ;;  %s7492_s5 = inlined_call_operand.vmem [shape: bf16[2,1024,64], index: 5, kind: input, shape index: {}, may-alias: {1,3,5}]   ;;  %s7493_s6 = inlined_call_operand.vmem [shape: bf16[2,1024,64], index: 6, kind: input, shape index: {}, may-alias: {2,4,6}]   ;;  %s7494_s7 = inlined_call_operand.vmem [shape: bf16[128,64], index: 7, kind: input, shape index: {}]   ;;  %s7495_s8 = inlined_call_operand.vmem [shape: f32[3,3,64], index: 8, kind: input, shape index: {}]   ;;  %s7496_s9 = inlined_call_operand.vmem [shape: f32[3,3,64], index: 9, kind: input, shape index: {}]   ;;  %s7497_s10 = inlined_call_operand.hbm [shape: f32[2,32,32,64], index: 10, kind: output, shape index: {}]  }
   0x1   :  { %7614 = sst [smem:[#allocation36_spill]] %s7489_s2 }
   0x2   :  { %7615 = sst [smem:[#allocation37_spill]] %s7497_s10 }
   0x3   :  { %15 = vsyncpa [#allocation5], 0 }
   0x4   :  { %17 = vsyncpa [#allocation5 + $0x1], 0  ;;  %s5278_s13 = smov 0   ;;  %s5280_s14 = smov 0  }
   0x5   :  { %s5282_s15 = smov 0   ;;  %s5284_s16 = smov 0  }
   0x6   :  { %s5286_s17 = smov 0   ;;  %s5288_s18 = smov 0  }
   0x7   :  { %s5290_s19 = smov 0   ;;  %s5292_s20 = smov 0  }
   0x8 LB: > { %7616 = sst [smem:[#allocation7_spill]] %s5182_s13  ;;  %s4291_s21 = sadd.s32 4294967295, %s5210_s20   ;;  %s5210_s20 = sphi %s5292_s20, %s23_s20   ;;  %s5206_s19 = sphi %s5290_s19, %s7751_s19   ;;  %s5202_s18 = sphi %s5288_s18, %s7750_s18   ;;  %s5198_s17 = sphi %s5286_s17, %s7754_s17   ;;  %s5194_s16 = sphi %s5284_s16, %s7748_s16   ;;  %s5190_s15 = sphi %s5282_s15, %s7747_s15   ;;  %s5186_s14 = sphi %s5280_s14, %s7753_s14   ;;  %s5182_s13 = sphi %s5278_s13, %s7752_s13  }
   0x9   : > { %7617 = sst [smem:[#allocation8_spill]] %s5190_s15  ;;  %s4292_s22 = sadd.s32 4294967294, %s5210_s20  }
   0xa   : > { %7618 = sst [smem:[#allocation9_spill]] %s5202_s18  ;;  %s32_s23 = sadd.s32 1, %s5202_s18 }
   0xb   : > { %7619 = sst [smem:[#allocation10_spill]] %s5206_s19  ;;  %p33_p0 = scmp.ge.s32.totalorder %s32_s23, 2 }
   0xc   : > { %7620 = sst [smem:[#allocation11_spill]] %s5210_s20  ;;  %s35_s24 = sadd.s32 1, %s5206_s19 }
   0xd   : > { %p345_p1 = scmp.ne.s32.totalorder %s5190_s15, %s5186_s14  ;;  %p346_p2 = scmp.eq.s32.totalorder %s4291_s21, 3 }
   0xe   : > { %s7756_s23 = smov (%p33_p0, %s32_s23), 0  ;;  %s7758_s24 = smov (!%p33_p0, %s35_s24), %s5206_s19 }
   0xf   : > { %7621 = sst [smem:[#allocation12_spill]] %s7756_s23  ;;  %s331_s25 = ssub.s32 %s5202_s18, %s7756_s23 }
  0x10   : > { %p5329_p3 = por %p346_p2, %p345_p1  ;;  %p37_p4 = scmp.ge.s32.totalorder %s7758_s24, 2 }
  0x11   : > { %p351_p5 = scmp.ne.s32.totalorder %s5186_s14, %s5182_s13  ;;  %p352_p6 = scmp.eq.s32.totalorder %s4292_s22, 3 }
  0x12   : > { %s7622_s26 = scalar_select %p5329_p3, 1, 0 }
  0x13   : > { %p4307_p7 = scmp.ge.s32.totalorder %s5210_s20, 1  ;;  %s7760_s24 = smov (%p37_p4, %s7758_s24), 0 }
  0x14   : > { %7623 = sst [smem:[#allocation13_spill]] %s7622_s26  ;;  %p5338_p8 = por %p352_p6, %p351_p5 }
  0x15   : > { %7624 = sst [smem:[#allocation14_spill]] %s7760_s24  ;;  %p503_p9 = scmp.lt.s32.totalorder %s5210_s20, 5 }
  0x16   : > { %s7625_s27 = scalar_select %p5338_p8, 1, 0 }
  0x17   : > { %s330_s28 = ssub.s32 %s5206_s19, %s7760_s24  ;;  %s335_s29 = sadd.s32 1, %s5190_s15 }
  0x18   : > { %7626 = sst [smem:[#allocation15_spill]] %s7625_s27  ;;  %s332_s30 = sor.u32 %s331_s25, %s330_s28 }
  0x19   : > { %p504_p10 = pnand %p4307_p7, %p503_p9  ;;  %p333_p11 = scmp.eq.s32.totalorder %s332_s30, 0 }
  0x1b   : > { %s5347_s11 = scalar_select %p333_p11, %s5190_s15, %s335_s29  }
  0x1c   : > { %507 = sbr.rel (%p504_p10) target bundleno = 849 (0x351), region = 60 }
  0x1d   : > { %7627 = sst [smem:[#allocation16_spill]] %s5347_s11 }
  0x23   : > { %p617_p12 = scmp.lt.s32.totalorder %s5198_s17, 1  ;;  %s5351_s12 = sshll.u32 %s5194_s16, 6  ;;  %v4940_v0 = vld [vmem:[%s7494_s7] sm:$0xff]   ;;  %v4941_v1 = vld [vmem:[%s7494_s7 + $0x8] sm:$0xff]   ;;  %v4942_v2 = vld [vmem:[%s7494_s7 + $0x10] sm:$0xff]   ;;  %vm737_vm0 = vcmask 523264  }
  0x24   : > { %p630_p13 = scmp.lt.s32.totalorder %s5351_s12, 127  ;;  %4715 = vmatprep.subr.bf16.mxu0 %v4940_v0  ;;  %4803 = vmatprep.subr.bf16.mxu1 %v4940_v0  ;;  %s5365_s23 = sshll.u32 %s5194_s16, 4  ;;  %v4943_v4 = vld [vmem:[%s7494_s7 + $0x18] sm:$0xff]   ;;  %v4944_v5 = vld [vmem:[%s7494_s7 + $0x20] sm:$0xff]   ;;  %v4946_v6 = vld [vmem:[%s7494_s7 + $0x28] sm:$0xff]   ;;  %vm760_vm1 = vcmask 1048064  }
  0x25   : > { %s618_s29 = scalar_select %p617_p12, %s5198_s17, 1  ;;  %4716 = vmatpush3.bf16.msra.mxu0 %v4940_v0  ;;  %4811 = vmatpush3.bf16.msra.mxu1 %v4940_v0  ;;  %v4949_v28 = vld [vmem:[%s7494_s7 + $0x30] sm:$0xff]   ;;  %v4951_v30 = vld [vmem:[%s7494_s7 + $0x38] sm:$0xff]   ;;  %vm2080_vm2 = vcmask 516096  }
  0x26   : > { %s631_s30 = scalar_select %p630_p13, %s5351_s12, 127  ;;  %4717 = vmatprep.subr.bf16.mxu0 %v4941_v1  ;;  %4804 = vmatprep.subr.bf16.mxu1 %v4941_v1 }
  0x27   : > { %s5362_s24 = sshll.u32 %s618_s29, 7  ;;  %s4320_s21 = sadd.s32 4294967295, %s5365_s23 }
  0x28   : > { %s633_s19 = sadd.s32 %s5362_s24, %s631_s30  ;;  %p649_p0 = scmp.gt.s32.totalorder %s4320_s21, 0 }
  0x29   : > { %s5372_s28 = sshll.u32 %s633_s19, 2  ;;  %s7628_s2 = sld [smem:[#allocation36_spill]]  ;;  %4718 = vmatpush3.bf16.msra.mxu0 %v4941_v1  ;;  %4812 = vmatpush3.bf16.msra.mxu1 %v4941_v1 }
  0x2a   : > { %s7762_s21 = smov (!%p649_p0, %s4320_s21), 0  ;;  %p619_p1 = scmp.lt.s32.totalorder %s5365_s23, 31  ;;  %4719 = vmatprep.subr.bf16.mxu0 %v4942_v2  ;;  %4805 = vmatprep.subr.bf16.mxu1 %v4942_v2 }
  0x2b   : > { %s7504_s22 = smov 64   ;;  %s4321_s18 = sshll.u32 %s7762_s21, 2 }
  0x2c   : > { %p654_p2 = scmp.lt.s32.totalorder %s4321_s18, 127  ;;  %s613_s13 = sand.u32 1, %s5186_s14  }
  0x2d   : > { %s620_s25 = scalar_select %p619_p1, %s5365_s23, 31  ;;  %4720 = vmatpush3.bf16.msra.mxu0 %v4942_v2  ;;  %4813 = vmatpush3.bf16.msra.mxu1 %v4942_v2 }
  0x2e   : > { %s7764_s18 = smov (!%p654_p2, %s4321_s18), 127  ;;  %4721 = vmatprep.subr.bf16.mxu0 %v4943_v4  ;;  %4806 = vmatprep.subr.bf16.mxu1 %v4943_v4  ;;  %s5414_s10 = sshll.u32 %s613_s13, 9 }
  0x2f   : > { %s5378_s11 = scalar_lea.vmem %s7628_s2, %s5372_s28  ;;  %s4310_s15 = sshll.u32 %s620_s25, 2 }
  0x30   : > { %v4904_v3 = vld [vmem:[%s5378_s11 + $0x88] sm:$0xff]   ;;  %s657_s27 = sadd.s32 %s5362_s24, %s7764_s18  ;;  %s623_s30 = sadd.s32 %s5362_s24, %s4310_s15  ;;  %v4907_v9 = vld [vmem:[%s5378_s11 + $0x80] sm:$0xff]   ;;  %v4909_v10 = vld [vmem:[%s5378_s11 + $0x90] sm:$0xff]  }
  0x31   : > { %1309 = vrot.lane.b32.xlu1 %v4904_v3, %s7504_s22  ;;  %s5392_s19 = sshll.u32 %s657_s27, 2  ;;  %s4312_s21 = sshll.u32 %s623_s30, 3  ;;  %4722 = vmatpush3.bf16.msra.mxu0 %v4943_v4  ;;  %v4908_v11 = vld [vmem:[%s5378_s11] sm:$0xff]   ;;  %v4911_v12 = vld [vmem:[%s5378_s11 + $0x98] sm:$0xff]   ;;  %v4910_v13 = vld [vmem:[%s5378_s11 + $0x8] sm:$0xff]  }
  0x32   : > { %4814 = vmatpush3.bf16.msra.mxu1 %v4943_v4  ;;  %s677_s20 = scalar_lea.vmem %s7491_s4, %s5392_s19  ;;  %s5401_s2 = scalar_lea.vmem %s7487_s0, %s4312_s21  ;;  %4723 = vmatprep.subr.bf16.mxu0 %v4944_v5  ;;  %v4913_v14 = vld [vmem:[%s5378_s11 + $0xa0] sm:$0xff]   ;;  %v4912_v15 = vld [vmem:[%s5378_s11 + $0x10] sm:$0xff]   ;;  %v4915_v16 = vld [vmem:[%s5378_s11 + $0xa8] sm:$0xff]  }
  0x33   : > { %4807 = vmatprep.subr.bf16.mxu1 %v4944_v5  ;;  %v4905_v7 = vld [vmem:[%s677_s20] sm:$0xff]   ;;  %s4666_s18 = sadd.s32 16, %s5365_s23  ;;  %v4906_v8 = vld [vmem:[%s677_s20 + $0x8] sm:$0xff]   ;;  %s7629_s25 = smov 64   ;;  %v4914_v17 = vld [vmem:[%s5378_s11 + $0x18] sm:$0xff]  }
  0x34   : > { %p685_p4 = scmp.lt.s32.totalorder %s4666_s18, 31  ;;  %754 = vrot.lane.b32.xlu0 %v4905_v7, %s7629_s25  ;;  %v4917_v18 = vld [vmem:[%s5378_s11 + $0xb0] sm:$0xff]   ;;  %v4916_v19 = vld [vmem:[%s5378_s11 + $0x20] sm:$0xff]   ;;  %v4919_v20 = vld [vmem:[%s5378_s11 + $0xb8] sm:$0xff]   ;;  %s5449_s15 = scalar_lea.vmem %s7488_s1, %s5372_s28 }
  0x35   : > { %4724 = vmatpush3.bf16.msra.mxu0 %v4944_v5  ;;  %756 = vrot.lane.b32.xlu1 %v4906_v8, %s7629_s25  ;;  %v4918_v21 = vld [vmem:[%s5378_s11 + $0x28] sm:$0xff]   ;;  %v4921_v22 = vld [vmem:[%s5378_s11 + $0xc0] sm:$0xff]   ;;  %v4920_v24 = vld [vmem:[%s5378_s11 + $0x30] sm:$0xff]   ;;  %p4417_p6 = scmp.ne.s32.totalorder %s5194_s16, 0 }
  0x36   : > { %s7766_s18 = smov (!%p685_p4, %s4666_s18), 31  ;;  %4725 = vmatprep.subr.bf16.mxu0 %v4946_v6  ;;  %4815 = vmatpush3.bf16.msra.mxu1 %v4944_v5  ;;  %v4945_v23 = vld [vmem:[%s5449_s15 + $0x88] sm:$0xff]   ;;  %v4950_v29 = vld [vmem:[%s5449_s15 + $0x80] sm:$0xff]   ;;  %v4922_v31 = vld [vmem:[%s5378_s11 + $0x38] sm:$0xff]  }
  0x37   : > { %s4330_s20 = sshll.u32 %s7766_s18, 2  ;;  %4808 = vmatprep.subr.bf16.mxu1 %v4946_v6  ;;  %v4923_v26 = vld [vmem:[%s5378_s11 + $0xc8] sm:$0xff]   ;;  %1036 = vst.msk [vmem:[#allocation2 + $0x98] sm:$0xff] %vm737_vm0, %v4945_v23  ;;  %1035 = vst.msk [vmem:[#allocation2 + $0x90] sm:$0xff] %vm737_vm0, %v4950_v29  ;;  %v4952_v32 = vld [vmem:[%s5449_s15] sm:$0xff]  }
  0x38   : > { %1307 = vrot.lane.b32.xlu0 %v4907_v9, %s7629_s25  ;;  %p690_p5 = scmp.lt.s32.totalorder %s4330_s20, 127  ;;  %v4925_v33 = vld [vmem:[%s5378_s11 + $0xd0] sm:$0xff]   ;;  %1019 = vst.msk [vmem:[#allocation2 + $0x10] sm:$0xff] %vm737_vm0, %v4952_v32  ;;  %v4954_v35 = vld [vmem:[%s5449_s15 + $0x8] sm:$0xff]   ;;  %v4955_v36 = vld [vmem:[%s5449_s15 + $0x98] sm:$0xff]  }
  0x39   : > { %4726 = vmatpush3.bf16.msra.mxu0 %v4946_v6  ;;  %1311 = vrot.lane.b32.xlu1 %v4909_v10, %s7629_s25  ;;  %v4953_v34 = vld [vmem:[%s5449_s15 + $0x90] sm:$0xff]   ;;  %v4924_v37 = vld [vmem:[%s5378_s11 + $0x40] sm:$0xff]   ;;  %1020 = vst.msk [vmem:[#allocation2 + $0x18] sm:$0xff] %vm737_vm0, %v4954_v35  ;;  %v4927_v39 = vld [vmem:[%s5378_s11 + $0xd8] sm:$0xff]  }
  0x3a   : > { %4816 = vmatpush3.bf16.msra.mxu1 %v4946_v6  ;;  %s7768_s20 = smov (!%p690_p5, %s4330_s20), 127  ;;  %4727 = vmatprep.subr.bf16.mxu0 %v4949_v28  ;;  %1037 = vst.msk [vmem:[#allocation2 + $0xa0] sm:$0xff] %vm737_vm0, %v4953_v34  ;;  %v4956_v38 = vld [vmem:[%s5449_s15 + $0x10] sm:$0xff]   ;;  %1038 = vst.msk [vmem:[#allocation2 + $0xa8] sm:$0xff] %vm737_vm0, %v4955_v36  ;;  %v4957_v40 = vld [vmem:[%s5449_s15 + $0xa0] sm:$0xff]  }
  0x3b   : > { %s693_s23 = sadd.s32 %s5362_s24, %s7768_s20  ;;  %s659_s20 = scalar_lea.vmem %s7490_s3, %s5392_s19  ;;  %4809 = vmatprep.subr.bf16.mxu1 %v4949_v28  ;;  %1021 = vst.msk [vmem:[#allocation2 + $0x20] sm:$0xff] %vm737_vm0, %v4956_v38  ;;  %v4958_v41 = vld [vmem:[%s5449_s15 + $0x18] sm:$0xff]   ;;  %1039 = vst.msk [vmem:[#allocation2 + $0xb0] sm:$0xff] %vm737_vm0, %v4957_v40  ;;  %v4959_v42 = vld [vmem:[%s5449_s15 + $0xa8] sm:$0xff]  }
  0x3c   : > { %1275 = vrot.lane.b32.xlu0 %v4908_v11, %s7629_s25  ;;  %s5433_s26 = sshll.u32 %s693_s23, 2  ;;  %v4947_v25 = vld [vmem:[%s659_s20] sm:$0xff]   ;;  %v4948_v27 = vld [vmem:[%s659_s20 + $0x8] sm:$0xff]   ;;  %1022 = vst.msk [vmem:[#allocation2 + $0x28] sm:$0xff] %vm737_vm0, %v4958_v41  ;;  %1040 = vst.msk [vmem:[#allocation2 + $0xb8] sm:$0xff] %vm737_vm0, %v4959_v42 }
  0x3d   : > { %1313 = vrot.lane.b32.xlu1 %v4911_v12, %s7629_s25  ;;  %s5441_s30 = scalar_lea.vmem %s7493_s6, %s5433_s26  ;;  %738 = vst.msk [vmem:[#allocation2] sm:$0xff] %vm737_vm0, %v4947_v25  ;;  %739 = vst.msk [vmem:[#allocation2 + $0x8] sm:$0xff] %vm737_vm0, %v4948_v27  ;;  %4728 = vmatpush3.bf16.msra.mxu0 %v4949_v28  ;;  %v4926_v43 = vld [vmem:[%s5378_s11 + $0x48] sm:$0xff]   ;;  %v4960_v44 = vld [vmem:[%s5449_s15 + $0x20] sm:$0xff]   ;;  %s695_s21 = scalar_lea.vmem %s7492_s5, %s5433_s26 }
  0x3e   : > { %4729 = vmatprep.subr.bf16.mxu0 %v4951_v30  ;;  %4817 = vmatpush3.bf16.msra.mxu1 %v4949_v28  ;;  %v4929_v45 = vld [vmem:[%s5378_s11 + $0xe0] sm:$0xff]   ;;  %v4961_v46 = vld [vmem:[%s5449_s15 + $0xb0] sm:$0xff]   ;;  %1023 = vst.msk [vmem:[#allocation2 + $0x30] sm:$0xff] %vm737_vm0, %v4960_v44  ;;  %v4962_v47 = vld [vmem:[%s5449_s15 + $0x28] sm:$0xff]  }
  0x3f   : > { %4810 = vmatprep.subr.bf16.mxu1 %v4951_v30  ;;  %1041 = vst.msk [vmem:[#allocation2 + $0xc0] sm:$0xff] %vm737_vm0, %v4961_v46  ;;  %v4963_v48 = vld [vmem:[%s5449_s15 + $0xb8] sm:$0xff]   ;;  %v4928_v49 = vld [vmem:[%s5378_s11 + $0x50] sm:$0xff]   ;;  %1024 = vst.msk [vmem:[#allocation2 + $0x38] sm:$0xff] %vm737_vm0, %v4962_v47 }
  0x40   : > { %1277 = vrot.lane.b32.xlu0 %v4910_v13, %s7629_s25  ;;  %v4964_v50 = vld [vmem:[%s5449_s15 + $0x30] sm:$0xff]   ;;  %v4931_v51 = vld [vmem:[%s5378_s11 + $0xe8] sm:$0xff]   ;;  %1042 = vst.msk [vmem:[#allocation2 + $0xc8] sm:$0xff] %vm737_vm0, %v4963_v48  ;;  %v4965_v52 = vld [vmem:[%s5449_s15 + $0xc0] sm:$0xff]  }
  0x41   : > { %1315 = vrot.lane.b32.xlu1 %v4913_v14, %s7629_s25  ;;  %4730 = vmatpush3.bf16.msra.mxu0 %v4951_v30  ;;  %1025 = vst.msk [vmem:[#allocation2 + $0x40] sm:$0xff] %vm737_vm0, %v4964_v50  ;;  %v4966_v53 = vld [vmem:[%s5449_s15 + $0x38] sm:$0xff]   ;;  %1043 = vst.msk [vmem:[#allocation2 + $0xd0] sm:$0xff] %vm737_vm0, %v4965_v52  ;;  %v4967_v54 = vld [vmem:[%s5449_s15 + $0xc8] sm:$0xff]  }
  0x42   : > { %4818 = vmatpush3.bf16.msra.mxu1 %v4951_v30  ;;  %v4930_v55 = vld [vmem:[%s5378_s11 + $0x58] sm:$0xff]   ;;  %1026 = vst.msk [vmem:[#allocation2 + $0x48] sm:$0xff] %vm737_vm0, %v4966_v53  ;;  %v4968_v56 = vld [vmem:[%s5449_s15 + $0x40] sm:$0xff]   ;;  %v4933_v57 = vld [vmem:[%s5378_s11 + $0xf0] sm:$0xff]  }
  0x43   : > { %1044 = vst.msk [vmem:[#allocation2 + $0xd8] sm:$0xff] %vm737_vm0, %v4967_v54  ;;  %v4969_v58 = vld [vmem:[%s5449_s15 + $0xd0] sm:$0xff]   ;;  %1027 = vst.msk [vmem:[#allocation2 + $0x50] sm:$0xff] %vm737_vm0, %v4968_v56  ;;  %v4970_v59 = vld [vmem:[%s5449_s15 + $0x48] sm:$0xff]  }
  0x44   : > { %1279 = vrot.lane.b32.xlu0 %v4912_v15, %s7629_s25  ;;  %1045 = vst.msk [vmem:[#allocation2 + $0xe0] sm:$0xff] %vm737_vm0, %v4969_v58  ;;  %v4971_v60 = vld [vmem:[%s5449_s15 + $0xd8] sm:$0xff]   ;;  %v4932_v61 = vld [vmem:[%s5378_s11 + $0x60] sm:$0xff]   ;;  %1028 = vst.msk [vmem:[#allocation2 + $0x58] sm:$0xff] %vm737_vm0, %v4970_v59 }
  0x45   : > { %1317 = vrot.lane.b32.xlu1 %v4915_v16, %s7629_s25  ;;  %v4972_v62 = vld [vmem:[%s5449_s15 + $0x50] sm:$0xff]   ;;  %v4935_v63 = vld [vmem:[%s5378_s11 + $0xf8] sm:$0xff]   ;;  %1046 = vst.msk [vmem:[#allocation2 + $0xe8] sm:$0xff] %vm737_vm0, %v4971_v60  ;;  %v4973_v0 = vld [vmem:[%s5449_s15 + $0xe0] sm:$0xff]  }
  0x46   : > { %1029 = vst.msk [vmem:[#allocation2 + $0x60] sm:$0xff] %vm737_vm0, %v4972_v62  ;;  %v4974_v1 = vld [vmem:[%s5449_s15 + $0x58] sm:$0xff]   ;;  %1047 = vst.msk [vmem:[#allocation2 + $0xf0] sm:$0xff] %vm737_vm0, %v4973_v0  ;;  %v4975_v2 = vld [vmem:[%s5449_s15 + $0xe8] sm:$0xff]  }
  0x47   : > { %v4934_v3 = vld [vmem:[%s5378_s11 + $0x68] sm:$0xff]   ;;  %1030 = vst.msk [vmem:[#allocation2 + $0x68] sm:$0xff] %vm737_vm0, %v4974_v1  ;;  %v4976_v4 = vld [vmem:[%s5449_s15 + $0x60] sm:$0xff]   ;;  %1048 = vst.msk [vmem:[#allocation2 + $0xf8] sm:$0xff] %vm737_vm0, %v4975_v2 }
  0x48   : > { %1281 = vrot.lane.b32.xlu0 %v4914_v17, %s7629_s25  ;;  %v4937_v5 = vld [vmem:[%s5441_s30] sm:$0xff]   ;;  %v4977_v6 = vld [vmem:[%s5449_s15 + $0xf0] sm:$0xff]   ;;  %1031 = vst.msk [vmem:[#allocation2 + $0x70] sm:$0xff] %vm737_vm0, %v4976_v4  ;;  %v4978_v7 = vld [vmem:[%s5449_s15 + $0x68] sm:$0xff]  }
  0x49   : > { %1319 = vrot.lane.b32.xlu1 %v4917_v18, %s7629_s25  ;;  %1049 = vst.msk [vmem:[#allocation2 + $0x100] sm:$0xff] %vm737_vm0, %v4977_v6  ;;  %v4979_v8 = vld [vmem:[%s5449_s15 + $0xf8] sm:$0xff]   ;;  %v4936_v9 = vld [vmem:[%s5378_s11 + $0x70] sm:$0xff]   ;;  %1032 = vst.msk [vmem:[#allocation2 + $0x78] sm:$0xff] %vm737_vm0, %v4978_v7 }
  0x4a   : > { %v4980_v10 = vld [vmem:[%s5449_s15 + $0x70] sm:$0xff]   ;;  %1050 = vst.msk [vmem:[#allocation2 + $0x108] sm:$0xff] %vm737_vm0, %v4979_v8  ;;  %v4981_v11 = vld [vmem:[%s695_s21] sm:$0xff]   ;;  %v4982_v12 = vld [vmem:[%s5449_s15 + $0x78] sm:$0xff]  }
  0x4b   : > { %1033 = vst.msk [vmem:[#allocation2 + $0x80] sm:$0xff] %vm737_vm0, %v4980_v10  ;;  %v4939_v13 = vld [vmem:[%s5441_s30 + $0x8] sm:$0xff]   ;;  %1419 = vst.msk [vmem:[#allocation2 + $0x110] sm:$0xff] %vm737_vm0, %v4981_v11  ;;  %v4938_v15 = vld [vmem:[%s5378_s11 + $0x78] sm:$0xff]   ;;  %s615_s11 = scalar_lea.vmem [#allocation4], %s5414_s10 }
  0x4c   : > { %1283 = vrot.lane.b32.xlu0 %v4916_v19, %s7629_s25  ;;  %v4983_v14 = vld [vmem:[%s695_s21 + $0x8] sm:$0xff]   ;;  %1034 = vst.msk [vmem:[#allocation2 + $0x88] sm:$0xff] %vm737_vm0, %v4982_v12 }
  0x4d   : > { %1321 = vrot.lane.b32.xlu1 %v4919_v20, %s7629_s25  ;;  %1420 = vst.msk [vmem:[#allocation2 + $0x118] sm:$0xff] %vm737_vm0, %v4983_v14 }
  0x50   : > { %1285 = vrot.lane.b32.xlu0 %v4918_v21, %s7629_s25 }
  0x51   : > { %1323 = vrot.lane.b32.xlu1 %v4921_v22, %s7629_s25 }
  0x54   : > { %1287 = vrot.lane.b32.xlu0 %v4920_v24, %s7629_s25 }
  0x55   : > { %1325 = vrot.lane.b32.xlu1 %v4923_v26, %s7629_s25 }
  0x58   : > { %1289 = vrot.lane.b32.xlu0 %v4922_v31, %s7629_s25 }
  0x59   : > { %1327 = vrot.lane.b32.xlu1 %v4925_v33, %s7629_s25 }
  0x5c   : > { %1291 = vrot.lane.b32.xlu0 %v4924_v37, %s7629_s25 }
  0x5d   : > { %1329 = vrot.lane.b32.xlu1 %v4927_v39, %s7629_s25 }
  0x60   : > { %1293 = vrot.lane.b32.xlu0 %v4926_v43, %s7629_s25 }
  0x61   : > { %1331 = vrot.lane.b32.xlu1 %v4929_v45, %s7629_s25 }
  0x64   : > { %1295 = vrot.lane.b32.xlu0 %v4928_v49, %s7629_s25 }
  0x65   : > { %1333 = vrot.lane.b32.xlu1 %v4931_v51, %s7629_s25 }
  0x68   : > { %1297 = vrot.lane.b32.xlu0 %v4930_v55, %s7629_s25 }
  0x69   : > { %1335 = vrot.lane.b32.xlu1 %v4933_v57, %s7629_s25 }
  0x6c   : > { %1299 = vrot.lane.b32.xlu0 %v4932_v61, %s7629_s25 }
  0x6d   : > { %1337 = vrot.lane.b32.xlu1 %v4935_v63, %s7629_s25 }
  0x70   : > { %1301 = vrot.lane.b32.xlu0 %v4934_v3, %s7629_s25 }
  0x71   : > { %1435 = vrot.lane.b32.xlu1 %v4937_v5, %s7629_s25 }
  0x74   : > { %1303 = vrot.lane.b32.xlu0 %v4936_v9, %s7629_s25 }
  0x75   : > { %1437 = vrot.lane.b32.xlu1 %v4939_v13, %s7629_s25 }
  0x78   : > { %1305 = vrot.lane.b32.xlu0 %v4938_v15, %s7629_s25 }
  0xa3   : > { %v1310_v16 = vpop.permute.xlu1 %1309 }
  0xa4   : > { %1388 = vst.msk [vmem:[#allocation2 + $0x98] sm:$0xff] %vm760_vm1, %v1310_v16 }
  0xa6   : > { %v755_v17 = vpop.permute.xlu0 %754 }
  0xa7   : > { %761 = vst.msk [vmem:[#allocation2] sm:$0xff] %vm760_vm1, %v755_v17  ;;  %v757_v18 = vpop.permute.xlu1 %756 }
  0xa8   : > { %762 = vst.msk [vmem:[#allocation2 + $0x8] sm:$0xff] %vm760_vm1, %v757_v18 }
  0xaa   : > { %v1308_v19 = vpop.permute.xlu0 %1307 }
  0xab   : > { %1387 = vst.msk [vmem:[#allocation2 + $0x90] sm:$0xff] %vm760_vm1, %v1308_v19  ;;  %v1312_v20 = vpop.permute.xlu1 %1311  ;;  %v1462_v27 = vld [vmem:[#allocation2 + $0x98] sm:$0xff] }
  0xac   : > { %1389 = vst.msk [vmem:[#allocation2 + $0xa0] sm:$0xff] %vm760_vm1, %v1312_v20 }
  0xae   : > { %v1276_v21 = vpop.permute.xlu0 %1275  ;;  %v1443_v22 = vld [vmem:[#allocation2] sm:$0xff] }
  0xaf   : > { %1371 = vst.msk [vmem:[#allocation2 + $0x10] sm:$0xff] %vm760_vm1, %v1276_v21  ;;  %4731 = vmatprep.mubr.bf16.mxu0 %v1443_v22  ;;  %v1444_v23 = vld [vmem:[#allocation2 + $0x8] sm:$0xff]  ;;  %v1314_v24 = vpop.permute.xlu1 %1313 }
  0xb0   : > { %4732 = vmatmul.mubr.bf16.vlgmr.msra.gmra.mrb[0].mxu0 %v1444_v23  ;;  %1390 = vst.msk [vmem:[#allocation2 + $0xa8] sm:$0xff] %vm760_vm1, %v1314_v24  ;;  %v5217_v24 = vmov 0.0  }
  0xb1   : > { %2081 = vst.msk [vmem:[#allocation3 + $0x7] sm:$0x1] %vm2080_vm2, %v5217_v24  ;;  %2082 = vst.msk [vmem:[#allocation3 + $0x37] sm:$0x1] %vm2080_vm2, %v5217_v24 }
  0xb2   : > { %v1278_v25 = vpop.permute.xlu0 %1277  ;;  %v1461_v26 = vld [vmem:[#allocation2 + $0x90] sm:$0xff]  ;;  %2083 = vst.msk [vmem:[#allocation3 + $0x67] sm:$0x1] %vm2080_vm2, %v5217_v24  ;;  %2084 = vst.msk [vmem:[#allocation3 + $0x97] sm:$0x1] %vm2080_vm2, %v5217_v24 }
  0xb3   : > { %1372 = vst.msk [vmem:[#allocation2 + $0x18] sm:$0xff] %vm760_vm1, %v1278_v25  ;;  %4767 = vmatprep.mubr.bf16.mxu1 %v1461_v26  ;;  %v1316_v28 = vpop.permute.xlu1 %1315  ;;  %v1463_v29 = vld [vmem:[#allocation2 + $0xa0] sm:$0xff] }
  0xb4   : > { %4768 = vmatmul.mubr.bf16.vlgmr.msra.gmra.mrb[0].mxu1 %v1462_v27  ;;  %1391 = vst.msk [vmem:[#allocation2 + $0xb0] sm:$0xff] %vm760_vm1, %v1316_v28 }
  0xb5   : > { %4771 = vmatprep.mubr.bf16.mxu1 %v1463_v29  ;;  %2085 = vst.msk [vmem:[#allocation3 + $0xc7] sm:$0x1] %vm2080_vm2, %v5217_v24  ;;  %2086 = vst.msk [vmem:[#allocation3 + $0xf7] sm:$0x1] %vm2080_vm2, %v5217_v24 }
  0xb6   : > { %v1280_v30 = vpop.permute.xlu0 %1279  ;;  %v1445_v31 = vld [vmem:[#allocation2 + $0x10] sm:$0xff]  ;;  %2087 = vst.msk [vmem:[#allocation3 + $0x127] sm:$0x1] %vm2080_vm2, %v5217_v24  ;;  %2088 = vst.msk [vmem:[#allocation3 + $0x157] sm:$0x1] %vm2080_vm2, %v5217_v24 }
  0xb7   : > { %1373 = vst.msk [vmem:[#allocation2 + $0x20] sm:$0xff] %vm760_vm1, %v1280_v30  ;;  %4735 = vmatprep.mubr.bf16.mxu0 %v1445_v31  ;;  %v1318_v32 = vpop.permute.xlu1 %1317  ;;  %v1464_v33 = vld [vmem:[#allocation2 + $0xa8] sm:$0xff] }
  0xb8   : > { %1392 = vst.msk [vmem:[#allocation2 + $0xb8] sm:$0xff] %vm760_vm1, %v1318_v32 }
  0xb9   : > { %2089 = vst.msk [vmem:[#allocation3 + $0x187] sm:$0x1] %vm2080_vm2, %v5217_v24  ;;  %2090 = vst.msk [vmem:[#allocation3 + $0x1b7] sm:$0x1] %vm2080_vm2, %v5217_v24 }
  0xba   : > { %v1282_v34 = vpop.permute.xlu0 %1281  ;;  %v1446_v35 = vld [vmem:[#allocation2 + $0x18] sm:$0xff]  ;;  %2091 = vst.msk [vmem:[#allocation3 + $0x1e7] sm:$0x1] %vm2080_vm2, %v5217_v24  ;;  %2092 = vst.msk [vmem:[#allocation3 + $0x217] sm:$0x1] %vm2080_vm2, %v5217_v24 }
  0xbb   : > { %1374 = vst.msk [vmem:[#allocation2 + $0x28] sm:$0xff] %vm760_vm1, %v1282_v34  ;;  %4736 = vmatmul.mubr.bf16.gmra.mrb[4].mxu0 %v1446_v35  ;;  %v1320_v36 = vpop.permute.xlu1 %1319  ;;  %v1465_v37 = vld [vmem:[#allocation2 + $0xb0] sm:$0xff] }
  0xbc   : > { %4772 = vmatmul.mubr.bf16.gmra.mrb[4].mxu1 %v1464_v33  ;;  %1393 = vst.msk [vmem:[#allocation2 + $0xc0] sm:$0xff] %vm760_vm1, %v1320_v36 }
  0xbd   : > { %4775 = vmatprep.mubr.bf16.mxu1 %v1465_v37  ;;  %2093 = vst.msk [vmem:[#allocation3 + $0x247] sm:$0x1] %vm2080_vm2, %v5217_v24  ;;  %2094 = vst.msk [vmem:[#allocation3 + $0x277] sm:$0x1] %vm2080_vm2, %v5217_v24 }
  0xbe   : > { %v1284_v38 = vpop.permute.xlu0 %1283  ;;  %v1447_v39 = vld [vmem:[#allocation2 + $0x20] sm:$0xff]  ;;  %2095 = vst.msk [vmem:[#allocation3 + $0x2a7] sm:$0x1] %vm2080_vm2, %v5217_v24  ;;  %2096 = vst.msk [vmem:[#allocation3 + $0x2d7] sm:$0x1] %vm2080_vm2, %v5217_v24 }
  0xbf   : > { %1375 = vst.msk [vmem:[#allocation2 + $0x30] sm:$0xff] %vm760_vm1, %v1284_v38  ;;  %4739 = vmatprep.mubr.bf16.mxu0 %v1447_v39  ;;  %v1322_v40 = vpop.permute.xlu1 %1321  ;;  %v1466_v41 = vld [vmem:[#allocation2 + $0xb8] sm:$0xff] }
  0xc0   : > { %1394 = vst.msk [vmem:[#allocation2 + $0xc8] sm:$0xff] %vm760_vm1, %v1322_v40 }
  0xc1   : > { %2097 = vst.msk [vmem:[#allocation3 + $0x307] sm:$0x1] %vm2080_vm2, %v5217_v24  ;;  %2098 = vst.msk [vmem:[#allocation3 + $0x337] sm:$0x1] %vm2080_vm2, %v5217_v24 }
  0xc2   : > { %v1286_v42 = vpop.permute.xlu0 %1285  ;;  %v1448_v43 = vld [vmem:[#allocation2 + $0x28] sm:$0xff]  ;;  %2099 = vst.msk [vmem:[#allocation3 + $0x28] sm:$0x1] %vm2080_vm2, %v5217_v24  ;;  %2100 = vst.msk [vmem:[#allocation3 + $0x58] sm:$0x1] %vm2080_vm2, %v5217_v24 }
  0xc3   : > { %1376 = vst.msk [vmem:[#allocation2 + $0x38] sm:$0xff] %vm760_vm1, %v1286_v42  ;;  %4740 = vmatmul.mubr.bf16.gmra.mrb[8].mxu0 %v1448_v43  ;;  %v1324_v44 = vpop.permute.xlu1 %1323  ;;  %v1467_v45 = vld [vmem:[#allocation2 + $0xc0] sm:$0xff] }
  0xc4   : > { %4776 = vmatmul.mubr.bf16.gmra.mrb[8].mxu1 %v1466_v41  ;;  %1395 = vst.msk [vmem:[#allocation2 + $0xd0] sm:$0xff] %vm760_vm1, %v1324_v44 }
  0xc5   : > { %4779 = vmatprep.mubr.bf16.mxu1 %v1467_v45  ;;  %2101 = vst.msk [vmem:[#allocation3 + $0x88] sm:$0x1] %vm2080_vm2, %v5217_v24  ;;  %2102 = vst.msk [vmem:[#allocation3 + $0xb8] sm:$0x1] %vm2080_vm2, %v5217_v24 }
  0xc6   : > { %v1288_v46 = vpop.permute.xlu0 %1287  ;;  %v1449_v47 = vld [vmem:[#allocation2 + $0x30] sm:$0xff]  ;;  %2103 = vst.msk [vmem:[#allocation3 + $0xe8] sm:$0x1] %vm2080_vm2, %v5217_v24  ;;  %2104 = vst.msk [vmem:[#allocation3 + $0x118] sm:$0x1] %vm2080_vm2, %v5217_v24 }
  0xc7   : > { %1377 = vst.msk [vmem:[#allocation2 + $0x40] sm:$0xff] %vm760_vm1, %v1288_v46  ;;  %4743 = vmatprep.mubr.bf16.mxu0 %v1449_v47  ;;  %v1326_v48 = vpop.permute.xlu1 %1325  ;;  %v1468_v49 = vld [vmem:[#allocation2 + $0xc8] sm:$0xff] }
  0xc8   : > { %1396 = vst.msk [vmem:[#allocation2 + $0xd8] sm:$0xff] %vm760_vm1, %v1326_v48 }
  0xc9   : > { %2105 = vst.msk [vmem:[#allocation3 + $0x148] sm:$0x1] %vm2080_vm2, %v5217_v24  ;;  %2106 = vst.msk [vmem:[#allocation3 + $0x178] sm:$0x1] %vm2080_vm2, %v5217_v24 }
  0xca   : > { %v1290_v50 = vpop.permute.xlu0 %1289  ;;  %v1450_v51 = vld [vmem:[#allocation2 + $0x38] sm:$0xff]  ;;  %2107 = vst.msk [vmem:[#allocation3 + $0x1a8] sm:$0x1] %vm2080_vm2, %v5217_v24  ;;  %2108 = vst.msk [vmem:[#allocation3 + $0x1d8] sm:$0x1] %vm2080_vm2, %v5217_v24 }
  0xcb   : > { %1378 = vst.msk [vmem:[#allocation2 + $0x48] sm:$0xff] %vm760_vm1, %v1290_v50  ;;  %4744 = vmatmul.mubr.bf16.gmra.mrb[12].mxu0 %v1450_v51  ;;  %v1328_v52 = vpop.permute.xlu1 %1327  ;;  %v1469_v53 = vld [vmem:[#allocation2 + $0xd0] sm:$0xff] }
  0xcc   : > { %4780 = vmatmul.mubr.bf16.gmra.mrb[12].mxu1 %v1468_v49  ;;  %1397 = vst.msk [vmem:[#allocation2 + $0xe0] sm:$0xff] %vm760_vm1, %v1328_v52 }
  0xcd   : > { %4783 = vmatprep.mubr.bf16.mxu1 %v1469_v53  ;;  %2109 = vst.msk [vmem:[#allocation3 + $0x208] sm:$0x1] %vm2080_vm2, %v5217_v24  ;;  %2110 = vst.msk [vmem:[#allocation3 + $0x238] sm:$0x1] %vm2080_vm2, %v5217_v24 }
  0xce   : > { %v1292_v54 = vpop.permute.xlu0 %1291  ;;  %v1451_v55 = vld [vmem:[#allocation2 + $0x40] sm:$0xff]  ;;  %2111 = vst.msk [vmem:[#allocation3 + $0x268] sm:$0x1] %vm2080_vm2, %v5217_v24  ;;  %2112 = vst.msk [vmem:[#allocation3 + $0x298] sm:$0x1] %vm2080_vm2, %v5217_v24 }
  0xcf   : > { %1379 = vst.msk [vmem:[#allocation2 + $0x50] sm:$0xff] %vm760_vm1, %v1292_v54  ;;  %4747 = vmatprep.mubr.bf16.mxu0 %v1451_v55  ;;  %v1330_v56 = vpop.permute.xlu1 %1329  ;;  %v1470_v57 = vld [vmem:[#allocation2 + $0xd8] sm:$0xff] }
  0xd0   : > { %1398 = vst.msk [vmem:[#allocation2 + $0xe8] sm:$0xff] %vm760_vm1, %v1330_v56 }
  0xd1   : > { %2113 = vst.msk [vmem:[#allocation3 + $0x2c8] sm:$0x1] %vm2080_vm2, %v5217_v24  ;;  %2114 = vst.msk [vmem:[#allocation3 + $0x2f8] sm:$0x1] %vm2080_vm2, %v5217_v24 }
  0xd2   : > { %v1294_v58 = vpop.permute.xlu0 %1293  ;;  %v1452_v59 = vld [vmem:[#allocation2 + $0x48] sm:$0xff]  ;;  %2115 = vst.msk [vmem:[#allocation3 + $0x328] sm:$0x1] %vm2080_vm2, %v5217_v24  ;;  %2116 = vst.msk [vmem:[#allocation3 + $0x358] sm:$0x1] %vm2080_vm2, %v5217_v24 }
  0xd3   : > { %1380 = vst.msk [vmem:[#allocation2 + $0x58] sm:$0xff] %vm760_vm1, %v1294_v58  ;;  %4748 = vmatmul.mubr.bf16.gmra.mrb[16].mxu0 %v1452_v59  ;;  %v1332_v60 = vpop.permute.xlu1 %1331  ;;  %v1471_v61 = vld [vmem:[#allocation2 + $0xe0] sm:$0xff] }
  0xd4   : > { %4784 = vmatmul.mubr.bf16.gmra.mrb[16].mxu1 %v1470_v57  ;;  %1399 = vst.msk [vmem:[#allocation2 + $0xf0] sm:$0xff] %vm760_vm1, %v1332_v60 }
  0xd5   : > { %4787 = vmatprep.mubr.bf16.mxu1 %v1471_v61 }
  0xd6   : > { %v1296_v62 = vpop.permute.xlu0 %1295  ;;  %v1453_v63 = vld [vmem:[#allocation2 + $0x50] sm:$0xff] }
  0xd7   : > { %1381 = vst.msk [vmem:[#allocation2 + $0x60] sm:$0xff] %vm760_vm1, %v1296_v62  ;;  %4751 = vmatprep.mubr.bf16.mxu0 %v1453_v63  ;;  %v1334_v0 = vpop.permute.xlu1 %1333  ;;  %v1472_v1 = vld [vmem:[#allocation2 + $0xe8] sm:$0xff] }
  0xd8   : > { %1400 = vst.msk [vmem:[#allocation2 + $0xf8] sm:$0xff] %vm760_vm1, %v1334_v0 }
  0xda   : > { %v1298_v2 = vpop.permute.xlu0 %1297  ;;  %v1454_v3 = vld [vmem:[#allocation2 + $0x58] sm:$0xff] }
  0xdb   : > { %1382 = vst.msk [vmem:[#allocation2 + $0x68] sm:$0xff] %vm760_vm1, %v1298_v2  ;;  %4752 = vmatmul.mubr.bf16.gmra.mrb[20].mxu0 %v1454_v3  ;;  %v1336_v4 = vpop.permute.xlu1 %1335  ;;  %v1473_v5 = vld [vmem:[#allocation2 + $0xf0] sm:$0xff] }
  0xdc   : > { %4788 = vmatmul.mubr.bf16.gmra.mrb[20].mxu1 %v1472_v1  ;;  %1401 = vst.msk [vmem:[#allocation2 + $0x100] sm:$0xff] %vm760_vm1, %v1336_v4 }
  0xdd   : > { %4791 = vmatprep.mubr.bf16.mxu1 %v1473_v5 }
  0xde   : > { %v1300_v6 = vpop.permute.xlu0 %1299  ;;  %v1455_v7 = vld [vmem:[#allocation2 + $0x60] sm:$0xff] }
  0xdf   : > { %1383 = vst.msk [vmem:[#allocation2 + $0x70] sm:$0xff] %vm760_vm1, %v1300_v6  ;;  %4755 = vmatprep.mubr.bf16.mxu0 %v1455_v7  ;;  %v1338_v8 = vpop.permute.xlu1 %1337  ;;  %v1474_v9 = vld [vmem:[#allocation2 + $0xf8] sm:$0xff] }
  0xe0   : > { %1402 = vst.msk [vmem:[#allocation2 + $0x108] sm:$0xff] %vm760_vm1, %v1338_v8 }
  0xe2   : > { %v1302_v10 = vpop.permute.xlu0 %1301  ;;  %v1456_v11 = vld [vmem:[#allocation2 + $0x68] sm:$0xff] }
  0xe3   : > { %1384 = vst.msk [vmem:[#allocation2 + $0x78] sm:$0xff] %vm760_vm1, %v1302_v10  ;;  %4756 = vmatmul.mubr.bf16.gmra.mrb[24].mxu0 %v1456_v11  ;;  %v1436_v12 = vpop.permute.xlu1 %1435  ;;  %v1475_v13 = vld [vmem:[#allocation2 + $0x100] sm:$0xff] }
  0xe4   : > { %4792 = vmatmul.mubr.bf16.gmra.mrb[24].mxu1 %v1474_v9  ;;  %1441 = vst.msk [vmem:[#allocation2 + $0x110] sm:$0xff] %vm760_vm1, %v1436_v12 }
  0xe5   : > { %4795 = vmatprep.mubr.bf16.mxu1 %v1475_v13 }
  0xe6   : > { %v1304_v14 = vpop.permute.xlu0 %1303  ;;  %v1457_v15 = vld [vmem:[#allocation2 + $0x70] sm:$0xff] }
  0xe7   : > { %1385 = vst.msk [vmem:[#allocation2 + $0x80] sm:$0xff] %vm760_vm1, %v1304_v14  ;;  %4759 = vmatprep.mubr.bf16.mxu0 %v1457_v15  ;;  %v1438_v16 = vpop.permute.xlu1 %1437  ;;  %v1476_v17 = vld [vmem:[#allocation2 + $0x108] sm:$0xff] }
  0xe8   : > { %1442 = vst.msk [vmem:[#allocation2 + $0x118] sm:$0xff] %vm760_vm1, %v1438_v16 }
  0xea   : > { %v1306_v18 = vpop.permute.xlu0 %1305  ;;  %v1458_v19 = vld [vmem:[#allocation2 + $0x78] sm:$0xff] }
  0xeb   : > { %1386 = vst.msk [vmem:[#allocation2 + $0x88] sm:$0xff] %vm760_vm1, %v1306_v18  ;;  %4760 = vmatmul.mubr.bf16.gmra.mrb[28].mxu0 %v1458_v19  ;;  %v1477_v20 = vld [vmem:[#allocation2 + $0x110] sm:$0xff] }
  0xec   : > { %4796 = vmatmul.mubr.bf16.gmra.mrb[28].mxu1 %v1476_v17 }
  0xed   : > { %4799 = vmatprep.mubr.bf16.mxu1 %v1477_v20 }
  0xee   : > { %v1459_v21 = vld [vmem:[#allocation2 + $0x80] sm:$0xff] }
  0xef   : > { %4763 = vmatprep.mubr.bf16.mxu0 %v1459_v21  ;;  %v1478_v22 = vld [vmem:[#allocation2 + $0x118] sm:$0xff] }
  0xf2   : > { %v1460_v23 = vld [vmem:[#allocation2 + $0x88] sm:$0xff] }
  0xf3   : > { %4764 = vmatmul.mubr.bf16.gmra.mrb[32].mxu0 %v1460_v23 }
  0xf4   : > { %4800 = vmatmul.mubr.bf16.gmra.mrb[32].mxu1 %v1478_v22 }
 0x183   : > { %v4733_v25 = vpop.f32.mrb[0].mxu0 }
 0x184   : > { %vm1866_vm3 = vcmp.ge.f32.partialorder %v4733_v25, 0.0  ;;  %v1938_v26 = vmul.f32 0.01, %v4733_v25  ;;  %v1577_v27 = vpop.f32.mrb[1].mxu0 }
 0x185   : > { %vm1864_vm4 = vcmp.ge.f32.partialorder %v1577_v27, 0.0  ;;  %v1936_v28 = vmul.f32 0.01, %v1577_v27  ;;  %v4734_v29 = vpop.f32.mrb[2].mxu0 }
 0x186   : > { %v2010_v30 = vsel %vm1866_vm3, %v4733_v25, %v1938_v26  ;;  %vm1867_vm5 = vcmp.ge.f32.partialorder %v4734_v29, 0.0  ;;  %v1939_v31 = vmul.f32 0.01, %v4734_v29  ;;  %v1580_v32 = vpop.f32.mrb[3].mxu0 }
 0x187   : > { %2119 = vst.msk [vmem:[#allocation3 + $0x18] sm:$0xff] %vm737_vm0, %v2010_v30  ;;  %v2008_v33 = vsel %vm1864_vm4, %v1577_v27, %v1936_v28  ;;  %vm1865_vm6 = vcmp.ge.f32.partialorder %v1580_v32, 0.0  ;;  %v1937_v34 = vmul.f32 0.01, %v1580_v32  ;;  %v4769_v35 = vpop.f32.mrb[0].mxu1 }
 0x188   : > { %2117 = vst.msk [vmem:[#allocation3 + $0x8] sm:$0xff] %vm737_vm0, %v2008_v33  ;;  %v2011_v36 = vsel %vm1867_vm5, %v4734_v29, %v1939_v31  ;;  %vm1902_vm7 = vcmp.ge.f32.partialorder %v4769_v35, 0.0  ;;  %v1974_v37 = vmul.f32 0.01, %v4769_v35  ;;  %v1721_v38 = vpop.f32.mrb[1].mxu1 }
 0x189   : > { %2120 = vst.msk [vmem:[#allocation3 + $0x20] sm:$0xff] %vm737_vm0, %v2011_v36  ;;  %v2009_v39 = vsel %vm1865_vm6, %v1580_v32, %v1937_v34  ;;  %vm1900_vm8 = vcmp.ge.f32.partialorder %v1721_v38, 0.0  ;;  %v1972_v40 = vmul.f32 0.01, %v1721_v38  ;;  %v4770_v41 = vpop.f32.mrb[2].mxu1 }
 0x18a   : > { %2118 = vst.msk [vmem:[#allocation3 + $0x10] sm:$0xff] %vm737_vm0, %v2009_v39  ;;  %v2046_v42 = vsel %vm1902_vm7, %v4769_v35, %v1974_v37  ;;  %vm1903_vm9 = vcmp.ge.f32.partialorder %v4770_v41, 0.0  ;;  %v1975_v43 = vmul.f32 0.01, %v4770_v41  ;;  %v1724_v44 = vpop.f32.mrb[3].mxu1 }
 0x18b   : > { %2155 = vst.msk [vmem:[#allocation3 + $0x1c8] sm:$0xff] %vm737_vm0, %v2046_v42  ;;  %v2044_v45 = vsel %vm1900_vm8, %v1721_v38, %v1972_v40  ;;  %vm1901_vm10 = vcmp.ge.f32.partialorder %v1724_v44, 0.0  ;;  %v1973_v46 = vmul.f32 0.01, %v1724_v44 }
 0x18c   : > { %2153 = vst.msk [vmem:[#allocation3 + $0x1b8] sm:$0xff] %vm737_vm0, %v2044_v45  ;;  %v2047_v47 = vsel %vm1903_vm9, %v4770_v41, %v1975_v43 }
 0x18d   : > { %2156 = vst.msk [vmem:[#allocation3 + $0x1d0] sm:$0xff] %vm737_vm0, %v2047_v47  ;;  %v2045_v48 = vsel %vm1901_vm10, %v1724_v44, %v1973_v46 }
 0x18e   : > { %2154 = vst.msk [vmem:[#allocation3 + $0x1c0] sm:$0xff] %vm737_vm0, %v2045_v48  ;;  %v4737_v49 = vpop.f32.mrb[4].mxu0 }
 0x18f   : > { %vm1870_vm11 = vcmp.ge.f32.partialorder %v4737_v49, 0.0  ;;  %v1942_v50 = vmul.f32 0.01, %v4737_v49  ;;  %v1593_v51 = vpop.f32.mrb[5].mxu0  ;;  %v4773_v52 = vpop.f32.mrb[4].mxu1 }
 0x190   : > { %vm1868_vm12 = vcmp.ge.f32.partialorder %v1593_v51, 0.0  ;;  %v1940_v53 = vmul.f32 0.01, %v1593_v51  ;;  %vm1906_vm13 = vcmp.ge.f32.partialorder %v4773_v52, 0.0  ;;  %v1978_v54 = vmul.f32 0.01, %v4773_v52 }
 0x191   : > { %v2014_v55 = vsel %vm1870_vm11, %v4737_v49, %v1942_v50  ;;  %v4738_v56 = vpop.f32.mrb[6].mxu0  ;;  %v1737_v57 = vpop.f32.mrb[5].mxu1 }
 0x192   : > { %2123 = vst.msk [vmem:[#allocation3 + $0x48] sm:$0xff] %vm737_vm0, %v2014_v55  ;;  %v2012_v58 = vsel %vm1868_vm12, %v1593_v51, %v1940_v53  ;;  %v2050_v59 = vsel %vm1906_vm13, %v4773_v52, %v1978_v54  ;;  %vm1871_vm14 = vcmp.ge.f32.partialorder %v4738_v56, 0.0  ;;  %v1943_v60 = vmul.f32 0.01, %v4738_v56  ;;  %v1596_v61 = vpop.f32.mrb[7].mxu0  ;;  %v4774_v62 = vpop.f32.mrb[6].mxu1 }
 0x193   : > { %2121 = vst.msk [vmem:[#allocation3 + $0x38] sm:$0xff] %vm737_vm0, %v2012_v58  ;;  %2159 = vst.msk [vmem:[#allocation3 + $0x1f8] sm:$0xff] %vm737_vm0, %v2050_v59  ;;  %vm1904_vm15 = vcmp.ge.f32.partialorder %v1737_v57, 0.0  ;;  %v1976_v63 = vmul.f32 0.01, %v1737_v57  ;;  %vm1869_vm1 = vcmp.ge.f32.partialorder %v1596_v61, 0.0 }
 0x194   : > { %v1941_v0 = vmul.f32 0.01, %v1596_v61  ;;  %v2015_v1 = vsel %vm1871_vm14, %v4738_v56, %v1943_v60  ;;  %vm1907_vm2 = vcmp.ge.f32.partialorder %v4774_v62, 0.0  ;;  %v1979_v2 = vmul.f32 0.01, %v4774_v62  ;;  %v1740_v3 = vpop.f32.mrb[7].mxu1 }
 0x195   : > { %2124 = vst.msk [vmem:[#allocation3 + $0x50] sm:$0xff] %vm737_vm0, %v2015_v1  ;;  %v2048_v4 = vsel %vm1904_vm15, %v1737_v57, %v1976_v63  ;;  %vm1905_vm3 = vcmp.ge.f32.partialorder %v1740_v3, 0.0  ;;  %v1977_v6 = vmul.f32 0.01, %v1740_v3 }
 0x196   : > { %v2013_v5 = vsel %vm1869_vm1, %v1596_v61, %v1941_v0  ;;  %2157 = vst.msk [vmem:[#allocation3 + $0x1e8] sm:$0xff] %vm737_vm0, %v2048_v4  ;;  %v2051_v7 = vsel %vm1907_vm2, %v4774_v62, %v1979_v2  ;;  %v4741_v8 = vpop.f32.mrb[8].mxu0 }
 0x197   : > { %2122 = vst.msk [vmem:[#allocation3 + $0x40] sm:$0xff] %vm737_vm0, %v2013_v5  ;;  %2160 = vst.msk [vmem:[#allocation3 + $0x200] sm:$0xff] %vm737_vm0, %v2051_v7  ;;  %v2049_v9 = vsel %vm1905_vm3, %v1740_v3, %v1977_v6  ;;  %vm1874_vm4 = vcmp.ge.f32.partialorder %v4741_v8, 0.0  ;;  %v1946_v10 = vmul.f32 0.01, %v4741_v8  ;;  %v1609_v11 = vpop.f32.mrb[9].mxu0 }
 0x198   : > { %v4777_v12 = vpop.f32.mrb[8].mxu1  ;;  %2158 = vst.msk [vmem:[#allocation3 + $0x1f0] sm:$0xff] %vm737_vm0, %v2049_v9  ;;  %vm1872_vm5 = vcmp.ge.f32.partialorder %v1609_v11, 0.0  ;;  %v1944_v13 = vmul.f32 0.01, %v1609_v11  ;;  %v4742_v16 = vpop.f32.mrb[10].mxu0 }
 0x199   : > { %vm1910_vm6 = vcmp.ge.f32.partialorder %v4777_v12, 0.0  ;;  %v1982_v14 = vmul.f32 0.01, %v4777_v12  ;;  %v2018_v15 = vsel %vm1874_vm4, %v4741_v8, %v1946_v10  ;;  %v1753_v17 = vpop.f32.mrb[9].mxu1  ;;  %vm1875_vm7 = vcmp.ge.f32.partialorder %v4742_v16, 0.0  ;;  %v1612_v21 = vpop.f32.mrb[11].mxu0 }
 0x19a   : > { %2127 = vst.msk [vmem:[#allocation3 + $0x78] sm:$0xff] %vm737_vm0, %v2018_v15  ;;  %v2016_v18 = vsel %vm1872_vm5, %v1609_v11, %v1944_v13  ;;  %v1947_v20 = vmul.f32 0.01, %v4742_v16  ;;  %v4778_v22 = vpop.f32.mrb[10].mxu1  ;;  %vm1908_vm8 = vcmp.ge.f32.partialorder %v1753_v17, 0.0  ;;  %vm1873_vm9 = vcmp.ge.f32.partialorder %v1612_v21, 0.0 }
 0x19b   : > { %v2054_v19 = vsel %vm1910_vm6, %v4777_v12, %v1982_v14  ;;  %2125 = vst.msk [vmem:[#allocation3 + $0x68] sm:$0xff] %vm737_vm0, %v2016_v18  ;;  %v1980_v23 = vmul.f32 0.01, %v1753_v17  ;;  %v1945_v24 = vmul.f32 0.01, %v1612_v21  ;;  %vm1911_vm10 = vcmp.ge.f32.partialorder %v4778_v22, 0.0 }
 0x19c   : > { %2163 = vst.msk [vmem:[#allocation3 + $0x228] sm:$0xff] %vm737_vm0, %v2054_v19  ;;  %v2019_v25 = vsel %vm1875_vm7, %v4742_v16, %v1947_v20  ;;  %v1983_v26 = vmul.f32 0.01, %v4778_v22  ;;  %v1756_v27 = vpop.f32.mrb[11].mxu1 }
 0x19d   : > { %2128 = vst.msk [vmem:[#allocation3 + $0x80] sm:$0xff] %vm737_vm0, %v2019_v25  ;;  %v2052_v28 = vsel %vm1908_vm8, %v1753_v17, %v1980_v23  ;;  %v2017_v29 = vsel %vm1873_vm9, %v1612_v21, %v1945_v24  ;;  %vm1909_vm11 = vcmp.ge.f32.partialorder %v1756_v27, 0.0  ;;  %v1981_v30 = vmul.f32 0.01, %v1756_v27 }
 0x19e   : > { %2161 = vst.msk [vmem:[#allocation3 + $0x218] sm:$0xff] %vm737_vm0, %v2052_v28  ;;  %2126 = vst.msk [vmem:[#allocation3 + $0x70] sm:$0xff] %vm737_vm0, %v2017_v29  ;;  %v2055_v31 = vsel %vm1911_vm10, %v4778_v22, %v1983_v26  ;;  %v4745_v32 = vpop.f32.mrb[12].mxu0 }
 0x19f   : > { %2164 = vst.msk [vmem:[#allocation3 + $0x230] sm:$0xff] %vm737_vm0, %v2055_v31  ;;  %v2053_v33 = vsel %vm1909_vm11, %v1756_v27, %v1981_v30  ;;  %vm1878_vm12 = vcmp.ge.f32.partialorder %v4745_v32, 0.0  ;;  %v1950_v34 = vmul.f32 0.01, %v4745_v32  ;;  %v1625_v35 = vpop.f32.mrb[13].mxu0  ;;  %v4781_v36 = vpop.f32.mrb[12].mxu1 }
 0x1a0   : > { %2162 = vst.msk [vmem:[#allocation3 + $0x220] sm:$0xff] %vm737_vm0, %v2053_v33  ;;  %vm1876_vm13 = vcmp.ge.f32.partialorder %v1625_v35, 0.0  ;;  %v1948_v37 = vmul.f32 0.01, %v1625_v35  ;;  %vm1914_vm14 = vcmp.ge.f32.partialorder %v4781_v36, 0.0  ;;  %v4746_v40 = vpop.f32.mrb[14].mxu0 }
 0x1a1   : > { %v1986_v38 = vmul.f32 0.01, %v4781_v36  ;;  %v2022_v39 = vsel %vm1878_vm12, %v4745_v32, %v1950_v34  ;;  %v1769_v41 = vpop.f32.mrb[13].mxu1  ;;  %vm1879_vm15 = vcmp.ge.f32.partialorder %v4746_v40, 0.0  ;;  %v1951_v44 = vmul.f32 0.01, %v4746_v40 }
 0x1a2   : > { %2131 = vst.msk [vmem:[#allocation3 + $0xa8] sm:$0xff] %vm737_vm0, %v2022_v39  ;;  %v2020_v42 = vsel %vm1876_vm13, %v1625_v35, %v1948_v37  ;;  %v1628_v45 = vpop.f32.mrb[15].mxu0  ;;  %v4782_v46 = vpop.f32.mrb[14].mxu1  ;;  %vm1912_vm1 = vcmp.ge.f32.partialorder %v1769_v41, 0.0  ;;  %v1984_v47 = vmul.f32 0.01, %v1769_v41 }
 0x1a3   : > { %v2058_v43 = vsel %vm1914_vm14, %v4781_v36, %v1986_v38  ;;  %2129 = vst.msk [vmem:[#allocation3 + $0x98] sm:$0xff] %vm737_vm0, %v2020_v42  ;;  %vm1877_vm2 = vcmp.ge.f32.partialorder %v1628_v45, 0.0  ;;  %v1949_v48 = vmul.f32 0.01, %v1628_v45  ;;  %v2023_v49 = vsel %vm1879_vm15, %v4746_v40, %v1951_v44  ;;  %v1772_v51 = vpop.f32.mrb[15].mxu1 }
 0x1a4   : > { %2167 = vst.msk [vmem:[#allocation3 + $0x258] sm:$0xff] %vm737_vm0, %v2058_v43  ;;  %vm1915_vm3 = vcmp.ge.f32.partialorder %v4782_v46, 0.0  ;;  %v1987_v50 = vmul.f32 0.01, %v4782_v46  ;;  %2132 = vst.msk [vmem:[#allocation3 + $0xb0] sm:$0xff] %vm737_vm0, %v2023_v49  ;;  %v2056_v52 = vsel %vm1912_vm1, %v1769_v41, %v1984_v47  ;;  %vm1913_vm4 = vcmp.ge.f32.partialorder %v1772_v51, 0.0 }
 0x1a5   : > { %v2021_v53 = vsel %vm1877_vm2, %v1628_v45, %v1949_v48  ;;  %v1985_v54 = vmul.f32 0.01, %v1772_v51  ;;  %2165 = vst.msk [vmem:[#allocation3 + $0x248] sm:$0xff] %vm737_vm0, %v2056_v52 }
 0x1a6   : > { %2130 = vst.msk [vmem:[#allocation3 + $0xa0] sm:$0xff] %vm737_vm0, %v2021_v53  ;;  %v2059_v55 = vsel %vm1915_vm3, %v4782_v46, %v1987_v50  ;;  %v4749_v56 = vpop.f32.mrb[16].mxu0 }
 0x1a7   : > { %2168 = vst.msk [vmem:[#allocation3 + $0x260] sm:$0xff] %vm737_vm0, %v2059_v55  ;;  %v2057_v57 = vsel %vm1913_vm4, %v1772_v51, %v1985_v54  ;;  %vm1882_vm5 = vcmp.ge.f32.partialorder %v4749_v56, 0.0  ;;  %v1954_v58 = vmul.f32 0.01, %v4749_v56  ;;  %v1641_v59 = vpop.f32.mrb[17].mxu0  ;;  %v4785_v60 = vpop.f32.mrb[16].mxu1 }
 0x1a8   : > { %2166 = vst.msk [vmem:[#allocation3 + $0x250] sm:$0xff] %vm737_vm0, %v2057_v57  ;;  %vm1880_vm6 = vcmp.ge.f32.partialorder %v1641_v59, 0.0  ;;  %v1952_v61 = vmul.f32 0.01, %v1641_v59  ;;  %vm1918_vm7 = vcmp.ge.f32.partialorder %v4785_v60, 0.0  ;;  %v4750_v0 = vpop.f32.mrb[18].mxu0 }
 0x1a9   : > { %v1990_v62 = vmul.f32 0.01, %v4785_v60  ;;  %v2026_v63 = vsel %vm1882_vm5, %v4749_v56, %v1954_v58  ;;  %v1785_v1 = vpop.f32.mrb[17].mxu1  ;;  %vm1883_vm8 = vcmp.ge.f32.partialorder %v4750_v0, 0.0  ;;  %v1955_v4 = vmul.f32 0.01, %v4750_v0 }
 0x1aa   : > { %2135 = vst.msk [vmem:[#allocation3 + $0xd8] sm:$0xff] %vm737_vm0, %v2026_v63  ;;  %v2024_v2 = vsel %vm1880_vm6, %v1641_v59, %v1952_v61  ;;  %v1644_v5 = vpop.f32.mrb[19].mxu0  ;;  %v4786_v6 = vpop.f32.mrb[18].mxu1  ;;  %vm1916_vm9 = vcmp.ge.f32.partialorder %v1785_v1, 0.0  ;;  %v1988_v7 = vmul.f32 0.01, %v1785_v1 }
 0x1ab   : > { %v2062_v3 = vsel %vm1918_vm7, %v4785_v60, %v1990_v62  ;;  %2133 = vst.msk [vmem:[#allocation3 + $0xc8] sm:$0xff] %vm737_vm0, %v2024_v2  ;;  %vm1881_vm10 = vcmp.ge.f32.partialorder %v1644_v5, 0.0  ;;  %v1953_v8 = vmul.f32 0.01, %v1644_v5  ;;  %v2027_v9 = vsel %vm1883_vm8, %v4750_v0, %v1955_v4  ;;  %v1788_v11 = vpop.f32.mrb[19].mxu1 }
 0x1ac   : > { %2171 = vst.msk [vmem:[#allocation3 + $0x288] sm:$0xff] %vm737_vm0, %v2062_v3  ;;  %vm1919_vm11 = vcmp.ge.f32.partialorder %v4786_v6, 0.0  ;;  %v1991_v10 = vmul.f32 0.01, %v4786_v6  ;;  %2136 = vst.msk [vmem:[#allocation3 + $0xe0] sm:$0xff] %vm737_vm0, %v2027_v9  ;;  %v2060_v12 = vsel %vm1916_vm9, %v1785_v1, %v1988_v7  ;;  %vm1917_vm12 = vcmp.ge.f32.partialorder %v1788_v11, 0.0 }
 0x1ad   : > { %v2025_v13 = vsel %vm1881_vm10, %v1644_v5, %v1953_v8  ;;  %v1989_v14 = vmul.f32 0.01, %v1788_v11  ;;  %2169 = vst.msk [vmem:[#allocation3 + $0x278] sm:$0xff] %vm737_vm0, %v2060_v12 }
 0x1ae   : > { %2134 = vst.msk [vmem:[#allocation3 + $0xd0] sm:$0xff] %vm737_vm0, %v2025_v13  ;;  %v2063_v15 = vsel %vm1919_vm11, %v4786_v6, %v1991_v10  ;;  %v4753_v16 = vpop.f32.mrb[20].mxu0 }
 0x1af   : > { %2172 = vst.msk [vmem:[#allocation3 + $0x290] sm:$0xff] %vm737_vm0, %v2063_v15  ;;  %v2061_v17 = vsel %vm1917_vm12, %v1788_v11, %v1989_v14  ;;  %vm1886_vm13 = vcmp.ge.f32.partialorder %v4753_v16, 0.0  ;;  %v1958_v18 = vmul.f32 0.01, %v4753_v16  ;;  %v1657_v19 = vpop.f32.mrb[21].mxu0  ;;  %v4789_v20 = vpop.f32.mrb[20].mxu1 }
 0x1b0   : > { %2170 = vst.msk [vmem:[#allocation3 + $0x280] sm:$0xff] %vm737_vm0, %v2061_v17  ;;  %vm1884_vm14 = vcmp.ge.f32.partialorder %v1657_v19, 0.0  ;;  %v1956_v21 = vmul.f32 0.01, %v1657_v19  ;;  %vm1922_vm15 = vcmp.ge.f32.partialorder %v4789_v20, 0.0  ;;  %v4754_v24 = vpop.f32.mrb[22].mxu0 }
 0x1b1   : > { %v1994_v22 = vmul.f32 0.01, %v4789_v20  ;;  %v2030_v23 = vsel %vm1886_vm13, %v4753_v16, %v1958_v18  ;;  %v1801_v25 = vpop.f32.mrb[21].mxu1  ;;  %vm1887_vm1 = vcmp.ge.f32.partialorder %v4754_v24, 0.0  ;;  %v1959_v28 = vmul.f32 0.01, %v4754_v24 }
 0x1b2   : > { %2139 = vst.msk [vmem:[#allocation3 + $0x108] sm:$0xff] %vm737_vm0, %v2030_v23  ;;  %v2028_v26 = vsel %vm1884_vm14, %v1657_v19, %v1956_v21  ;;  %v1660_v29 = vpop.f32.mrb[23].mxu0  ;;  %v4790_v30 = vpop.f32.mrb[22].mxu1  ;;  %vm1920_vm2 = vcmp.ge.f32.partialorder %v1801_v25, 0.0  ;;  %v1992_v31 = vmul.f32 0.01, %v1801_v25 }
 0x1b3   : > { %v2066_v27 = vsel %vm1922_vm15, %v4789_v20, %v1994_v22  ;;  %2137 = vst.msk [vmem:[#allocation3 + $0xf8] sm:$0xff] %vm737_vm0, %v2028_v26  ;;  %vm1885_vm3 = vcmp.ge.f32.partialorder %v1660_v29, 0.0  ;;  %v1957_v32 = vmul.f32 0.01, %v1660_v29  ;;  %v2031_v33 = vsel %vm1887_vm1, %v4754_v24, %v1959_v28  ;;  %v1804_v35 = vpop.f32.mrb[23].mxu1 }
 0x1b4   : > { %2175 = vst.msk [vmem:[#allocation3 + $0x2b8] sm:$0xff] %vm737_vm0, %v2066_v27  ;;  %vm1923_vm4 = vcmp.ge.f32.partialorder %v4790_v30, 0.0  ;;  %v1995_v34 = vmul.f32 0.01, %v4790_v30  ;;  %2140 = vst.msk [vmem:[#allocation3 + $0x110] sm:$0xff] %vm737_vm0, %v2031_v33  ;;  %v2064_v36 = vsel %vm1920_vm2, %v1801_v25, %v1992_v31  ;;  %vm1921_vm5 = vcmp.ge.f32.partialorder %v1804_v35, 0.0 }
 0x1b5   : > { %v2029_v37 = vsel %vm1885_vm3, %v1660_v29, %v1957_v32  ;;  %v1993_v38 = vmul.f32 0.01, %v1804_v35  ;;  %2173 = vst.msk [vmem:[#allocation3 + $0x2a8] sm:$0xff] %vm737_vm0, %v2064_v36 }
 0x1b6   : > { %2138 = vst.msk [vmem:[#allocation3 + $0x100] sm:$0xff] %vm737_vm0, %v2029_v37  ;;  %v2067_v39 = vsel %vm1923_vm4, %v4790_v30, %v1995_v34  ;;  %v4757_v40 = vpop.f32.mrb[24].mxu0 }
 0x1b7   : > { %2176 = vst.msk [vmem:[#allocation3 + $0x2c0] sm:$0xff] %vm737_vm0, %v2067_v39  ;;  %v2065_v41 = vsel %vm1921_vm5, %v1804_v35, %v1993_v38  ;;  %vm1890_vm6 = vcmp.ge.f32.partialorder %v4757_v40, 0.0  ;;  %v1962_v42 = vmul.f32 0.01, %v4757_v40  ;;  %v1673_v43 = vpop.f32.mrb[25].mxu0  ;;  %v4793_v44 = vpop.f32.mrb[24].mxu1 }
 0x1b8   : > { %2174 = vst.msk [vmem:[#allocation3 + $0x2b0] sm:$0xff] %vm737_vm0, %v2065_v41  ;;  %vm1888_vm7 = vcmp.ge.f32.partialorder %v1673_v43, 0.0  ;;  %v1960_v45 = vmul.f32 0.01, %v1673_v43  ;;  %vm1926_vm8 = vcmp.ge.f32.partialorder %v4793_v44, 0.0  ;;  %v4758_v48 = vpop.f32.mrb[26].mxu0 }
 0x1b9   : > { %v1998_v46 = vmul.f32 0.01, %v4793_v44  ;;  %v2034_v47 = vsel %vm1890_vm6, %v4757_v40, %v1962_v42  ;;  %v1817_v49 = vpop.f32.mrb[25].mxu1  ;;  %vm1891_vm9 = vcmp.ge.f32.partialorder %v4758_v48, 0.0  ;;  %v1963_v52 = vmul.f32 0.01, %v4758_v48 }
 0x1ba   : > { %2143 = vst.msk [vmem:[#allocation3 + $0x138] sm:$0xff] %vm737_vm0, %v2034_v47  ;;  %v2032_v50 = vsel %vm1888_vm7, %v1673_v43, %v1960_v45  ;;  %v1676_v53 = vpop.f32.mrb[27].mxu0  ;;  %v4794_v54 = vpop.f32.mrb[26].mxu1  ;;  %vm1924_vm10 = vcmp.ge.f32.partialorder %v1817_v49, 0.0  ;;  %v1996_v55 = vmul.f32 0.01, %v1817_v49 }
 0x1bb   : > { %v2070_v51 = vsel %vm1926_vm8, %v4793_v44, %v1998_v46  ;;  %2141 = vst.msk [vmem:[#allocation3 + $0x128] sm:$0xff] %vm737_vm0, %v2032_v50  ;;  %vm1889_vm11 = vcmp.ge.f32.partialorder %v1676_v53, 0.0  ;;  %v1961_v56 = vmul.f32 0.01, %v1676_v53  ;;  %v2035_v57 = vsel %vm1891_vm9, %v4758_v48, %v1963_v52  ;;  %v1820_v59 = vpop.f32.mrb[27].mxu1 }
 0x1bc   : > { %2179 = vst.msk [vmem:[#allocation3 + $0x2e8] sm:$0xff] %vm737_vm0, %v2070_v51  ;;  %vm1927_vm12 = vcmp.ge.f32.partialorder %v4794_v54, 0.0  ;;  %v1999_v58 = vmul.f32 0.01, %v4794_v54  ;;  %2144 = vst.msk [vmem:[#allocation3 + $0x140] sm:$0xff] %vm737_vm0, %v2035_v57  ;;  %v2068_v60 = vsel %vm1924_vm10, %v1817_v49, %v1996_v55  ;;  %vm1925_vm13 = vcmp.ge.f32.partialorder %v1820_v59, 0.0 }
 0x1bd   : > { %v2033_v61 = vsel %vm1889_vm11, %v1676_v53, %v1961_v56  ;;  %v1997_v62 = vmul.f32 0.01, %v1820_v59  ;;  %2177 = vst.msk [vmem:[#allocation3 + $0x2d8] sm:$0xff] %vm737_vm0, %v2068_v60  ;;  %v5218_v49 = vmov (!%p4417_p6), 0.0  }
 0x1be   : > { %2142 = vst.msk [vmem:[#allocation3 + $0x130] sm:$0xff] %vm737_vm0, %v2033_v61  ;;  %v2071_v63 = vsel %vm1927_vm12, %v4794_v54, %v1999_v58  ;;  %v4761_v0 = vpop.f32.mrb[28].mxu0  ;;  %2193 = vst.msk [vmem:[#allocation3 + $0x8] sm:$0xff] (!%p4417_p6), %vm737_vm0, %v5218_v49 }
 0x1bf   : > { %2180 = vst.msk [vmem:[#allocation3 + $0x2f0] sm:$0xff] %vm737_vm0, %v2071_v63  ;;  %v2069_v1 = vsel %vm1925_vm13, %v1820_v59, %v1997_v62  ;;  %vm1894_vm14 = vcmp.ge.f32.partialorder %v4761_v0, 0.0  ;;  %v1966_v2 = vmul.f32 0.01, %v4761_v0  ;;  %v1689_v3 = vpop.f32.mrb[29].mxu0  ;;  %v4797_v4 = vpop.f32.mrb[28].mxu1 }
 0x1c0   : > { %2178 = vst.msk [vmem:[#allocation3 + $0x2e0] sm:$0xff] %vm737_vm0, %v2069_v1  ;;  %vm1892_vm15 = vcmp.ge.f32.partialorder %v1689_v3, 0.0  ;;  %v1964_v5 = vmul.f32 0.01, %v1689_v3  ;;  %vm1930_vm1 = vcmp.ge.f32.partialorder %v4797_v4, 0.0  ;;  %v4762_v8 = vpop.f32.mrb[30].mxu0 }
 0x1c1   : > { %v2002_v6 = vmul.f32 0.01, %v4797_v4  ;;  %v2038_v7 = vsel %vm1894_vm14, %v4761_v0, %v1966_v2  ;;  %v1833_v9 = vpop.f32.mrb[29].mxu1  ;;  %vm1895_vm2 = vcmp.ge.f32.partialorder %v4762_v8, 0.0  ;;  %v1967_v12 = vmul.f32 0.01, %v4762_v8 }
 0x1c2   : > { %2147 = vst.msk [vmem:[#allocation3 + $0x168] sm:$0xff] %vm737_vm0, %v2038_v7  ;;  %v2036_v10 = vsel %vm1892_vm15, %v1689_v3, %v1964_v5  ;;  %v1692_v13 = vpop.f32.mrb[31].mxu0  ;;  %v4798_v14 = vpop.f32.mrb[30].mxu1  ;;  %vm1928_vm3 = vcmp.ge.f32.partialorder %v1833_v9, 0.0  ;;  %v2000_v15 = vmul.f32 0.01, %v1833_v9 }
 0x1c3   : > { %v2074_v11 = vsel %vm1930_vm1, %v4797_v4, %v2002_v6  ;;  %2145 = vst.msk [vmem:[#allocation3 + $0x158] sm:$0xff] %vm737_vm0, %v2036_v10  ;;  %vm1893_vm4 = vcmp.ge.f32.partialorder %v1692_v13, 0.0  ;;  %v1965_v16 = vmul.f32 0.01, %v1692_v13  ;;  %v2039_v17 = vsel %vm1895_vm2, %v4762_v8, %v1967_v12  ;;  %v1836_v19 = vpop.f32.mrb[31].mxu1  ;;  %2194 = vst.msk [vmem:[#allocation3 + $0x10] sm:$0xff] (!%p4417_p6), %vm737_vm0, %v5218_v49 }
 0x1c4   : > { %2183 = vst.msk [vmem:[#allocation3 + $0x318] sm:$0xff] %vm737_vm0, %v2074_v11  ;;  %vm1931_vm5 = vcmp.ge.f32.partialorder %v4798_v14, 0.0  ;;  %v2003_v18 = vmul.f32 0.01, %v4798_v14  ;;  %2148 = vst.msk [vmem:[#allocation3 + $0x170] sm:$0xff] %vm737_vm0, %v2039_v17  ;;  %v2072_v20 = vsel %vm1928_vm3, %v1833_v9, %v2000_v15  ;;  %vm1929_vm6 = vcmp.ge.f32.partialorder %v1836_v19, 0.0 }
 0x1c5   : > { %v2037_v21 = vsel %vm1893_vm4, %v1692_v13, %v1965_v16  ;;  %v2001_v22 = vmul.f32 0.01, %v1836_v19  ;;  %2181 = vst.msk [vmem:[#allocation3 + $0x308] sm:$0xff] %vm737_vm0, %v2072_v20  ;;  %2195 = vst.msk [vmem:[#allocation3 + $0x18] sm:$0xff] (!%p4417_p6), %vm737_vm0, %v5218_v49 }
 0x1c6   : > { %2146 = vst.msk [vmem:[#allocation3 + $0x160] sm:$0xff] %vm737_vm0, %v2037_v21  ;;  %v2075_v23 = vsel %vm1931_vm5, %v4798_v14, %v2003_v18  ;;  %v4765_v24 = vpop.f32.mrb[32].mxu0  ;;  %2196 = vst.msk [vmem:[#allocation3 + $0x20] sm:$0xff] (!%p4417_p6), %vm737_vm0, %v5218_v49 }
 0x1c7   : > { %2184 = vst.msk [vmem:[#allocation3 + $0x320] sm:$0xff] %vm737_vm0, %v2075_v23  ;;  %v2073_v25 = vsel %vm1929_vm6, %v1836_v19, %v2001_v22  ;;  %vm1898_vm7 = vcmp.ge.f32.partialorder %v4765_v24, 0.0  ;;  %v1970_v26 = vmul.f32 0.01, %v4765_v24  ;;  %v1705_v27 = vpop.f32.mrb[33].mxu0  ;;  %v4801_v28 = vpop.f32.mrb[32].mxu1 }
 0x1c8   : > { %2182 = vst.msk [vmem:[#allocation3 + $0x310] sm:$0xff] %vm737_vm0, %v2073_v25  ;;  %vm1896_vm8 = vcmp.ge.f32.partialorder %v1705_v27, 0.0  ;;  %v1968_v29 = vmul.f32 0.01, %v1705_v27  ;;  %vm1934_vm9 = vcmp.ge.f32.partialorder %v4801_v28, 0.0  ;;  %v4766_v32 = vpop.f32.mrb[34].mxu0 }
 0x1c9   : > { %v2006_v30 = vmul.f32 0.01, %v4801_v28  ;;  %v2042_v31 = vsel %vm1898_vm7, %v4765_v24, %v1970_v26  ;;  %v1849_v33 = vpop.f32.mrb[33].mxu1  ;;  %vm1899_vm10 = vcmp.ge.f32.partialorder %v4766_v32, 0.0  ;;  %v1971_v36 = vmul.f32 0.01, %v4766_v32 }
 0x1ca   : > { %2151 = vst.msk [vmem:[#allocation3 + $0x198] sm:$0xff] %vm737_vm0, %v2042_v31  ;;  %v2040_v34 = vsel %vm1896_vm8, %v1705_v27, %v1968_v29  ;;  %v1708_v37 = vpop.f32.mrb[35].mxu0  ;;  %v4802_v38 = vpop.f32.mrb[34].mxu1  ;;  %vm1932_vm11 = vcmp.ge.f32.partialorder %v1849_v33, 0.0  ;;  %v2004_v39 = vmul.f32 0.01, %v1849_v33 }
 0x1cb   : > { %v2078_v35 = vsel %vm1934_vm9, %v4801_v28, %v2006_v30  ;;  %2149 = vst.msk [vmem:[#allocation3 + $0x188] sm:$0xff] %vm737_vm0, %v2040_v34  ;;  %vm1897_vm12 = vcmp.ge.f32.partialorder %v1708_v37, 0.0  ;;  %v1969_v40 = vmul.f32 0.01, %v1708_v37  ;;  %v2043_v41 = vsel %vm1899_vm10, %v4766_v32, %v1971_v36  ;;  %v1852_v43 = vpop.f32.mrb[35].mxu1  ;;  %2192 = sbr.rel (%p4417_p6) target bundleno = 466 (0x1d2), region = 64 }
 0x1cc   : > { %2187 = vst.msk [vmem:[#allocation3 + $0x348] sm:$0xff] %vm737_vm0, %v2078_v35  ;;  %vm1935_vm13 = vcmp.ge.f32.partialorder %v4802_v38, 0.0  ;;  %v2007_v42 = vmul.f32 0.01, %v4802_v38  ;;  %2152 = vst.msk [vmem:[#allocation3 + $0x1a0] sm:$0xff] %vm737_vm0, %v2043_v41  ;;  %v2076_v44 = vsel %vm1932_vm11, %v1849_v33, %v2004_v39  ;;  %vm1933_vm14 = vcmp.ge.f32.partialorder %v1852_v43, 0.0 }
 0x1cd   : > { %v2041_v45 = vsel %vm1897_vm12, %v1708_v37, %v1969_v40  ;;  %v2005_v46 = vmul.f32 0.01, %v1852_v43  ;;  %2185 = vst.msk [vmem:[#allocation3 + $0x338] sm:$0xff] %vm737_vm0, %v2076_v44 }
 0x1ce   : > { %2150 = vst.msk [vmem:[#allocation3 + $0x190] sm:$0xff] %vm737_vm0, %v2041_v45  ;;  %v2079_v47 = vsel %vm1935_vm13, %v4802_v38, %v2007_v42 }
 0x1cf   : > { %2188 = vst.msk [vmem:[#allocation3 + $0x350] sm:$0xff] %vm737_vm0, %v2079_v47  ;;  %v2077_v48 = vsel %vm1933_vm14, %v1852_v43, %v2005_v46 }
 0x1d0   : > { %2186 = vst.msk [vmem:[#allocation3 + $0x340] sm:$0xff] %vm737_vm0, %v2077_v48 }
 0x1d2 PF: > { %p4418_p7 = scmp.ne.s32.totalorder %s5194_s16, 1 }
 0x1d3   : > { %v5219_v50 = vmov (!%p4418_p7), 0.0  }
 0x1d4   : > { %2200 = sbr.rel (%p4418_p7) target bundleno = 475 (0x1db), region = 68  ;;  %2202 = vst.msk [vmem:[#allocation3 + $0x338] sm:$0xff] (!%p4418_p7), %vm737_vm0, %v5219_v50  ;;  %2203 = vst.msk [vmem:[#allocation3 + $0x340] sm:$0xff] (!%p4418_p7), %vm737_vm0, %v5219_v50 }
 0x1d5   : > { %2204 = vst.msk [vmem:[#allocation3 + $0x348] sm:$0xff] (!%p4418_p7), %vm737_vm0, %v5219_v50  ;;  %2205 = vst.msk [vmem:[#allocation3 + $0x350] sm:$0xff] (!%p4418_p7), %vm737_vm0, %v5219_v50 }
 0x1db PF: > { %v5735_v51 = vld [vmem:[%s7495_s8] sm:$0x7]  ;;  %v5740_v52 = vld [vmem:[%s7495_s8 + $0x4] sm:$0x7]  ;;  %v5745_v53 = vld [vmem:[%s7495_s8 + $0x8] sm:$0x7] }
 0x1dc   : > { %7630 = vst [vmem:[#allocation17_spill] sm:$0xff] %v5735_v51  ;;  %7631 = vst [vmem:[#allocation18_spill] sm:$0xff] %v5740_v52  ;;  %v5750_v54 = vld [vmem:[%s7496_s9] sm:$0x7]  ;;  %v5755_v55 = vld [vmem:[%s7496_s9 + $0x4] sm:$0x7] }
 0x1dd   : > { %7632 = vst [vmem:[#allocation19_spill] sm:$0xff] %v5745_v53  ;;  %7633 = vst [vmem:[#allocation20_spill] sm:$0xff] %v5750_v54  ;;  %v5760_v56 = vld [vmem:[%s7496_s9 + $0x8] sm:$0x7]  ;;  %s5762_s29 = smov 0  }
 0x1de   : > { %7634 = vst [vmem:[#allocation21_spill] sm:$0xff] %v5755_v55  ;;  %7635 = vst [vmem:[#allocation22_spill] sm:$0xff] %v5760_v56 }
 0x1df LB: >> { %v2253_v57 = vlaneseq  ;;  %s4420_s24 = smul.u32 384, %s5214_s29  ;;  %s4669_s25 = sshll.u32 %s5214_s29, 8  ;;  %s5214_s29 = sphi %s5762_s29, %s2217_s29  }
 0x1e0   : >> { %s6043_s26 = scalar_lea.vmem %s5401_s2, %s4669_s25  ;;  %s6083_s30 = scalar_lea.vmem %s615_s11, %s4669_s25 [#allocation4] }
 0x1e1   : >> { %v2254_v58 = vshrl.u32 %v2253_v57, 7  ;;  %s5770_s21 = scalar_lea.vmem [#allocation3], %s4420_s24  ;;  %s2217_s29 = sadd.s32 1, %s5214_s29  }
 0x1e2   : >> { %v2221_v62 = vld [vmem:[%s5770_s21 + $0x7] sm:$0xff]  ;;  %v5806_v13 = vld [vmem:[%s5770_s21 + $0x37] sm:$0xff]  ;;  %v2222_v32 = vld [vmem:[%s5770_s21 + $0xf] sm:$0xff]  ;;  %p2214_p9 = scmp.ge.s32.totalorder %s2217_s29, 2  }
 0x1e3   : >> { %v7640_v52 = vld [vmem:[#allocation18_spill] sm:$0xff]  ;;  %v7641_v51 = vld [vmem:[#allocation17_spill] sm:$0xff]  ;;  %v2255_v59 = vsub.s32 0, %v2254_v58  ;;  %v2423_v60 = vsub.s32 1, %v2254_v58  ;;  %v5768_v61 = vsub.s32 2, %v2254_v58  ;;  %v5821_v22 = vld [vmem:[%s5770_s21 + $0x38] sm:$0xff] }
 0x1e4   : >> { %v7638_v54 = vld [vmem:[#allocation20_spill] sm:$0xff]  ;;  %v7639_v53 = vld [vmem:[#allocation19_spill] sm:$0xff]  ;;  %v2389_v63 = vld [vmem:[%s5770_s21 + $0x8] sm:$0xff]  ;;  %s4653_s16 = sshll.u32 (%p2214_p9), %s5198_s17, 7  ;;  %s4079_s18 = sshll.u32 (%p2214_p9), %s615_s11, 4  ;;  %s7426_s18 = int_to_ptr.vmem [resolvable:$true] %s4079_s18 }
 0x1e5   : >> { %v7636_v56 = vld [vmem:[#allocation22_spill] sm:$0xff]  ;;  %v7637_v55 = vld [vmem:[#allocation21_spill] sm:$0xff]  ;;  %v5775_v0 = vrot.slane %v7641_v51, %v2255_v59  ;;  %v5778_v1 = vrot.slane %v7638_v54, %v2255_v59  ;;  %v5781_v2 = vrot.slane %v7641_v51, %v2423_v60  ;;  %v5784_v3 = vrot.slane %v7638_v54, %v2423_v60  ;;  %v2390_v39 = vld [vmem:[%s5770_s21 + $0x10] sm:$0xff]  ;;  %s4076_s27 = sadd.s32 (%p2214_p9), %s4653_s16, %s5351_s12  ;;  %s7741_s19 = sld [smem:[#allocation37_spill]] (%p2214_p9) }
 0x1e6   : >> { %v2557_v4 = vld [vmem:[%s5770_s21 + $0x9] sm:$0xff]  ;;  %v5789_v5 = vrot.slane %v7641_v51, %v5768_v61  ;;  %v5793_v6 = vrot.slane %v7638_v54, %v5768_v61  ;;  %v5796_v7 = vrot.slane %v7640_v52, %v2255_v59  ;;  %v5799_v8 = vrot.slane %v7637_v55, %v2255_v59  ;;  %v5842_v31 = vld [vmem:[%s5770_s21 + $0x39] sm:$0xff]  ;;  %v2558_v43 = vld [vmem:[%s5770_s21 + $0x11] sm:$0xff]  ;;  %s4654_s20 = sshll.u32 (%p2214_p9), %s4076_s27, 7  ;;  %s7435_s2 = scalar_lea.sflag (%p2214_p9), [#allocation5], %s613_s13 }
 0x1e7   : >> { %v2257_v9 = vmul.f32 %v5775_v0, %v2221_v62  ;;  %v2325_v10 = vmul.f32 %v5778_v1, %v2221_v62  ;;  %v2425_v11 = vmul.f32 %v5781_v2, %v2389_v63  ;;  %v2493_v12 = vmul.f32 %v5784_v3, %v2389_v63  ;;  %v5850_v37 = vld [vmem:[%s5770_s21 + $0x67] sm:$0xff]  ;;  %v5985_v54 = vld [vmem:[%s5770_s21 + $0x4f] sm:$0xff]  ;;  %s5112_s24 = scalar_lea.vmem (%p2214_p9), %s7426_s18, 8192  ;;  %s5220_s17 = smov (%p2214_p9), [#allocation4]  }
 0x1e8   : >> { %v2593_v14 = vmul.f32 %v5789_v5, %v2557_v4  ;;  %v2661_v15 = vmul.f32 %v5793_v6, %v2557_v4  ;;  %v2764_v16 = vmul.f32 %v5806_v13, %v5796_v7  ;;  %v2832_v17 = vmul.f32 %v5806_v13, %v5799_v8  ;;  %v5864_v47 = vld [vmem:[%s5770_s21 + $0x68] sm:$0xff]  ;;  %p5113_p10 = scmp.ne.s32.totalorder (%p2214_p9), %s7426_s18, %s5112_s24  ;;  %s5116_s12 = sshll.u32 (%p2214_p9), %s5220_s17, 4  ;;  %s5117_s12 = int_to_ptr.vmem [resolvable:$false] %s5116_s12 }
 0x1e9   : >> { %v2457_v18 = vadd.f32 %v2425_v11, %v2257_v9  ;;  %v2525_v19 = vadd.f32 %v2493_v12, %v2325_v10  ;;  %v5815_v20 = vrot.slane %v7640_v52, %v2423_v60  ;;  %v5818_v21 = vrot.slane %v7637_v55, %v2423_v60  ;;  %v5880_v9 = vld [vmem:[%s5770_s21 + $0x3f] sm:$0xff]  ;;  %v5883_v10 = vld [vmem:[%s5770_s21 + $0x69] sm:$0xff]  ;;  %s5118_s10 = scalar_lea.vmem (%p2214_p9), %s5117_s12, 16384  ;;  %p5119_p13 = scmp.lt.s32.totalorder (%p2214_p9), %s7426_s18, %s5117_s12 }
 0x1ea   : >> { %v5825_v23 = vrot.slane %v7640_v52, %v5768_v61  ;;  %v5829_v24 = vrot.slane %v7637_v55, %v5768_v61  ;;  %v5832_v25 = vrot.slane %v7639_v53, %v2255_v59  ;;  %v5835_v26 = vrot.slane %v7636_v56, %v2255_v59  ;;  %p5114_p11 = pnand (%p2214_p9), %p5113_p10, %p5329_p3  ;;  %p5120_p0 = scmp.lt.s32.totalorder (%p2214_p9), %s5118_s10, %s5112_s24 }
 0x1eb   : >> { %v2625_v27 = vadd.f32 %v2593_v14, %v2457_v18  ;;  %v2693_v28 = vadd.f32 %v2661_v15, %v2525_v19  ;;  %v2932_v29 = vmul.f32 %v5821_v22, %v5815_v20  ;;  %v3000_v30 = vmul.f32 %v5821_v22, %v5818_v21  ;;  %s7742_s22 = smov (%p2214_p9), %s7741_s19  ;;  %s7431_s29 = scalar_lea.hbm (%p2214_p9), %s7741_s19, %s4654_s20 }
 0x1ec   : >> { %v3100_v33 = vmul.f32 %v5842_v31, %v5825_v23  ;;  %v3168_v36 = vmul.f32 %v5842_v31, %v5829_v24  ;;  %v5853_v38 = vrot.slane %v7639_v53, %v2423_v60  ;;  %v3271_v40 = vmul.f32 %v5850_v37, %v5832_v25  ;;  %p5115_p12 = pneg (%p2214_p9), %p5114_p11  ;;  %p5121_p1 = por (%p2214_p9), %p5120_p0, %p5119_p13 }
 0x1ed   : >> { %v2796_v34 = vadd.f32 %v2764_v16, %v2625_v27  ;;  %v2864_v35 = vadd.f32 %v2832_v17, %v2693_v28  ;;  %v2258_v41 = vmul.f32 %v5775_v0, %v2222_v32  ;;  %v2326_v42 = vmul.f32 %v5778_v1, %v2222_v32  ;;  %v5892_v17 = vld [vmem:[%s5770_s21 + $0x40] sm:$0xff] }
 0x1ee   : >> { %v3339_v46 = vmul.f32 %v5850_v37, %v5835_v26  ;;  %v5868_v48 = vrot.slane %v7639_v53, %v5768_v61  ;;  %v3439_v49 = vmul.f32 %v5864_v47, %v5853_v38  ;;  %v5873_v50 = vrot.slane %v7636_v56, %v2423_v60  ;;  %p5122_p2 = pnand (%p2214_p9), %p5121_p1, %p5115_p12 }
 0x1ef   : >> { %v2964_v44 = vadd.f32 %v2932_v29, %v2796_v34  ;;  %v3032_v45 = vadd.f32 %v3000_v30, %v2864_v35  ;;  %v2426_v57 = vmul.f32 %v5781_v2, %v2390_v39  ;;  %v2494_v58 = vmul.f32 %v5784_v3, %v2390_v39  ;;  %v5905_v34 = vld [vmem:[%s5770_s21 + $0x41] sm:$0xff]  ;;  %v5908_v35 = vld [vmem:[%s5770_s21 + $0x6f] sm:$0xff] }
 0x1f0   : >> { %v2594_v63 = vmul.f32 %v5789_v5, %v2558_v43  ;;  %v2662_v4 = vmul.f32 %v5793_v6, %v2558_v43  ;;  %v2765_v60 = vmul.f32 %v5880_v9, %v5796_v7  ;;  %v2833_v14 = vmul.f32 %v5880_v9, %v5799_v8  ;;  %v5916_v43 = vld [vmem:[%s5770_s21 + $0x70] sm:$0xff] }
 0x1f1   : >> { %v3132_v59 = vadd.f32 %v3100_v33, %v2964_v44  ;;  %v3200_v62 = vadd.f32 %v3168_v36, %v3032_v45  ;;  %v2458_v11 = vadd.f32 %v2426_v57, %v2258_v41  ;;  %v2526_v12 = vadd.f32 %v2494_v58, %v2326_v42  ;;  %v2223_v36 = vld [vmem:[%s5770_s21 + $0x17] sm:$0xff]  ;;  %7642 = vst [vmem:[#allocation23_spill] sm:$0xff] %v5916_v43 }
 0x1f2   : >> { %v3607_v16 = vmul.f32 %v5883_v10, %v5868_v48  ;;  %v2933_v27 = vmul.f32 %v5892_v17, %v5815_v20  ;;  %v3001_v28 = vmul.f32 %v5892_v17, %v5818_v21  ;;  %v3507_v32 = vmul.f32 %v5864_v47, %v5873_v50  ;;  %v2391_v44 = vld [vmem:[%s5770_s21 + $0x18] sm:$0xff] }
 0x1f3   : >> { %v3303_v15 = vadd.f32 %v3271_v40, %v3132_v59  ;;  %v2626_v18 = vadd.f32 %v2594_v63, %v2458_v11  ;;  %v2694_v19 = vadd.f32 %v2662_v4, %v2526_v12  ;;  %v3371_v29 = vadd.f32 %v3339_v46, %v3200_v62  ;;  %v2559_v45 = vld [vmem:[%s5770_s21 + $0x19] sm:$0xff] }
 0x1f4   : >> { %v5902_v33 = vrot.slane %v7636_v56, %v5768_v61  ;;  %v3101_v41 = vmul.f32 %v5905_v34, %v5825_v23  ;;  %v3169_v42 = vmul.f32 %v5905_v34, %v5829_v24  ;;  %v3272_v46 = vmul.f32 %v5908_v35, %v5832_v25 }
 0x1f5   : >> { %v3471_v30 = vadd.f32 %v3439_v49, %v3303_v15  ;;  %v2797_v39 = vadd.f32 %v2765_v60, %v2626_v18  ;;  %v2865_v40 = vadd.f32 %v2833_v14, %v2694_v19  ;;  %v3340_v49 = vmul.f32 %v5908_v35, %v5835_v26  ;;  %v5932_v14 = vld [vmem:[%s5770_s21 + $0x47] sm:$0xff] }
 0x1f6   : >> { %v3440_v57 = vmul.f32 %v5916_v43, %v5853_v38  ;;  %v2259_v62 = vmul.f32 %v5775_v0, %v2223_v36  ;;  %v2327_v63 = vmul.f32 %v5778_v1, %v2223_v36  ;;  %v2427_v11 = vmul.f32 %v5781_v2, %v2391_v44 }
 0x1f7   : >> { %v3639_v61 = vadd.f32 %v3607_v16, %v3471_v30  ;;  %v2965_v58 = vadd.f32 %v2933_v27, %v2797_v39  ;;  %v3033_v59 = vadd.f32 %v3001_v28, %v2865_v40  ;;  %v2495_v12 = vmul.f32 %v5784_v3, %v2391_v44  ;;  %v5938_v27 = vld [vmem:[%s5770_s21 + $0x71] sm:$0xff]  ;;  %v5947_v44 = vld [vmem:[%s5770_s21 + $0x48] sm:$0xff] }
 0x1f8   : >> { %v2595_v60 = vmul.f32 %v5789_v5, %v2559_v45  ;;  %v2663_v18 = vmul.f32 %v5793_v6, %v2559_v45  ;;  %v2766_v19 = vmul.f32 %v5932_v14, %v5796_v7  ;;  %7643 = vst [vmem:[#allocation24_spill] sm:$0xff] %v5938_v27  ;;  %v2459_v28 = vadd.f32 %v2427_v11, %v2259_v62  ;;  %v2224_v11 = vld [vmem:[%s5770_s21 + $0x1f] sm:$0xff] }
 0x1f9   : >> { %v4617_v4 = vmul.f32 -1.442695, %v3639_v61  ;;  %v3133_v15 = vadd.f32 %v3101_v41, %v2965_v58  ;;  %v3201_v16 = vadd.f32 %v3169_v42, %v3033_v59  ;;  %v2527_v30 = vadd.f32 %v2495_v12, %v2327_v63 }
 0x1fa   : >> { %v2834_v36 = vmul.f32 %v5932_v14, %v5799_v8  ;;  %v3539_v39 = vadd.f32 %v3507_v32, %v3371_v29  ;;  %v3675_v40 = vmul.f32 %v5883_v10, %v5902_v33  ;;  %v3608_v42 = vmul.f32 %v5938_v27, %v5868_v48  ;;  %v5954_v32 = vld [vmem:[%s5770_s21 + $0x49] sm:$0xff] }
 0x1fb   : >> { %4984 = vpow2.f32 %v4617_v4  ;;  %v3304_v41 = vadd.f32 %v3272_v46, %v3133_v15  ;;  %v2627_v45 = vadd.f32 %v2595_v60, %v2459_v28  ;;  %v2695_v61 = vadd.f32 %v2663_v18, %v2527_v30  ;;  %v5961_v4 = vld [vmem:[%s5770_s21 + $0x77] sm:$0xff] }
 0x1fc   : >> { %v2934_v58 = vmul.f32 %v5947_v44, %v5815_v20  ;;  %v3002_v29 = vmul.f32 %v5947_v44, %v5818_v21  ;;  %v3372_v59 = vadd.f32 %v3340_v49, %v3201_v16  ;;  %v3508_v62 = vmul.f32 %v5916_v43, %v5873_v50  ;;  %7644 = vst [vmem:[#allocation25_spill] sm:$0xff] %v5961_v4  ;;  %v5969_v49 = vld [vmem:[%s5770_s21 + $0x78] sm:$0xff]  ;;  %v2560_v16 = vld [vmem:[%s5770_s21 + $0x21] sm:$0xff] }
 0x1fd   : >> { %v3472_v46 = vadd.f32 %v3440_v57, %v3304_v41  ;;  %v3102_v63 = vmul.f32 %v5954_v32, %v5825_v23  ;;  %v2798_v12 = vadd.f32 %v2766_v19, %v2627_v45  ;;  %v2866_v60 = vadd.f32 %v2834_v36, %v2695_v61  ;;  %7645 = vst [vmem:[#allocation26_spill] sm:$0xff] %v5969_v49  ;;  %v2392_v57 = vld [vmem:[%s5770_s21 + $0x20] sm:$0xff] }
 0x1fe   : >> { %v3170_v15 = vmul.f32 %v5954_v32, %v5829_v24  ;;  %v3273_v18 = vmul.f32 %v5961_v4, %v5832_v25  ;;  %v3341_v30 = vmul.f32 %v5961_v4, %v5835_v26  ;;  %v3441_v41 = vmul.f32 %v5969_v49, %v5853_v38 }
 0x1ff   : >> { %v3640_v28 = vadd.f32 %v3608_v42, %v3472_v46  ;;  %v3509_v19 = vmul.f32 %v5969_v49, %v5873_v50  ;;  %v2966_v36 = vadd.f32 %v2934_v58, %v2798_v12  ;;  %v3034_v45 = vadd.f32 %v3002_v29, %v2866_v60  ;;  %v5991_v29 = vld [vmem:[%s5770_s21 + $0x79] sm:$0xff] }
 0x200   : >> { %v2260_v61 = vmul.f32 %v5775_v0, %v2224_v11  ;;  %v2328_v51 = vmul.f32 %v5778_v1, %v2224_v11  ;;  %v2428_v42 = vmul.f32 %v5781_v2, %v2392_v57  ;;  %v2496_v46 = vmul.f32 %v5784_v3, %v2392_v57  ;;  %v5996_v57 = vld [vmem:[%s5770_s21 + $0x50] sm:$0xff] }
 0x201   : >> { %v4618_v52 = vmul.f32 -1.442695, %v3640_v28  ;;  %v2596_v53 = vmul.f32 %v5789_v5, %v2560_v16  ;;  %v3134_v55 = vadd.f32 %v3102_v63, %v2966_v36  ;;  %v3202_v56 = vadd.f32 %v3170_v15, %v3034_v45  ;;  %7646 = vst [vmem:[#allocation27_spill] sm:$0xff] %v5996_v57 }
 0x202   : >> { %v2664_v49 = vmul.f32 %v5793_v6, %v2560_v16  ;;  %v2767_v58 = vmul.f32 %v5985_v54, %v5796_v7  ;;  %v2460_v11 = vadd.f32 %v2428_v42, %v2260_v61  ;;  %v2528_v12 = vadd.f32 %v2496_v46, %v2328_v51 }
 0x203   : >> { %4986 = vpow2.f32 %v4618_v52  ;;  %v2835_v60 = vmul.f32 %v5985_v54, %v5799_v8  ;;  %v3305_v4 = vadd.f32 %v3273_v18, %v3134_v55  ;;  %v3373_v63 = vadd.f32 %v3341_v30, %v3202_v56  ;;  %v6009_v18 = vld [vmem:[%s5770_s21 + $0x51] sm:$0xff] }
 0x204   : >> { %v3609_v15 = vmul.f32 %v5991_v29, %v5868_v48  ;;  %v2935_v16 = vmul.f32 %v5996_v57, %v5815_v20  ;;  %v2628_v36 = vadd.f32 %v2596_v53, %v2460_v11  ;;  %v2696_v45 = vadd.f32 %v2664_v49, %v2528_v12  ;;  %7647 = vst [vmem:[#allocation28_spill] sm:$0xff] %v6009_v18  ;;  %v6026_v12 = vld [vmem:[%s5770_s21 + $0x80] sm:$0xff] }
 0x205   : >> { %v4985_v28 = vpop.eup %4984  ;;  %v3003_v51 = vmul.f32 %v5996_v57, %v5818_v21  ;;  %v6004_v61 = vadd.f32 %v3675_v40, %v3539_v39  ;;  %v3540_v42 = vadd.f32 %v3508_v62, %v3372_v59  ;;  %v3676_v55 = vmul.f32 %v5938_v27, %v5902_v33  ;;  %v6018_v59 = vld [vmem:[%s5770_s21 + $0x7f] sm:$0xff] }
 0x206   : >> { %v3835_v52 = vadd.f32 1.0, %v4985_v28  ;;  %v3473_v56 = vadd.f32 %v3441_v41, %v3305_v4  ;;  %v2799_v30 = vadd.f32 %v2767_v58, %v2628_v36  ;;  %v2867_v46 = vadd.f32 %v2835_v60, %v2696_v45  ;;  %7648 = vst [vmem:[#allocation29_spill] sm:$0xff] %v6018_v59  ;;  %v6046_v45 = vld [vmem:[%s5770_s21 + $0x81] sm:$0xff] }
 0x207   : >> { %v3103_v53 = vmul.f32 %v6009_v18, %v5825_v23  ;;  %v3541_v49 = vadd.f32 %v3509_v19, %v3373_v63  ;;  %v3677_v39 = vmul.f32 %v5991_v29, %v5902_v33  ;;  %v3171_v40 = vmul.f32 %v6009_v18, %v5829_v24  ;;  %7649 = vst [vmem:[#allocation30_spill] sm:$0xff] %v6046_v45 }
 0x208   : >> { %4988 = vrcp.f32 %v3835_v52  ;;  %v3641_v11 = vadd.f32 %v3609_v15, %v3473_v56  ;;  %v2967_v62 = vadd.f32 %v2935_v16, %v2799_v30  ;;  %v3035_v4 = vadd.f32 %v3003_v51, %v2867_v46 }
 0x209   : >> { %v3274_v41 = vmul.f32 %v6018_v59, %v5832_v25  ;;  %v3342_v19 = vmul.f32 %v6018_v59, %v5835_v26  ;;  %v2261_v60 = vmul.f32 %v5806_v13, %v5775_v0  ;;  %v2329_v28 = vmul.f32 %v5806_v13, %v5778_v1 }
 0x20a   : >> { %v4619_v58 = vmul.f32 -1.442695, %v3641_v11  ;;  %v2429_v63 = vmul.f32 %v5821_v22, %v5781_v2  ;;  %v3135_v15 = vadd.f32 %v3103_v53, %v2967_v62  ;;  %v3442_v16 = vmul.f32 %v6026_v12, %v5853_v38 }
 0x20b   : >> { %v2497_v52 = vmul.f32 %v5821_v22, %v5784_v3  ;;  %v2597_v36 = vmul.f32 %v5842_v31, %v5789_v5  ;;  %v2665_v51 = vmul.f32 %v5842_v31, %v5793_v6  ;;  %v2768_v56 = vmul.f32 %v5850_v37, %v5796_v7  ;;  %v3933_v31 = vld [vmem:[%s6043_s26] sm:$0xff] }
 0x20c   : >> { %4990 = vpow2.f32 %v4619_v58  ;;  %v2461_v13 = vadd.f32 %v2429_v63, %v2261_v60  ;;  %v3306_v46 = vadd.f32 %v3274_v41, %v3135_v15  ;;  %v3610_v22 = vmul.f32 %v6046_v45, %v5868_v48 }
 0x20d   : >> { %v4987_v30 = vpop.eup %4986  ;;  %v2529_v53 = vadd.f32 %v2497_v52, %v2329_v28  ;;  %v2836_v11 = vmul.f32 %v5850_v37, %v5799_v8  ;;  %v3203_v58 = vadd.f32 %v3171_v40, %v3035_v4  ;;  %v2936_v60 = vmul.f32 %v5864_v47, %v5815_v20 }
 0x20e   : >> { %v3836_v62 = vadd.f32 1.0, %v4987_v30  ;;  %v2629_v59 = vadd.f32 %v2597_v36, %v2461_v13  ;;  %v6059_v63 = vadd.f32 %v3676_v55, %v3540_v42  ;;  %v3474_v18 = vadd.f32 %v3442_v16, %v3306_v46  ;;  %v6072_v36 = vld [vmem:[%s5770_s21 + $0x97] sm:$0xff] }
 0x20f   : >> { %v2697_v57 = vadd.f32 %v2665_v51, %v2529_v53  ;;  %v3004_v41 = vmul.f32 %v5864_v47, %v5818_v21  ;;  %v6063_v28 = vadd.f32 %v3677_v39, %v3541_v49  ;;  %v3104_v4 = vmul.f32 %v5883_v10, %v5825_v23  ;;  %7650 = vst [vmem:[#allocation31_spill] sm:$0xff] %v6072_v36 }
 0x210   : >> { %4992 = vrcp.f32 %v3836_v62  ;;  %v2800_v40 = vadd.f32 %v2768_v56, %v2629_v59  ;;  %v3510_v42 = vmul.f32 %v6026_v12, %v5873_v50  ;;  %v3642_v55 = vadd.f32 %v3610_v22, %v3474_v18  ;;  %v6077_v59 = vld [vmem:[%s5770_s21 + $0x98] sm:$0xff] }
 0x211   : >> { %v2868_v16 = vadd.f32 %v2836_v11, %v2697_v57  ;;  %v3172_v52 = vmul.f32 %v5883_v10, %v5829_v24  ;;  %v3374_v51 = vadd.f32 %v3342_v19, %v3203_v58  ;;  %v3275_v39 = vmul.f32 %v6072_v36, %v5832_v25  ;;  %7651 = vst [vmem:[#allocation32_spill] sm:$0xff] %v6077_v59  ;;  %v6095_v62 = vld [vmem:[%s5770_s21 + $0x99] sm:$0xff] }
 0x212   : >> { %v4989_v15 = vpop.eup %4988  ;;  %v2968_v49 = vadd.f32 %v2936_v60, %v2800_v40  ;;  %v4620_v57 = vmul.f32 -1.442695, %v3642_v55  ;;  %v3343_v56 = vmul.f32 %v6072_v36, %v5835_v26  ;;  %v3443_v30 = vmul.f32 %v6077_v59, %v5853_v38  ;;  %7652 = vst [vmem:[#allocation33_spill] sm:$0xff] %v6095_v62 }
 0x213   : >> { %v3965_v13 = vmul.f32 %v4989_v15, %v3933_v31  ;;  %v3036_v18 = vadd.f32 %v3004_v41, %v2868_v16  ;;  %v2262_v22 = vmul.f32 %v5880_v9, %v5775_v0  ;;  %v2330_v53 = vmul.f32 %v5880_v9, %v5778_v1 }
 0x214   : >> { %v3136_v46 = vadd.f32 %v3104_v4, %v2968_v49  ;;  %4994 = vpow2.f32 %v4620_v57  ;;  %v2430_v58 = vmul.f32 %v5892_v17, %v5781_v2  ;;  %v2498_v60 = vmul.f32 %v5892_v17, %v5784_v3  ;;  %v3934_v17 = vld [vmem:[%s6043_s26 + $0x8] sm:$0xff] }
 0x215   : >> { %v3997_v19 = vadd.f32 %v3965_v13, %v6004_v61  ;;  %v3204_v11 = vadd.f32 %v3172_v52, %v3036_v18  ;;  %v3611_v41 = vmul.f32 %v6095_v62, %v5868_v48  ;;  %v2598_v9 = vmul.f32 %v5905_v34, %v5789_v5 }
 0x216   : >> { %v4991_v31 = vpop.eup %4990  ;;  %v3307_v61 = vadd.f32 %v3275_v39, %v3136_v46  ;;  %v2666_v40 = vmul.f32 %v5905_v34, %v5793_v6  ;;  %v2462_v15 = vadd.f32 %v2430_v58, %v2262_v22  ;;  %v2530_v55 = vadd.f32 %v2498_v60, %v2330_v53 }
 0x217   : >> { %4030 = vst.msk [vmem:[%s6083_s30] sm:$0xff] %vm737_vm0, %v3997_v19  ;;  %v3837_v4 = vadd.f32 1.0, %v4991_v31  ;;  %v2769_v16 = vmul.f32 %v5908_v35, %v5796_v7  ;;  %v3375_v52 = vadd.f32 %v3343_v56, %v3204_v11  ;;  %v3511_v49 = vmul.f32 %v6077_v59, %v5873_v50 }
 0x218   : >> { %v3475_v13 = vadd.f32 %v3443_v30, %v3307_v61  ;;  %v2837_v39 = vmul.f32 %v5908_v35, %v5799_v8  ;;  %v2630_v57 = vadd.f32 %v2598_v9, %v2462_v15  ;;  %v2698_v18 = vadd.f32 %v2666_v40, %v2530_v55 }
 0x219   : >> { %4996 = vrcp.f32 %v3837_v4  ;;  %v2937_v34 = vmul.f32 %v5916_v43, %v5815_v20  ;;  %v3542_v46 = vadd.f32 %v3510_v42, %v3374_v51  ;;  %v3678_v22 = vmul.f32 %v6046_v45, %v5902_v33 }
 0x21a   : >> { %v4993_v19 = vpop.eup %4992  ;;  %v3643_v56 = vadd.f32 %v3611_v41, %v3475_v13  ;;  %v3005_v30 = vmul.f32 %v5916_v43, %v5818_v21  ;;  %v2801_v11 = vadd.f32 %v2769_v16, %v2630_v57  ;;  %v2869_v58 = vadd.f32 %v2837_v39, %v2698_v18  ;;  %v6129_v41 = vld [vmem:[%s5770_s21 + $0x9f] sm:$0xff] }
 0x21b   : >> { %v3966_v53 = vmul.f32 %v4993_v19, %v3934_v17  ;;  %v3105_v60 = vmul.f32 %v5938_v27, %v5825_v23  ;;  %v3543_v31 = vadd.f32 %v3511_v49, %v3375_v52  ;;  %v3679_v61 = vmul.f32 %v6095_v62, %v5902_v33  ;;  %7653 = vst [vmem:[#allocation34_spill] sm:$0xff] %v6129_v41  ;;  %v6137_v16 = vld [vmem:[%s5770_s21 + $0xa0] sm:$0xff] }
 0x21c   : >> { %v4621_v42 = vmul.f32 -1.442695, %v3643_v56  ;;  %v3173_v51 = vmul.f32 %v5938_v27, %v5829_v24  ;;  %v2969_v40 = vadd.f32 %v2937_v34, %v2801_v11  ;;  %v3276_v4 = vmul.f32 %v6129_v41, %v5832_v25  ;;  %v6148_v39 = vld [vmem:[%s5770_s21 + $0xa1] sm:$0xff] }
 0x21d   : >> { %v3998_v9 = vadd.f32 %v3966_v53, %v6059_v63  ;;  %v3344_v15 = vmul.f32 %v6129_v41, %v5835_v26  ;;  %v3037_v55 = vadd.f32 %v3005_v30, %v2869_v58  ;;  %v2263_v17 = vmul.f32 %v5932_v14, %v5775_v0  ;;  %v3935_v30 = vld [vmem:[%s6043_s26 + $0x10] sm:$0xff] }
 0x21e   : >> { %4998 = vpow2.f32 %v4621_v42  ;;  %v2331_v52 = vmul.f32 %v5932_v14, %v5778_v1  ;;  %v4995_v13 = vpop.eup %4994  ;;  %v3137_v63 = vadd.f32 %v3105_v60, %v2969_v40  ;;  %v3444_v49 = vmul.f32 %v6137_v16, %v5853_v38  ;;  %v7654_v60 = vld [vmem:[#allocation25_spill] sm:$0xff]  ;;  %v7655_v40 = vld [vmem:[#allocation26_spill] sm:$0xff] }
 0x21f   : >> { %4031 = vst.msk [vmem:[%s6083_s30 + $0x8] sm:$0xff] %vm737_vm0, %v3998_v9  ;;  %v2431_v57 = vmul.f32 %v5947_v44, %v5781_v2  ;;  %v2499_v18 = vmul.f32 %v5947_v44, %v5784_v3  ;;  %v3838_v34 = vadd.f32 1.0, %v4995_v13  ;;  %v3612_v19 = vmul.f32 %v6148_v39, %v5868_v48 }
 0x220   : >> { %v2599_v14 = vmul.f32 %v5954_v32, %v5789_v5  ;;  %v2667_v56 = vmul.f32 %v5954_v32, %v5793_v6  ;;  %v3308_v53 = vadd.f32 %v3276_v4, %v3137_v63  ;;  %v2770_v42 = vmul.f32 %v7654_v60, %v5796_v7 }
 0x221   : >> { %v2463_v11 = vadd.f32 %v2431_v57, %v2263_v17  ;;  %v2531_v58 = vadd.f32 %v2499_v18, %v2331_v52  ;;  %5000 = vrcp.f32 %v3838_v34  ;;  %v3205_v9 = vadd.f32 %v3173_v51, %v3037_v55  ;;  %v6176_v34 = vld [vmem:[%s5770_s21 + $0xa7] sm:$0xff] }
 0x222   : >> { %v2838_v44 = vmul.f32 %v7654_v60, %v5799_v8  ;;  %v2938_v13 = vmul.f32 %v7655_v40, %v5815_v20  ;;  %v3476_v27 = vadd.f32 %v3444_v49, %v3308_v53  ;;  %v3006_v4 = vmul.f32 %v7655_v40, %v5818_v21  ;;  %v7657_v53 = vld [vmem:[#allocation27_spill] sm:$0xff] }
 0x223   : >> { %v4997_v41 = vpop.eup %4996  ;;  %v2631_v43 = vadd.f32 %v2599_v14, %v2463_v11  ;;  %v2699_v32 = vadd.f32 %v2667_v56, %v2531_v58  ;;  %v3710_v52 = vadd.f32 %v3678_v22, %v3542_v46  ;;  %v6169_v63 = vadd.f32 %v3679_v61, %v3543_v31 }
 0x224   : >> { %v3967_v17 = vmul.f32 %v4997_v41, %v3935_v30  ;;  %v3106_v51 = vmul.f32 %v5991_v29, %v5825_v23  ;;  %v3644_v55 = vadd.f32 %v3612_v19, %v3476_v27  ;;  %v3174_v49 = vmul.f32 %v5991_v29, %v5829_v24  ;;  %v6186_v41 = vld [vmem:[%s5770_s21 + $0xa8] sm:$0xff] }
 0x225   : >> { %v2802_v57 = vadd.f32 %v2770_v42, %v2631_v43  ;;  %v2870_v18 = vadd.f32 %v2838_v44, %v2699_v32  ;;  %v3376_v56 = vadd.f32 %v3344_v15, %v3205_v9  ;;  %v3512_v46 = vmul.f32 %v6137_v16, %v5873_v50  ;;  %7656 = vst [vmem:[#allocation25_spill] sm:$0xff] %v6186_v41  ;;  %v3936_v44 = vld [vmem:[%s6043_s26 + $0x18] sm:$0xff] }
 0x226   : >> { %v3999_v14 = vadd.f32 %v3967_v17, %v6063_v28  ;;  %v3277_v22 = vmul.f32 %v6176_v34, %v5832_v25  ;;  %v4622_v31 = vmul.f32 -1.442695, %v3644_v55  ;;  %v3345_v61 = vmul.f32 %v6176_v34, %v5835_v26  ;;  %v7659_v17 = vld [vmem:[#allocation28_spill] sm:$0xff] }
 0x227   : >> { %v2970_v27 = vadd.f32 %v2938_v13, %v2802_v57  ;;  %v3038_v43 = vadd.f32 %v3006_v4, %v2870_v18  ;;  %v3445_v28 = vmul.f32 %v6186_v41, %v5853_v38  ;;  %v2264_v15 = vmul.f32 %v5985_v54, %v5775_v0  ;;  %v6200_v13 = vld [vmem:[%s5770_s21 + $0xa9] sm:$0xff] }
 0x228   : >> { %v4999_v19 = vpop.eup %4998  ;;  %4032 = vst.msk [vmem:[%s6083_s30 + $0x10] sm:$0xff] %vm737_vm0, %v3999_v14  ;;  %v2332_v30 = vmul.f32 %v5985_v54, %v5778_v1  ;;  %v2432_v11 = vmul.f32 %v7657_v53, %v5781_v2  ;;  %5002 = vpow2.f32 %v4622_v31  ;;  %7658 = vst [vmem:[#allocation26_spill] sm:$0xff] %v6200_v13  ;;  %v2500_v4 = vmul.f32 %v7657_v53, %v5784_v3 }
 0x229   : >> { %v3839_v58 = vadd.f32 1.0, %v4999_v19  ;;  %v3138_v42 = vadd.f32 %v3106_v51, %v2970_v27  ;;  %v3206_v9 = vadd.f32 %v3174_v49, %v3038_v43  ;;  %v2600_v55 = vmul.f32 %v7659_v17, %v5789_v5  ;;  %v7660_v51 = vld [vmem:[#allocation29_spill] sm:$0xff] }
 0x22a   : >> { %v2464_v32 = vadd.f32 %v2432_v11, %v2264_v15  ;;  %v2668_v54 = vmul.f32 %v7659_v17, %v5793_v6  ;;  %v3613_v18 = vmul.f32 %v6200_v13, %v5868_v48  ;;  %v2771_v49 = vmul.f32 %v7660_v51, %v5796_v7 }
 0x22b   : >> { %5004 = vrcp.f32 %v3839_v58  ;;  %v3309_v57 = vadd.f32 %v3277_v22, %v3138_v42  ;;  %v5001_v14 = vpop.eup %5000  ;;  %v2532_v31 = vadd.f32 %v2500_v4, %v2332_v30  ;;  %v2839_v43 = vmul.f32 %v7660_v51, %v5799_v8 }
 0x22c   : >> { %v2632_v27 = vadd.f32 %v2600_v55, %v2464_v32  ;;  %v2939_v19 = vmul.f32 %v6026_v12, %v5815_v20  ;;  %v3968_v15 = vmul.f32 %v5001_v14, %v3936_v44  ;;  %v3377_v53 = vadd.f32 %v3345_v61, %v3206_v9  ;;  %v6225_v9 = vld [vmem:[%s5770_s21 + $0xaf] sm:$0xff] }
 0x22d   : >> { %v3477_v22 = vadd.f32 %v3445_v28, %v3309_v57  ;;  %v3513_v11 = vmul.f32 %v6186_v41, %v5873_v50  ;;  %v2700_v58 = vadd.f32 %v2668_v54, %v2532_v31  ;;  %v3007_v30 = vmul.f32 %v6026_v12, %v5818_v21 }
 0x22e   : >> { %v2803_v42 = vadd.f32 %v2771_v49, %v2632_v27  ;;  %v3107_v32 = vmul.f32 %v6046_v45, %v5825_v23  ;;  %v4000_v4 = vadd.f32 %v3968_v15, %v3710_v52  ;;  %v3544_v17 = vadd.f32 %v3512_v46, %v3376_v56  ;;  %v6232_v49 = vld [vmem:[%s5770_s21 + $0xb0] sm:$0xff]  ;;  %v3937_v15 = vld [vmem:[%s6043_s26 + $0x20] sm:$0xff] }
 0x22f   : >> { %v3680_v44 = vmul.f32 %v6148_v39, %v5902_v33  ;;  %v3645_v61 = vadd.f32 %v3613_v18, %v3477_v22  ;;  %v3681_v28 = vmul.f32 %v6200_v13, %v5902_v33  ;;  %v2871_v55 = vadd.f32 %v2839_v43, %v2700_v58  ;;  %7661 = vst [vmem:[#allocation27_spill] sm:$0xff] %v6232_v49  ;;  %v6246_v22 = vld [vmem:[%s5770_s21 + $0xb1] sm:$0xff] }
 0x230   : >> { %v2971_v54 = vadd.f32 %v2939_v19, %v2803_v42  ;;  %v3278_v57 = vmul.f32 %v6225_v9, %v5832_v25  ;;  %4033 = vst.msk [vmem:[%s6083_s30 + $0x18] sm:$0xff] %vm737_vm0, %v4000_v4  ;;  %v3545_v52 = vadd.f32 %v3513_v11, %v3377_v53  ;;  %v3175_v46 = vmul.f32 %v6046_v45, %v5829_v24 }
 0x231   : >> { %v4623_v56 = vmul.f32 -1.442695, %v3645_v61  ;;  %v3446_v18 = vmul.f32 %v6232_v49, %v5853_v38  ;;  %v3039_v14 = vadd.f32 %v3007_v30, %v2871_v55  ;;  %v2265_v27 = vmul.f32 %v5850_v37, %v5775_v0  ;;  %7662 = vst [vmem:[#allocation28_spill] sm:$0xff] %v6246_v22 }
 0x232   : >> { %v3139_v31 = vadd.f32 %v3107_v32, %v2971_v54  ;;  %v2333_v43 = vmul.f32 %v5850_v37, %v5778_v1  ;;  %v5003_v19 = vpop.eup %5002  ;;  %v2433_v53 = vmul.f32 %v5864_v47, %v5781_v2  ;;  %v2501_v11 = vmul.f32 %v5864_v47, %v5784_v3 }
 0x233   : >> { %5006 = vpow2.f32 %v4623_v56  ;;  %v2601_v58 = vmul.f32 %v5883_v10, %v5789_v5  ;;  %v3840_v42 = vadd.f32 1.0, %v5003_v19  ;;  %v3614_v32 = vmul.f32 %v6246_v22, %v5868_v48 }
 0x234   : >> { %v3310_v30 = vadd.f32 %v3278_v57, %v3139_v31  ;;  %v2669_v37 = vmul.f32 %v5883_v10, %v5793_v6  ;;  %v2465_v61 = vadd.f32 %v2433_v53, %v2265_v27  ;;  %v2533_v55 = vadd.f32 %v2501_v11, %v2333_v43 }
 0x235   : >> { %v5005_v4 = vpop.eup %5004  ;;  %v2772_v54 = vmul.f32 %v6072_v36, %v5796_v7  ;;  %v2840_v47 = vmul.f32 %v6072_v36, %v5799_v8  ;;  %5008 = vrcp.f32 %v3840_v42  ;;  %v3346_v57 = vmul.f32 %v6225_v9, %v5835_v26 }
 0x236   : >> { %v3969_v56 = vmul.f32 %v5005_v4, %v3937_v15  ;;  %v3478_v31 = vadd.f32 %v3446_v18, %v3310_v30  ;;  %v3207_v19 = vadd.f32 %v3175_v46, %v3039_v14  ;;  %v2633_v45 = vadd.f32 %v2601_v58, %v2465_v61  ;;  %v6278_v58 = vld [vmem:[%s5770_s21 + $0xc7] sm:$0xff] }
 0x237   : >> { %v2701_v10 = vadd.f32 %v2669_v37, %v2533_v55  ;;  %v2940_v27 = vmul.f32 %v6077_v59, %v5815_v20  ;;  %v3008_v11 = vmul.f32 %v6077_v59, %v5818_v21  ;;  %v3108_v4 = vmul.f32 %v6095_v62, %v5825_v23 }
 0x238   : >> { %v4001_v43 = vadd.f32 %v3969_v56, %v6169_v63  ;;  %v3646_v53 = vadd.f32 %v3614_v32, %v3478_v31  ;;  %v2804_v15 = vadd.f32 %v2772_v54, %v2633_v45  ;;  %v3712_v46 = vadd.f32 %v3680_v44, %v3544_v17  ;;  %v6285_v44 = vld [vmem:[%s5770_s21 + $0xc8] sm:$0xff]  ;;  %v7663_v56 = vld [vmem:[#allocation23_spill] sm:$0xff] }
 0x239   : >> { %v2872_v42 = vadd.f32 %v2840_v47, %v2701_v10  ;;  %v6273_v18 = vadd.f32 %v3681_v28, %v3545_v52  ;;  %v3514_v14 = vmul.f32 %v6232_v49, %v5873_v50  ;;  %v3378_v30 = vadd.f32 %v3346_v57, %v3207_v19  ;;  %v6294_v47 = vld [vmem:[%s5770_s21 + $0xc9] sm:$0xff] }
 0x23a   : >> { %4034 = vst.msk [vmem:[%s6083_s30 + $0x20] sm:$0xff] %vm737_vm0, %v4001_v43  ;;  %v4624_v63 = vmul.f32 -1.442695, %v3646_v53  ;;  %v2972_v32 = vadd.f32 %v2940_v27, %v2804_v15  ;;  %v3176_v45 = vmul.f32 %v6095_v62, %v5829_v24  ;;  %v3279_v37 = vmul.f32 %v6278_v58, %v5832_v25  ;;  %v3938_v19 = vld [vmem:[%s6043_s26 + $0x28] sm:$0xff] }
 0x23b   : >> { %v3040_v17 = vadd.f32 %v3008_v11, %v2872_v42  ;;  %v2266_v28 = vmul.f32 %v5908_v35, %v5775_v0  ;;  %v2334_v52 = vmul.f32 %v5908_v35, %v5778_v1  ;;  %v3447_v54 = vmul.f32 %v6285_v44, %v5853_v38  ;;  %v7664_v35 = vld [vmem:[#allocation24_spill] sm:$0xff] }
 0x23c   : >> { %5010 = vpow2.f32 %v4624_v63  ;;  %v3140_v55 = vadd.f32 %v3108_v4, %v2972_v32  ;;  %v2434_v57 = vmul.f32 %v7663_v56, %v5781_v2  ;;  %v2502_v31 = vmul.f32 %v7663_v56, %v5784_v3  ;;  %v7665_v4 = vld [vmem:[#allocation34_spill] sm:$0xff] }
 0x23d   : >> { %v5007_v61 = vpop.eup %5006  ;;  %v3615_v27 = vmul.f32 %v6294_v47, %v5868_v48  ;;  %v2602_v43 = vmul.f32 %v7664_v35, %v5789_v5  ;;  %v2670_v53 = vmul.f32 %v7664_v35, %v5793_v6  ;;  %v2773_v63 = vmul.f32 %v7665_v4, %v5796_v7 }
 0x23e   : >> { %v3841_v10 = vadd.f32 1.0, %v5007_v61  ;;  %v3311_v11 = vadd.f32 %v3279_v37, %v3140_v55  ;;  %v2466_v15 = vadd.f32 %v2434_v57, %v2266_v28  ;;  %v2534_v42 = vadd.f32 %v2502_v31, %v2334_v52 }
 0x23f   : >> { %v5009_v32 = vpop.eup %5008  ;;  %v3208_v56 = vadd.f32 %v3176_v45, %v3040_v17  ;;  %v3347_v61 = vmul.f32 %v6278_v58, %v5835_v26  ;;  %v2841_v62 = vmul.f32 %v7665_v4, %v5799_v8  ;;  %v2941_v37 = vmul.f32 %v6137_v16, %v5815_v20 }
 0x240   : >> { %5012 = vrcp.f32 %v3841_v10  ;;  %v3970_v59 = vmul.f32 %v5009_v32, %v3938_v19  ;;  %v3479_v36 = vadd.f32 %v3447_v54, %v3311_v11  ;;  %v2634_v35 = vadd.f32 %v2602_v43, %v2466_v15 }
 0x241   : >> { %v3546_v28 = vadd.f32 %v3514_v14, %v3378_v30  ;;  %v3682_v52 = vmul.f32 %v6246_v22, %v5902_v33  ;;  %v2702_v45 = vadd.f32 %v2670_v53, %v2534_v42  ;;  %v3009_v17 = vmul.f32 %v6137_v16, %v5818_v21  ;;  %v6326_v30 = vld [vmem:[%s5770_s21 + $0xcf] sm:$0xff] }
 0x242   : >> { %v4002_v55 = vadd.f32 %v3970_v59, %v3712_v46  ;;  %v3647_v57 = vadd.f32 %v3615_v27, %v3479_v36  ;;  %v2805_v31 = vadd.f32 %v2773_v63, %v2634_v35  ;;  %v3109_v54 = vmul.f32 %v6148_v39, %v5825_v23  ;;  %7666 = vst [vmem:[#allocation29_spill] sm:$0xff] %v6326_v30  ;;  %v6329_v53 = vld [vmem:[%s5770_s21 + $0xd0] sm:$0xff] }
 0x243   : >> { %v3379_v19 = vadd.f32 %v3347_v61, %v3208_v56  ;;  %v3515_v10 = vmul.f32 %v6285_v44, %v5873_v50  ;;  %v2873_v43 = vadd.f32 %v2841_v62, %v2702_v45  ;;  %v3177_v14 = vmul.f32 %v6148_v39, %v5829_v24  ;;  %7667 = vst [vmem:[#allocation23_spill] sm:$0xff] %v6329_v53  ;;  %v6344_v61 = vld [vmem:[%s5770_s21 + $0xd1] sm:$0xff] }
 0x244   : >> { %4035 = vst.msk [vmem:[%s6083_s30 + $0x28] sm:$0xff] %vm737_vm0, %v4002_v55  ;;  %v4625_v36 = vmul.f32 -1.442695, %v3647_v57  ;;  %v2973_v59 = vadd.f32 %v2941_v37, %v2805_v31  ;;  %v3280_v46 = vmul.f32 %v6326_v30, %v5832_v25  ;;  %v3448_v27 = vmul.f32 %v6329_v53, %v5853_v38  ;;  %7668 = vst [vmem:[#allocation24_spill] sm:$0xff] %v6344_v61  ;;  %v3939_v37 = vld [vmem:[%s6043_s26 + $0x30] sm:$0xff] }
 0x245   : >> { %v3041_v11 = vadd.f32 %v3009_v17, %v2873_v43  ;;  %v2267_v15 = vmul.f32 %v7654_v60, %v5775_v0  ;;  %v2335_v42 = vmul.f32 %v7654_v60, %v5778_v1  ;;  %v2435_v63 = vmul.f32 %v7655_v40, %v5781_v2 }
 0x246   : >> { %v5011_v62 = vpop.eup %5010  ;;  %5014 = vpow2.f32 %v4625_v36  ;;  %v3141_v56 = vadd.f32 %v3109_v54, %v2973_v59  ;;  %v2503_v35 = vmul.f32 %v7655_v40, %v5784_v3  ;;  %v3616_v45 = vmul.f32 %v6344_v61, %v5868_v48 }
 0x247   : >> { %v3842_v32 = vadd.f32 1.0, %v5011_v62  ;;  %v2467_v17 = vadd.f32 %v2435_v63, %v2267_v15  ;;  %v2603_v55 = vmul.f32 %v5991_v29, %v5789_v5  ;;  %v2671_v60 = vmul.f32 %v5991_v29, %v5793_v6 }
 0x248   : >> { %v3312_v57 = vadd.f32 %v3280_v46, %v3141_v56  ;;  %v2535_v31 = vadd.f32 %v2503_v35, %v2335_v42  ;;  %v2774_v54 = vmul.f32 %v6176_v34, %v5796_v7  ;;  %v3348_v40 = vmul.f32 %v6326_v30, %v5835_v26 }
 0x249   : >> { %5016 = vrcp.f32 %v3842_v32  ;;  %v2635_v36 = vadd.f32 %v2603_v55, %v2467_v17  ;;  %v2842_v59 = vmul.f32 %v6176_v34, %v5799_v8  ;;  %v2942_v62 = vmul.f32 %v6186_v41, %v5815_v20 }
 0x24a   : >> { %v5013_v43 = vpop.eup %5012  ;;  %v3209_v29 = vadd.f32 %v3177_v14, %v3041_v11  ;;  %v3480_v46 = vadd.f32 %v3448_v27, %v3312_v57  ;;  %v2703_v42 = vadd.f32 %v2671_v60, %v2535_v31  ;;  %v3714_v63 = vadd.f32 %v3682_v52, %v3546_v28  ;;  %v6371_v11 = vld [vmem:[%s5770_s21 + $0xd7] sm:$0xff] }
 0x24b   : >> { %v3971_v15 = vmul.f32 %v5013_v43, %v3939_v37  ;;  %v2806_v32 = vadd.f32 %v2774_v54, %v2635_v36  ;;  %v3010_v56 = vmul.f32 %v6186_v41, %v5818_v21  ;;  %v3110_v35 = vmul.f32 %v6200_v13, %v5825_v23  ;;  %7669 = vst [vmem:[#allocation34_spill] sm:$0xff] %v6371_v11  ;;  %v6378_v57 = vld [vmem:[%s5770_s21 + $0xd8] sm:$0xff] }
 0x24c   : >> { %v3683_v55 = vmul.f32 %v6294_v47, %v5902_v33  ;;  %v3648_v37 = vadd.f32 %v3616_v45, %v3480_v46  ;;  %v2874_v14 = vadd.f32 %v2842_v59, %v2703_v42  ;;  %v3547_v27 = vadd.f32 %v3515_v10, %v3379_v19  ;;  %7670 = vst [vmem:[#allocation35_spill] sm:$0xff] %v6378_v57  ;;  %v6387_v43 = vld [vmem:[%s5770_s21 + $0xd9] sm:$0xff] }
 0x24d   : >> { %v4003_v17 = vadd.f32 %v3971_v15, %v6273_v18  ;;  %v3516_v28 = vmul.f32 %v6329_v53, %v5873_v50  ;;  %v2974_v52 = vadd.f32 %v2942_v62, %v2806_v32  ;;  %v3281_v60 = vmul.f32 %v6371_v11, %v5832_v25  ;;  %v3940_v15 = vld [vmem:[%s6043_s26 + $0x38] sm:$0xff] }
 0x24e   : >> { %v3380_v18 = vadd.f32 %v3348_v40, %v3209_v29  ;;  %v4626_v31 = vmul.f32 -1.442695, %v3648_v37  ;;  %v3178_v45 = vmul.f32 %v6200_v13, %v5829_v24  ;;  %v3449_v19 = vmul.f32 %v6378_v57, %v5853_v38 }
 0x24f   : >> { %4036 = vst.msk [vmem:[%s6083_s30 + $0x30] sm:$0xff] %vm737_vm0, %v4003_v17  ;;  %v3042_v10 = vadd.f32 %v3010_v56, %v2874_v14  ;;  %v3142_v54 = vadd.f32 %v3110_v35, %v2974_v52  ;;  %v2268_v36 = vmul.f32 %v7660_v51, %v5775_v0  ;;  %v2336_v59 = vmul.f32 %v7660_v51, %v5778_v1  ;;  %v7671_v56 = vld [vmem:[#allocation30_spill] sm:$0xff] }
 0x250   : >> { %v5015_v62 = vpop.eup %5014  ;;  %5018 = vpow2.f32 %v4626_v31  ;;  %v3617_v40 = vmul.f32 %v6387_v43, %v5868_v48  ;;  %v2436_v29 = vmul.f32 %v6026_v12, %v5781_v2  ;;  %v2504_v46 = vmul.f32 %v6026_v12, %v5784_v3 }
 0x251   : >> { %v3843_v42 = vadd.f32 1.0, %v5015_v62  ;;  %v3313_v32 = vadd.f32 %v3281_v60, %v3142_v54  ;;  %v2604_v35 = vmul.f32 %v7671_v56, %v5789_v5  ;;  %v2672_v51 = vmul.f32 %v7671_v56, %v5793_v6 }
 0x252   : >> { %v3349_v37 = vmul.f32 %v6371_v11, %v5835_v26  ;;  %v2468_v14 = vadd.f32 %v2436_v29, %v2268_v36  ;;  %v2536_v52 = vadd.f32 %v2504_v46, %v2336_v59  ;;  %v2775_v31 = vmul.f32 %v6225_v9, %v5796_v7 }
 0x253   : >> { %v5017_v17 = vpop.eup %5016  ;;  %5020 = vrcp.f32 %v3843_v42  ;;  %v3481_v12 = vadd.f32 %v3449_v19, %v3313_v32  ;;  %v2843_v60 = vmul.f32 %v6225_v9, %v5799_v8  ;;  %v3210_v54 = vadd.f32 %v3178_v45, %v3042_v10  ;;  %v7672_v32 = vld [vmem:[#allocation31_spill] sm:$0xff] }
 0x254   : >> { %v3972_v13 = vmul.f32 %v5017_v17, %v3940_v15  ;;  %v2636_v62 = vadd.f32 %v2604_v35, %v2468_v14  ;;  %v2704_v56 = vadd.f32 %v2672_v51, %v2536_v52  ;;  %v2943_v41 = vmul.f32 %v6232_v49, %v5815_v20  ;;  %v7673_v52 = vld [vmem:[#allocation32_spill] sm:$0xff] }
 0x255   : >> { %v3649_v36 = vadd.f32 %v3617_v40, %v3481_v12  ;;  %v3011_v59 = vmul.f32 %v6232_v49, %v5818_v21  ;;  %v3715_v29 = vadd.f32 %v3683_v55, %v3547_v27  ;;  %v3111_v19 = vmul.f32 %v6246_v22, %v5825_v23  ;;  %v6423_v40 = vld [vmem:[%s5770_s21 + $0xdf] sm:$0xff] }
 0x256   : >> { %v4004_v11 = vadd.f32 %v3972_v13, %v3714_v63  ;;  %v2807_v15 = vadd.f32 %v2775_v31, %v2636_v62  ;;  %v2875_v46 = vadd.f32 %v2843_v60, %v2704_v56  ;;  %v3548_v45 = vadd.f32 %v3516_v28, %v3380_v18  ;;  %v6430_v18 = vld [vmem:[%s5770_s21 + $0xe0] sm:$0xff] }
 0x257   : >> { %v3684_v10 = vmul.f32 %v6344_v61, %v5902_v33  ;;  %v3517_v13 = vmul.f32 %v6378_v57, %v5873_v50  ;;  %v4627_v63 = vmul.f32 -1.442695, %v3649_v36  ;;  %v3381_v55 = vadd.f32 %v3349_v37, %v3210_v54  ;;  %v6439_v37 = vld [vmem:[%s5770_s21 + $0xe1] sm:$0xff] }
 0x258   : >> { %4037 = vst.msk [vmem:[%s6083_s30 + $0x38] sm:$0xff] %vm737_vm0, %v4004_v11  ;;  %v2975_v27 = vadd.f32 %v2943_v41, %v2807_v15  ;;  %v3179_v42 = vmul.f32 %v6246_v22, %v5829_v24  ;;  %v3282_v11 = vmul.f32 %v6423_v40, %v5832_v25  ;;  %v3043_v28 = vadd.f32 %v3011_v59, %v2875_v46  ;;  %v3941_v60 = vld [vmem:[%s6043_s26 + $0x40] sm:$0xff] }
 0x259   : >> { %5022 = vpow2.f32 %v4627_v63  ;;  %v2269_v35 = vmul.f32 %v7672_v32, %v5775_v0  ;;  %v2337_v51 = vmul.f32 %v7672_v32, %v5778_v1  ;;  %v3450_v41 = vmul.f32 %v6430_v18, %v5853_v38  ;;  %v7674_v56 = vld [vmem:[#allocation33_spill] sm:$0xff] }
 0x25a   : >> { %v5019_v17 = vpop.eup %5018  ;;  %v3143_v14 = vadd.f32 %v3111_v19, %v2975_v27  ;;  %v2437_v31 = vmul.f32 %v7673_v52, %v5781_v2  ;;  %v2505_v12 = vmul.f32 %v7673_v52, %v5784_v3  ;;  %v3618_v62 = vmul.f32 %v6439_v37, %v5868_v48 }
 0x25b   : >> { %v3844_v54 = vadd.f32 1.0, %v5019_v17  ;;  %v2605_v36 = vmul.f32 %v7674_v56, %v5789_v5  ;;  %v2673_v59 = vmul.f32 %v7674_v56, %v5793_v6  ;;  %v2776_v63 = vmul.f32 %v6278_v58, %v5796_v7 }
 0x25c   : >> { %v3314_v15 = vadd.f32 %v3282_v11, %v3143_v14  ;;  %v2469_v46 = vadd.f32 %v2437_v31, %v2269_v35  ;;  %v2537_v19 = vadd.f32 %v2505_v12, %v2337_v51  ;;  %v3211_v32 = vadd.f32 %v3179_v42, %v3043_v28 }
 0x25d   : >> { %v5021_v27 = vpop.eup %5020  ;;  %5024 = vrcp.f32 %v3844_v54  ;;  %v3350_v17 = vmul.f32 %v6423_v40, %v5835_v26  ;;  %v2844_v52 = vmul.f32 %v6278_v58, %v5799_v8  ;;  %v2944_v11 = vmul.f32 %v6285_v44, %v5815_v20 }
 0x25e   : >> { %v3973_v22 = vmul.f32 %v5021_v27, %v3941_v60  ;;  %v3482_v49 = vadd.f32 %v3450_v41, %v3314_v15  ;;  %v2637_v56 = vadd.f32 %v2605_v36, %v2469_v46  ;;  %v3716_v35 = vadd.f32 %v3684_v10, %v3548_v45  ;;  %v6469_v45 = vld [vmem:[%s5770_s21 + $0xf7] sm:$0xff] }
 0x25f   : >> { %v3685_v51 = vmul.f32 %v6387_v43, %v5902_v33  ;;  %v2705_v42 = vadd.f32 %v2673_v59, %v2537_v19  ;;  %v3112_v12 = vmul.f32 %v6294_v47, %v5825_v23  ;;  %v3549_v54 = vadd.f32 %v3517_v13, %v3381_v55  ;;  %7675 = vst [vmem:[#allocation30_spill] sm:$0xff] %v6469_v45  ;;  %v6476_v13 = vld [vmem:[%s5770_s21 + $0xf8] sm:$0xff] }
 0x260   : >> { %v4005_v28 = vadd.f32 %v3973_v22, %v3715_v29  ;;  %v3650_v14 = vadd.f32 %v3618_v62, %v3482_v49  ;;  %v2808_v31 = vadd.f32 %v2776_v63, %v2637_v56  ;;  %v3382_v60 = vadd.f32 %v3350_v17, %v3211_v32  ;;  %7676 = vst [vmem:[#allocation31_spill] sm:$0xff] %v6476_v13  ;;  %v6487_v27 = vld [vmem:[%s5770_s21 + $0xf9] sm:$0xff]  ;;  %v3942_v17 = vld [vmem:[%s6043_s26 + $0x48] sm:$0xff] }
 0x261   : >> { %v3518_v41 = vmul.f32 %v6430_v18, %v5873_v50  ;;  %v3012_v36 = vmul.f32 %v6285_v44, %v5818_v21  ;;  %v2876_v49 = vadd.f32 %v2844_v52, %v2705_v42  ;;  %v3283_v10 = vmul.f32 %v6469_v45, %v5832_v25  ;;  %7677 = vst [vmem:[#allocation32_spill] sm:$0xff] %v6487_v27 }
 0x262   : >> { %4038 = vst.msk [vmem:[%s6083_s30 + $0x40] sm:$0xff] %vm737_vm0, %v4005_v28  ;;  %v4628_v22 = vmul.f32 -1.442695, %v3650_v14  ;;  %v2976_v29 = vadd.f32 %v2944_v11, %v2808_v31  ;;  %v3451_v62 = vmul.f32 %v6476_v13, %v5853_v38  ;;  %v2270_v59 = vmul.f32 %v7665_v4, %v5775_v0 }
 0x263   : >> { %v5023_v55 = vpop.eup %5022  ;;  %v2338_v15 = vmul.f32 %v7665_v4, %v5778_v1  ;;  %v2438_v46 = vmul.f32 %v6137_v16, %v5781_v2  ;;  %v2506_v32 = vmul.f32 %v6137_v16, %v5784_v3  ;;  %v3619_v52 = vmul.f32 %v6487_v27, %v5868_v48 }
 0x264   : >> { %v3845_v19 = vadd.f32 1.0, %v5023_v55  ;;  %5026 = vpow2.f32 %v4628_v22  ;;  %v3144_v63 = vadd.f32 %v3112_v12, %v2976_v29  ;;  %v2606_v11 = vmul.f32 %v6148_v39, %v5789_v5 }
 0x265   : >> { %v2470_v56 = vadd.f32 %v2438_v46, %v2270_v59  ;;  %v2674_v4 = vmul.f32 %v6148_v39, %v5793_v6  ;;  %v2538_v28 = vadd.f32 %v2506_v32, %v2338_v15  ;;  %v2777_v14 = vmul.f32 %v6326_v30, %v5796_v7 }
 0x266   : >> { %5028 = vrcp.f32 %v3845_v19  ;;  %v3315_v42 = vadd.f32 %v3283_v10, %v3144_v63  ;;  %v3180_v16 = vmul.f32 %v6294_v47, %v5829_v24  ;;  %v2845_v22 = vmul.f32 %v6326_v30, %v5799_v8 }
 0x267   : >> { %v5025_v31 = vpop.eup %5024  ;;  %v2638_v12 = vadd.f32 %v2606_v11, %v2470_v56  ;;  %v2945_v29 = vmul.f32 %v6329_v53, %v5815_v20  ;;  %v3044_v39 = vadd.f32 %v3012_v36, %v2876_v49  ;;  %v2706_v59 = vadd.f32 %v2674_v4, %v2538_v28  ;;  %v6513_v36 = vld [vmem:[%s5770_s21 + $0xff] sm:$0xff] }
 0x268   : >> { %v3974_v55 = vmul.f32 %v5025_v31, %v3942_v17  ;;  %v3483_v10 = vadd.f32 %v3451_v62, %v3315_v42  ;;  %v3717_v15 = vadd.f32 %v3685_v51, %v3549_v54  ;;  %v3013_v19 = vmul.f32 %v6329_v53, %v5818_v21  ;;  %v6520_v4 = vld [vmem:[%s5770_s21 + $0x100] sm:$0xff] }
 0x269   : >> { %v2809_v46 = vadd.f32 %v2777_v14, %v2638_v12  ;;  %v3113_v63 = vmul.f32 %v6344_v61, %v5825_v23  ;;  %v3686_v56 = vmul.f32 %v6439_v37, %v5902_v33  ;;  %v2877_v17 = vadd.f32 %v2845_v22, %v2706_v59  ;;  %v6529_v14 = vld [vmem:[%s5770_s21 + $0x101] sm:$0xff] }
 0x26a   : >> { %v4006_v32 = vadd.f32 %v3974_v55, %v3716_v35  ;;  %v3651_v11 = vadd.f32 %v3619_v52, %v3483_v10  ;;  %v3550_v49 = vadd.f32 %v3518_v41, %v3382_v60  ;;  %v3351_v51 = vmul.f32 %v6469_v45, %v5835_v26  ;;  %v7678_v55 = vld [vmem:[#allocation25_spill] sm:$0xff] }
 0x26b   : >> { %v2977_v54 = vadd.f32 %v2945_v29, %v2809_v46  ;;  %v3284_v62 = vmul.f32 %v6513_v36, %v5832_v25  ;;  %v3212_v35 = vadd.f32 %v3180_v16, %v3044_v39  ;;  %v3181_v52 = vmul.f32 %v6344_v61, %v5829_v24  ;;  %v3943_v29 = vld [vmem:[%s6043_s26 + $0x50] sm:$0xff] }
 0x26c   : >> { %4039 = vst.msk [vmem:[%s6083_s30 + $0x48] sm:$0xff] %vm737_vm0, %v4006_v32  ;;  %v4629_v42 = vmul.f32 -1.442695, %v3651_v11  ;;  %v3452_v60 = vmul.f32 %v6520_v4, %v5853_v38  ;;  %v3045_v41 = vadd.f32 %v3013_v19, %v2877_v17  ;;  %v2271_v31 = vmul.f32 %v6176_v34, %v5775_v0  ;;  %v7679_v19 = vld [vmem:[#allocation26_spill] sm:$0xff] }
 0x26d   : >> { %v3145_v28 = vadd.f32 %v3113_v63, %v2977_v54  ;;  %v2339_v12 = vmul.f32 %v6176_v34, %v5778_v1  ;;  %v3620_v16 = vmul.f32 %v6529_v14, %v5868_v48  ;;  %v2439_v39 = vmul.f32 %v7678_v55, %v5781_v2 }
 0x26e   : >> { %v5027_v22 = vpop.eup %5026  ;;  %5030 = vpow2.f32 %v4629_v42  ;;  %v2507_v10 = vmul.f32 %v7678_v55, %v5784_v3  ;;  %v2607_v63 = vmul.f32 %v7679_v19, %v5789_v5  ;;  %v2675_v34 = vmul.f32 %v7679_v19, %v5793_v6  ;;  %v7680_v42 = vld [vmem:[#allocation34_spill] sm:$0xff] }
 0x26f   : >> { %v3846_v59 = vadd.f32 1.0, %v5027_v22  ;;  %v3316_v46 = vadd.f32 %v3284_v62, %v3145_v28  ;;  %v3519_v11 = vmul.f32 %v6476_v13, %v5873_v50  ;;  %v2471_v17 = vadd.f32 %v2439_v39, %v2271_v31 }
 0x270   : >> { %v5029_v32 = vpop.eup %5028  ;;  %v2539_v54 = vadd.f32 %v2507_v10, %v2339_v12  ;;  %v2778_v61 = vmul.f32 %v7680_v42, %v5796_v7  ;;  %v3383_v22 = vadd.f32 %v3351_v51, %v3212_v35  ;;  %v3213_v28 = vadd.f32 %v3181_v52, %v3045_v41 }
 0x271   : >> { %v3975_v53 = vmul.f32 %v5029_v32, %v3943_v29  ;;  %5032 = vrcp.f32 %v3846_v59  ;;  %v3484_v62 = vadd.f32 %v3452_v60, %v3316_v46  ;;  %v3352_v55 = vmul.f32 %v6513_v36, %v5835_v26  ;;  %v6565_v60 = vld [vmem:[%s5770_s21 + $0x107] sm:$0xff] }
 0x272   : >> { %v2639_v19 = vadd.f32 %v2607_v63, %v2471_v17  ;;  %v2946_v30 = vmul.f32 %v6378_v57, %v5815_v20  ;;  %v2707_v12 = vadd.f32 %v2675_v34, %v2539_v54  ;;  %v2846_v39 = vmul.f32 %v7680_v42, %v5799_v8  ;;  %v6581_v32 = vld [vmem:[%s5770_s21 + $0x109] sm:$0xff] }
 0x273   : >> { %v4007_v13 = vadd.f32 %v3975_v53, %v3717_v15  ;;  %v3652_v31 = vadd.f32 %v3620_v16, %v3484_v62  ;;  %v3718_v29 = vadd.f32 %v3686_v56, %v3550_v49  ;;  %v3114_v51 = vmul.f32 %v6387_v43, %v5825_v23  ;;  %v6572_v16 = vld [vmem:[%s5770_s21 + $0x108] sm:$0xff]  ;;  %7682 = vst [vmem:[#allocation25_spill] sm:$0xff] %v6581_v32 }
 0x274   : >> { %v2810_v10 = vadd.f32 %v2778_v61, %v2639_v19  ;;  %v3551_v35 = vadd.f32 %v3519_v11, %v3383_v22  ;;  %v3687_v52 = vmul.f32 %v6487_v27, %v5902_v33  ;;  %v3520_v53 = vmul.f32 %v6520_v4, %v5873_v50  ;;  %7681 = vst [vmem:[#allocation33_spill] sm:$0xff] %v6572_v16  ;;  %v7683_v11 = vld [vmem:[#allocation27_spill] sm:$0xff]  ;;  %v3944_v22 = vld [vmem:[%s6043_s26 + $0x58] sm:$0xff] }
 0x275   : >> { %4040 = vst.msk [vmem:[%s6083_s30 + $0x50] sm:$0xff] %vm737_vm0, %v4007_v13  ;;  %v4630_v15 = vmul.f32 -1.442695, %v3652_v31  ;;  %v3384_v41 = vadd.f32 %v3352_v55, %v3213_v28  ;;  %v3014_v61 = vmul.f32 %v6378_v57, %v5818_v21  ;;  %v3285_v13 = vmul.f32 %v6565_v60, %v5832_v25 }
 0x276   : >> { %v2978_v56 = vadd.f32 %v2946_v30, %v2810_v10  ;;  %v2878_v49 = vadd.f32 %v2846_v39, %v2707_v12  ;;  %v2272_v59 = vmul.f32 %v6225_v9, %v5775_v0  ;;  %v2340_v46 = vmul.f32 %v6225_v9, %v5778_v1  ;;  %v7684_v9 = vld [vmem:[#allocation28_spill] sm:$0xff] }
 0x277   : >> { %5034 = vpow2.f32 %v4630_v15  ;;  %v3453_v30 = vmul.f32 %v6572_v16, %v5853_v38  ;;  %v2440_v17 = vmul.f32 %v7683_v11, %v5781_v2  ;;  %v2508_v54 = vmul.f32 %v7683_v11, %v5784_v3 }
 0x278   : >> { %v5031_v63 = vpop.eup %5030  ;;  %v3146_v34 = vadd.f32 %v3114_v51, %v2978_v56  ;;  %v3621_v28 = vmul.f32 %v6581_v32, %v5868_v48  ;;  %v2608_v55 = vmul.f32 %v7684_v9, %v5789_v5  ;;  %v2676_v19 = vmul.f32 %v7684_v9, %v5793_v6 }
 0x279   : >> { %v3847_v62 = vadd.f32 1.0, %v5031_v63  ;;  %v2472_v12 = vadd.f32 %v2440_v17, %v2272_v59  ;;  %v2540_v39 = vadd.f32 %v2508_v54, %v2340_v46  ;;  %v2779_v10 = vmul.f32 %v6423_v40, %v5796_v7 }
 0x27a   : >> { %v3317_v31 = vadd.f32 %v3285_v13, %v3146_v34  ;;  %v3046_v15 = vadd.f32 %v3014_v61, %v2878_v49  ;;  %v3182_v56 = vmul.f32 %v6387_v43, %v5829_v24  ;;  %v2847_v63 = vmul.f32 %v6423_v40, %v5799_v8 }
 0x27b   : >> { %v5033_v51 = vpop.eup %5032  ;;  %5036 = vrcp.f32 %v3847_v62  ;;  %v2640_v9 = vadd.f32 %v2608_v55, %v2472_v12  ;;  %v2947_v13 = vmul.f32 %v6430_v18, %v5815_v20  ;;  %v3719_v59 = vadd.f32 %v3687_v52, %v3551_v35  ;;  %v6611_v35 = vld [vmem:[%s5770_s21 + $0x10f] sm:$0xff] }
 0x27c   : >> { %v3976_v11 = vmul.f32 %v5033_v51, %v3944_v22  ;;  %v3485_v57 = vadd.f32 %v3453_v30, %v3317_v31  ;;  %v3688_v46 = vmul.f32 %v6529_v14, %v5902_v33  ;;  %v2708_v61 = vadd.f32 %v2676_v19, %v2540_v39  ;;  %7685 = vst [vmem:[#allocation26_spill] sm:$0xff] %v6611_v35 }
 0x27d   : >> { %v2811_v17 = vadd.f32 %v2779_v10, %v2640_v9  ;;  %v3115_v54 = vmul.f32 %v6439_v37, %v5825_v23  ;;  %v3552_v62 = vadd.f32 %v3520_v53, %v3384_v41  ;;  %v3214_v22 = vadd.f32 %v3182_v56, %v3046_v15  ;;  %v6618_v53 = vld [vmem:[%s5770_s21 + $0x110] sm:$0xff] }
 0x27e   : >> { %v4008_v49 = vadd.f32 %v3976_v11, %v3718_v29  ;;  %v3653_v34 = vadd.f32 %v3621_v28, %v3485_v57  ;;  %v3353_v30 = vmul.f32 %v6565_v60, %v5835_v26  ;;  %v3015_v55 = vmul.f32 %v6430_v18, %v5818_v21  ;;  %7686 = vst [vmem:[#allocation34_spill] sm:$0xff] %v6618_v53  ;;  %v6629_v15 = vld [vmem:[%s5770_s21 + $0x111] sm:$0xff] }
 0x27f   : >> { %v2879_v57 = vadd.f32 %v2847_v63, %v2708_v61  ;;  %v2979_v52 = vadd.f32 %v2947_v13, %v2811_v17  ;;  %v3286_v28 = vmul.f32 %v6611_v35, %v5832_v25  ;;  %v3454_v19 = vmul.f32 %v6618_v53, %v5853_v38  ;;  %v3945_v63 = vld [vmem:[%s6043_s26 + $0x60] sm:$0xff] }
 0x280   : >> { %4041 = vst.msk [vmem:[%s6083_s30 + $0x58] sm:$0xff] %vm737_vm0, %v4008_v49  ;;  %v4631_v29 = vmul.f32 -1.442695, %v3653_v34  ;;  %v2273_v31 = vmul.f32 %v6278_v58, %v5775_v0  ;;  %v2341_v12 = vmul.f32 %v6278_v58, %v5778_v1  ;;  %v2441_v39 = vmul.f32 %v6285_v44, %v5781_v2 }
 0x281   : >> { %v5035_v41 = vpop.eup %5034  ;;  %v3147_v51 = vadd.f32 %v3115_v54, %v2979_v52  ;;  %v2509_v56 = vmul.f32 %v6285_v44, %v5784_v3  ;;  %v3622_v11 = vmul.f32 %v6629_v15, %v5868_v48  ;;  %v2609_v13 = vmul.f32 %v6294_v47, %v5789_v5  ;;  %v7687_v52 = vld [vmem:[#allocation31_spill] sm:$0xff] }
 0x282   : >> { %v3848_v10 = vadd.f32 1.0, %v5035_v41  ;;  %5038 = vpow2.f32 %v4631_v29  ;;  %v2473_v9 = vadd.f32 %v2441_v39, %v2273_v31  ;;  %v2677_v58 = vmul.f32 %v6294_v47, %v5793_v6 }
 0x283   : >> { %v3318_v61 = vadd.f32 %v3286_v28, %v3147_v51  ;;  %v2541_v49 = vadd.f32 %v2509_v56, %v2341_v12  ;;  %v2780_v34 = vmul.f32 %v6469_v45, %v5796_v7  ;;  %v3183_v44 = vmul.f32 %v6439_v37, %v5829_v24 }
 0x284   : >> { %5040 = vrcp.f32 %v3848_v10  ;;  %v2641_v54 = vadd.f32 %v2609_v13, %v2473_v9  ;;  %v2848_v29 = vmul.f32 %v6469_v45, %v5799_v8  ;;  %v2948_v41 = vmul.f32 %v7687_v52, %v5815_v20 }
 0x285   : >> { %v5037_v17 = vpop.eup %5036  ;;  %v3047_v47 = vadd.f32 %v3015_v55, %v2879_v57  ;;  %v3486_v28 = vadd.f32 %v3454_v19, %v3318_v61  ;;  %v2709_v12 = vadd.f32 %v2677_v58, %v2541_v49  ;;  %v3720_v39 = vadd.f32 %v3688_v46, %v3552_v62  ;;  %v6655_v55 = vld [vmem:[%s5770_s21 + $0x127] sm:$0xff] }
 0x286   : >> { %v3977_v31 = vmul.f32 %v5037_v17, %v3945_v63  ;;  %v2812_v10 = vadd.f32 %v2780_v34, %v2641_v54  ;;  %v3016_v51 = vmul.f32 %v7687_v52, %v5818_v21  ;;  %v3116_v56 = vmul.f32 %v6487_v27, %v5825_v23  ;;  %7688 = vst [vmem:[#allocation27_spill] sm:$0xff] %v6655_v55  ;;  %v6668_v49 = vld [vmem:[%s5770_s21 + $0x128] sm:$0xff]  ;;  %v7689_v54 = vld [vmem:[#allocation29_spill] sm:$0xff] }
 0x287   : >> { %v3521_v13 = vmul.f32 %v6572_v16, %v5873_v50  ;;  %v3654_v45 = vadd.f32 %v3622_v11, %v3486_v28  ;;  %v2880_v63 = vadd.f32 %v2848_v29, %v2709_v12  ;;  %v3385_v57 = vadd.f32 %v3353_v30, %v3214_v22  ;;  %v6673_v17 = vld [vmem:[%s5770_s21 + $0x129] sm:$0xff] }
 0x288   : >> { %v4009_v9 = vadd.f32 %v3977_v31, %v3719_v59  ;;  %v3689_v46 = vmul.f32 %v6581_v32, %v5902_v33  ;;  %v2980_v62 = vadd.f32 %v2948_v41, %v2812_v10  ;;  %v3287_v19 = vmul.f32 %v6655_v55, %v5832_v25  ;;  %v3946_v41 = vld [vmem:[%s6043_s26 + $0x68] sm:$0xff] }
 0x289   : >> { %v3215_v59 = vadd.f32 %v3183_v44, %v3047_v47  ;;  %v3354_v58 = vmul.f32 %v6611_v35, %v5835_v26  ;;  %v4632_v11 = vmul.f32 -1.442695, %v3654_v45  ;;  %v3184_v61 = vmul.f32 %v6487_v27, %v5829_v24  ;;  %v7690_v47 = vld [vmem:[#allocation23_spill] sm:$0xff] }
 0x28a   : >> { %4042 = vst.msk [vmem:[%s6083_s30 + $0x60] sm:$0xff] %vm737_vm0, %v4009_v9  ;;  %v3048_v22 = vadd.f32 %v3016_v51, %v2880_v63  ;;  %v3148_v30 = vadd.f32 %v3116_v56, %v2980_v62  ;;  %v3455_v34 = vmul.f32 %v6668_v49, %v5853_v38  ;;  %v2274_v29 = vmul.f32 %v7689_v54, %v5775_v0  ;;  %v7691_v56 = vld [vmem:[#allocation24_spill] sm:$0xff] }
 0x28b   : >> { %5042 = vpow2.f32 %v4632_v11  ;;  %v3623_v45 = vmul.f32 %v6673_v17, %v5868_v48  ;;  %v2342_v31 = vmul.f32 %v7689_v54, %v5778_v1  ;;  %v2442_v28 = vmul.f32 %v7690_v47, %v5781_v2 }
 0x28c   : >> { %v5039_v44 = vpop.eup %5038  ;;  %v3319_v10 = vadd.f32 %v3287_v19, %v3148_v30  ;;  %v2510_v51 = vmul.f32 %v7690_v47, %v5784_v3  ;;  %v2610_v9 = vmul.f32 %v7691_v56, %v5789_v5  ;;  %v3553_v62 = vadd.f32 %v3521_v13, %v3385_v57 }
 0x28d   : >> { %v3849_v12 = vadd.f32 1.0, %v5039_v44  ;;  %v3522_v11 = vmul.f32 %v6618_v53, %v5873_v50  ;;  %v2474_v27 = vadd.f32 %v2442_v28, %v2274_v29  ;;  %v2781_v54 = vmul.f32 %v6513_v36, %v5796_v7 }
 0x28e   : >> { %v5041_v63 = vpop.eup %5040  ;;  %v3386_v44 = vadd.f32 %v3354_v58, %v3215_v59  ;;  %v3487_v19 = vadd.f32 %v3455_v34, %v3319_v10  ;;  %v3216_v30 = vadd.f32 %v3184_v61, %v3048_v22  ;;  %v3355_v47 = vmul.f32 %v6655_v55, %v5835_v26  ;;  %v6707_v61 = vld [vmem:[%s5770_s21 + $0x12f] sm:$0xff] }
 0x28f   : >> { %v3978_v52 = vmul.f32 %v5041_v63, %v3946_v41  ;;  %5044 = vrcp.f32 %v3849_v12  ;;  %v2642_v35 = vadd.f32 %v2610_v9, %v2474_v27  ;;  %v2949_v13 = vmul.f32 %v6520_v4, %v5815_v20  ;;  %v6723_v63 = vld [vmem:[%s5770_s21 + $0x131] sm:$0xff] }
 0x290   : >> { %v3655_v53 = vadd.f32 %v3623_v45, %v3487_v19  ;;  %v2542_v29 = vadd.f32 %v2510_v51, %v2342_v31  ;;  %v2678_v28 = vmul.f32 %v7691_v56, %v5793_v6  ;;  %v3721_v41 = vadd.f32 %v3689_v46, %v3553_v62  ;;  %v6714_v31 = vld [vmem:[%s5770_s21 + $0x130] sm:$0xff]  ;;  %7692 = vst [vmem:[#allocation28_spill] sm:$0xff] %v6723_v63 }
 0x291   : >> { %v4010_v57 = vadd.f32 %v3978_v52, %v3720_v39  ;;  %v2813_v12 = vadd.f32 %v2781_v54, %v2642_v35  ;;  %v3117_v59 = vmul.f32 %v6529_v14, %v5825_v23  ;;  %v3554_v58 = vadd.f32 %v3522_v11, %v3386_v44  ;;  %v7693_v62 = vld [vmem:[#allocation35_spill] sm:$0xff] }
 0x292   : >> { %v3690_v27 = vmul.f32 %v6629_v15, %v5902_v33  ;;  %v3523_v52 = vmul.f32 %v6668_v49, %v5873_v50  ;;  %v4633_v39 = vmul.f32 -1.442695, %v3655_v53  ;;  %v3387_v22 = vadd.f32 %v3355_v47, %v3216_v30  ;;  %v3947_v44 = vld [vmem:[%s6043_s26 + $0x70] sm:$0xff] }
 0x293   : >> { %4043 = vst.msk [vmem:[%s6083_s30 + $0x68] sm:$0xff] %vm737_vm0, %v4010_v57  ;;  %v2849_v35 = vmul.f32 %v6513_v36, %v5799_v8  ;;  %v2981_v46 = vadd.f32 %v2949_v13, %v2813_v12  ;;  %v3288_v34 = vmul.f32 %v6707_v61, %v5832_v25  ;;  %v2710_v45 = vadd.f32 %v2678_v28, %v2542_v29 }
 0x294   : >> { %5046 = vpow2.f32 %v4633_v39  ;;  %v2275_v10 = vmul.f32 %v7680_v42, %v5775_v0  ;;  %v2343_v53 = vmul.f32 %v7680_v42, %v5778_v1  ;;  %v3456_v9 = vmul.f32 %v6714_v31, %v5853_v38 }
 0x295   : >> { %v5043_v51 = vpop.eup %5042  ;;  %v3149_v56 = vadd.f32 %v3117_v59, %v2981_v46  ;;  %v2443_v11 = vmul.f32 %v7693_v62, %v5781_v2  ;;  %v2511_v54 = vmul.f32 %v7693_v62, %v5784_v3  ;;  %v3624_v30 = vmul.f32 %v6723_v63, %v5868_v48 }
 0x296   : >> { %v3850_v19 = vadd.f32 1.0, %v5043_v51  ;;  %v2611_v42 = vmul.f32 %v6387_v43, %v5789_v5  ;;  %v2679_v47 = vmul.f32 %v6387_v43, %v5793_v6  ;;  %v2782_v28 = vmul.f32 %v6565_v60, %v5796_v7 }
 0x297   : >> { %v3320_v13 = vadd.f32 %v3288_v34, %v3149_v56  ;;  %v2475_v57 = vadd.f32 %v2443_v11, %v2275_v10  ;;  %v2543_v29 = vadd.f32 %v2511_v54, %v2343_v53  ;;  %v2881_v59 = vadd.f32 %v2849_v35, %v2710_v45 }
 0x298   : >> { %5048 = vrcp.f32 %v3850_v19  ;;  %v3017_v39 = vmul.f32 %v6520_v4, %v5818_v21  ;;  %v2850_v46 = vmul.f32 %v6565_v60, %v5799_v8  ;;  %v2950_v34 = vmul.f32 %v6572_v16, %v5815_v20 }
 0x299   : >> { %v5045_v12 = vpop.eup %5044  ;;  %v3488_v62 = vadd.f32 %v3456_v9, %v3320_v13  ;;  %v2643_v43 = vadd.f32 %v2611_v42, %v2475_v57  ;;  %v3722_v10 = vadd.f32 %v3690_v27, %v3554_v58  ;;  %v3691_v53 = vmul.f32 %v6673_v17, %v5902_v33  ;;  %v6753_v58 = vld [vmem:[%s5770_s21 + $0x137] sm:$0xff] }
 0x29a   : >> { %v3979_v51 = vmul.f32 %v5045_v12, %v3947_v44  ;;  %v2711_v35 = vadd.f32 %v2679_v47, %v2543_v29  ;;  %v3118_v54 = vmul.f32 %v6581_v32, %v5825_v23  ;;  %v3555_v19 = vadd.f32 %v3523_v52, %v3387_v22  ;;  %7694 = vst [vmem:[#allocation29_spill] sm:$0xff] %v6753_v58  ;;  %v6760_v52 = vld [vmem:[%s5770_s21 + $0x138] sm:$0xff] }
 0x29b   : >> { %v3656_v56 = vadd.f32 %v3624_v30, %v3488_v62  ;;  %v2814_v11 = vadd.f32 %v2782_v28, %v2643_v43  ;;  %v3049_v44 = vadd.f32 %v3017_v39, %v2881_v59  ;;  %v3185_v9 = vmul.f32 %v6529_v14, %v5829_v24  ;;  %7695 = vst [vmem:[#allocation23_spill] sm:$0xff] %v6760_v52  ;;  %v6771_v39 = vld [vmem:[%s5770_s21 + $0x139] sm:$0xff] }
 0x29c   : >> { %v4011_v45 = vadd.f32 %v3979_v51, %v3721_v41  ;;  %v3018_v42 = vmul.f32 %v6572_v16, %v5818_v21  ;;  %v2882_v27 = vadd.f32 %v2850_v46, %v2711_v35  ;;  %v3289_v47 = vmul.f32 %v6753_v58, %v5832_v25  ;;  %v3948_v51 = vld [vmem:[%s6043_s26 + $0x78] sm:$0xff] }
 0x29d   : >> { %v4634_v41 = vmul.f32 -1.442695, %v3656_v56  ;;  %v2982_v30 = vadd.f32 %v2950_v34, %v2814_v11  ;;  %v3457_v13 = vmul.f32 %v6760_v52, %v5853_v38  ;;  %v2276_v57 = vmul.f32 %v6423_v40, %v5775_v0  ;;  %v7696_v56 = vld [vmem:[#allocation26_spill] sm:$0xff] }
 0x29e   : >> { %4044 = vst.msk [vmem:[%s6083_s30 + $0x70] sm:$0xff] %vm737_vm0, %v4011_v45  ;;  %v5047_v22 = vpop.eup %5046  ;;  %v2344_v29 = vmul.f32 %v6423_v40, %v5778_v1  ;;  %v2444_v28 = vmul.f32 %v6430_v18, %v5781_v2  ;;  %v2512_v46 = vmul.f32 %v6430_v18, %v5784_v3  ;;  %v3625_v62 = vmul.f32 %v6771_v39, %v5868_v48 }
 0x29f   : >> { %v3851_v12 = vadd.f32 1.0, %v5047_v22  ;;  %5050 = vpow2.f32 %v4634_v41  ;;  %v3150_v59 = vadd.f32 %v3118_v54, %v2982_v30  ;;  %v2612_v34 = vmul.f32 %v6439_v37, %v5789_v5  ;;  %v7697_v22 = vld [vmem:[#allocation34_spill] sm:$0xff] }
 0x2a0   : >> { %v2476_v43 = vadd.f32 %v2444_v28, %v2276_v57  ;;  %v2680_v40 = vmul.f32 %v6439_v37, %v5793_v6  ;;  %v2544_v45 = vadd.f32 %v2512_v46, %v2344_v29  ;;  %v2783_v11 = vmul.f32 %v7696_v56, %v5796_v7 }
 0x2a1   : >> { %5052 = vrcp.f32 %v3851_v12  ;;  %v3321_v35 = vadd.f32 %v3289_v47, %v3150_v59  ;;  %v3217_v41 = vadd.f32 %v3185_v9, %v3049_v44  ;;  %v3356_v18 = vmul.f32 %v6707_v61, %v5835_v26 }
 0x2a2   : >> { %v5049_v54 = vpop.eup %5048  ;;  %v2644_v30 = vadd.f32 %v2612_v34, %v2476_v43  ;;  %v2951_v57 = vmul.f32 %v7697_v22, %v5815_v20  ;;  %v3050_v16 = vadd.f32 %v3018_v42, %v2882_v27  ;;  %v3186_v37 = vmul.f32 %v6581_v32, %v5829_v24  ;;  %v6797_v27 = vld [vmem:[%s5770_s21 + $0x13f] sm:$0xff] }
 0x2a3   : >> { %v3980_v28 = vmul.f32 %v5049_v54, %v3948_v51  ;;  %v3489_v47 = vadd.f32 %v3457_v13, %v3321_v35  ;;  %v2712_v29 = vadd.f32 %v2680_v40, %v2544_v45  ;;  %v2851_v44 = vmul.f32 %v7696_v56, %v5799_v8  ;;  %7698 = vst [vmem:[#allocation24_spill] sm:$0xff] %v6797_v27  ;;  %v6810_v35 = vld [vmem:[%s5770_s21 + $0x140] sm:$0xff] }
 0x2a4   : >> { %v2815_v12 = vadd.f32 %v2783_v11, %v2644_v30  ;;  %v3119_v9 = vmul.f32 %v6629_v15, %v5825_v23  ;;  %v3723_v46 = vadd.f32 %v3691_v53, %v3555_v19  ;;  %v3524_v51 = vmul.f32 %v6714_v31, %v5873_v50 }
 0x2a5   : >> { %v4012_v59 = vadd.f32 %v3980_v28, %v3722_v10  ;;  %v3657_v42 = vadd.f32 %v3625_v62, %v3489_v47  ;;  %v3388_v43 = vadd.f32 %v3356_v18, %v3217_v41  ;;  %v3692_v13 = vmul.f32 %v6723_v63, %v5902_v33  ;;  %v6815_v41 = vld [vmem:[%s5770_s21 + $0x141] sm:$0xff]  ;;  %v7700_v47 = vld [vmem:[#allocation31_spill] sm:$0xff] }
 0x2a6   : >> { %v2983_v34 = vadd.f32 %v2951_v57, %v2815_v12  ;;  %v3290_v40 = vmul.f32 %v6797_v27, %v5832_v25  ;;  %v3218_v10 = vadd.f32 %v3186_v37, %v3050_v16  ;;  %v3357_v53 = vmul.f32 %v6753_v58, %v5835_v26  ;;  %v7699_v18 = vld [vmem:[#allocation30_spill] sm:$0xff]  ;;  %v3949_v57 = vld [vmem:[%s6043_s26 + $0x80] sm:$0xff] }
 0x2a7   : >> { %4045 = vst.msk [vmem:[%s6083_s30 + $0x78] sm:$0xff] %vm737_vm0, %v4012_v59  ;;  %v4635_v19 = vmul.f32 -1.442695, %v3657_v42  ;;  %v3019_v62 = vmul.f32 %v7697_v22, %v5818_v21  ;;  %v2883_v45 = vadd.f32 %v2851_v44, %v2712_v29  ;;  %v3458_v54 = vmul.f32 %v6810_v35, %v5853_v38  ;;  %v7701_v59 = vld [vmem:[#allocation32_spill] sm:$0xff] }
 0x2a8   : >> { %v3151_v11 = vadd.f32 %v3119_v9, %v2983_v34  ;;  %v2277_v30 = vmul.f32 %v7699_v18, %v5775_v0  ;;  %v3626_v28 = vmul.f32 %v6815_v41, %v5868_v48  ;;  %v2345_v37 = vmul.f32 %v7699_v18, %v5778_v1 }
 0x2a9   : >> { %v5051_v16 = vpop.eup %5050  ;;  %5054 = vpow2.f32 %v4635_v19  ;;  %v2445_v29 = vmul.f32 %v7700_v47, %v5781_v2  ;;  %v2513_v9 = vmul.f32 %v7700_v47, %v5784_v3  ;;  %v2613_v42 = vmul.f32 %v7701_v59, %v5789_v5 }
 0x2aa   : >> { %v3852_v12 = vadd.f32 1.0, %v5051_v16  ;;  %v3322_v44 = vadd.f32 %v3290_v40, %v3151_v11  ;;  %v3556_v22 = vadd.f32 %v3524_v51, %v3388_v43  ;;  %v3525_v19 = vmul.f32 %v6760_v52, %v5873_v50 }
 0x2ab   : >> { %v5053_v34 = vpop.eup %5052  ;;  %v2477_v56 = vadd.f32 %v2445_v29, %v2277_v30  ;;  %v2784_v18 = vmul.f32 %v6655_v55, %v5796_v7  ;;  %v3389_v16 = vadd.f32 %v3357_v53, %v3218_v10  ;;  %v3051_v11 = vadd.f32 %v3019_v62, %v2883_v45 }
 0x2ac   : >> { %v3981_v58 = vmul.f32 %v5053_v34, %v3949_v57  ;;  %5056 = vrcp.f32 %v3852_v12  ;;  %v3490_v40 = vadd.f32 %v3458_v54, %v3322_v44  ;;  %v3187_v47 = vmul.f32 %v6629_v15, %v5829_v24  ;;  %v6858_v12 = vld [vmem:[%s5770_s21 + $0x158] sm:$0xff] }
 0x2ad   : >> { %v2645_v32 = vadd.f32 %v2613_v42, %v2477_v56  ;;  %v2952_v51 = vmul.f32 %v6668_v49, %v5815_v20  ;;  %v2545_v30 = vadd.f32 %v2513_v9, %v2345_v37  ;;  %v2681_v29 = vmul.f32 %v7701_v59, %v5793_v6  ;;  %7702 = vst [vmem:[#allocation35_spill] sm:$0xff] %v6858_v12  ;;  %v6867_v34 = vld [vmem:[%s5770_s21 + $0x159] sm:$0xff] }
 0x2ae   : >> { %v4013_v43 = vadd.f32 %v3981_v58, %v3723_v46  ;;  %v3658_v52 = vadd.f32 %v3626_v28, %v3490_v40  ;;  %v3724_v57 = vadd.f32 %v3692_v13, %v3556_v22  ;;  %v3693_v10 = vmul.f32 %v6771_v39, %v5902_v33  ;;  %v6851_v22 = vld [vmem:[%s5770_s21 + $0x157] sm:$0xff] }
 0x2af   : >> { %v2816_v53 = vadd.f32 %v2784_v18, %v2645_v32  ;;  %v3120_v62 = vmul.f32 %v6673_v17, %v5825_v23  ;;  %v3557_v56 = vadd.f32 %v3525_v19, %v3389_v16  ;;  %v3358_v58 = vmul.f32 %v6797_v27, %v5835_v26  ;;  %v3950_v16 = vld [vmem:[%s6043_s26 + $0x88] sm:$0xff] }
 0x2b0   : >> { %4046 = vst.msk [vmem:[%s6083_s30 + $0x80] sm:$0xff] %vm737_vm0, %v4013_v43  ;;  %v3526_v46 = vmul.f32 %v6810_v35, %v5873_v50  ;;  %v4636_v45 = vmul.f32 -1.442695, %v3658_v52  ;;  %v3219_v13 = vadd.f32 %v3187_v47, %v3051_v11  ;;  %v2852_v32 = vmul.f32 %v6655_v55, %v5799_v8 }
 0x2b1   : >> { %v2984_v54 = vadd.f32 %v2952_v51, %v2816_v53  ;;  %v3291_v28 = vmul.f32 %v6851_v22, %v5832_v25  ;;  %v2713_v37 = vadd.f32 %v2681_v29, %v2545_v30  ;;  %v2278_v44 = vmul.f32 %v6513_v36, %v5775_v0 }
 0x2b2   : >> { %5058 = vpow2.f32 %v4636_v45  ;;  %v2346_v52 = vmul.f32 %v6513_v36, %v5778_v1  ;;  %v3459_v42 = vmul.f32 %v6858_v12, %v5853_v38  ;;  %v2446_v19 = vmul.f32 %v6520_v4, %v5781_v2 }
 0x2b3   : >> { %v5055_v9 = vpop.eup %5054  ;;  %v3152_v59 = vadd.f32 %v3120_v62, %v2984_v54  ;;  %v2514_v18 = vmul.f32 %v6520_v4, %v5784_v3  ;;  %v3627_v11 = vmul.f32 %v6867_v34, %v5868_v48  ;;  %v2614_v36 = vmul.f32 %v6529_v14, %v5789_v5 }
 0x2b4   : >> { %v3853_v40 = vadd.f32 1.0, %v5055_v9  ;;  %v2682_v47 = vmul.f32 %v6529_v14, %v5793_v6  ;;  %v2478_v43 = vadd.f32 %v2446_v19, %v2278_v44  ;;  %v2785_v29 = vmul.f32 %v6707_v61, %v5796_v7 }
 0x2b5   : >> { %v3323_v51 = vadd.f32 %v3291_v28, %v3152_v59  ;;  %v2546_v30 = vadd.f32 %v2514_v18, %v2346_v52  ;;  %v3390_v4 = vadd.f32 %v3358_v58, %v3219_v13  ;;  %v2884_v62 = vadd.f32 %v2852_v32, %v2713_v37  ;;  %v6895_v18 = vld [vmem:[%s5770_s21 + $0x15f] sm:$0xff] }
 0x2b6   : >> { %v5057_v53 = vpop.eup %5056  ;;  %5060 = vrcp.f32 %v3853_v40  ;;  %v3020_v45 = vmul.f32 %v6668_v49, %v5818_v21  ;;  %v2646_v55 = vadd.f32 %v2614_v36, %v2478_v43  ;;  %v2953_v14 = vmul.f32 %v6714_v31, %v5815_v20  ;;  %7703 = vst [vmem:[#allocation30_spill] sm:$0xff] %v6895_v18 }
 0x2b7   : >> { %v3982_v54 = vmul.f32 %v5057_v53, %v3950_v16  ;;  %v3491_v9 = vadd.f32 %v3459_v42, %v3323_v51  ;;  %v2714_v28 = vadd.f32 %v2682_v47, %v2546_v30  ;;  %v2853_v44 = vmul.f32 %v6707_v61, %v5799_v8  ;;  %v7705_v47 = vld [vmem:[#allocation33_spill] sm:$0xff]  ;;  %v3951_v53 = vld [vmem:[%s6043_s26 + $0x90] sm:$0xff] }
 0x2b8   : >> { %v2817_v58 = vadd.f32 %v2785_v29, %v2646_v55  ;;  %v3121_v13 = vmul.f32 %v6723_v63, %v5825_v23  ;;  %v3725_v32 = vadd.f32 %v3693_v10, %v3557_v56  ;;  %v3558_v37 = vadd.f32 %v3526_v46, %v3390_v4  ;;  %v6914_v4 = vld [vmem:[%s5770_s21 + $0x161] sm:$0xff] }
 0x2b9   : >> { %v4014_v52 = vadd.f32 %v3982_v54, %v3724_v57  ;;  %v3659_v59 = vadd.f32 %v3627_v11, %v3491_v9  ;;  %v3694_v42 = vmul.f32 %v6815_v41, %v5902_v33  ;;  %v3188_v19 = vmul.f32 %v6673_v17, %v5829_v24  ;;  %v6904_v11 = vld [vmem:[%s5770_s21 + $0x160] sm:$0xff] }
 0x2ba   : >> { %v3052_v57 = vadd.f32 %v3020_v45, %v2884_v62  ;;  %v2985_v55 = vadd.f32 %v2953_v14, %v2817_v58  ;;  %v3292_v40 = vmul.f32 %v6895_v18, %v5832_v25  ;;  %v2885_v56 = vadd.f32 %v2853_v44, %v2714_v28  ;;  %7704 = vst [vmem:[#allocation31_spill] sm:$0xff] %v6904_v11  ;;  %v7706_v9 = vld [vmem:[#allocation25_spill] sm:$0xff] }
 0x2bb   : >> { %4047 = vst.msk [vmem:[%s6083_s30 + $0x88] sm:$0xff] %vm737_vm0, %v4014_v52  ;;  %v4637_v16 = vmul.f32 -1.442695, %v3659_v59  ;;  %v3021_v46 = vmul.f32 %v6714_v31, %v5818_v21  ;;  %v2279_v36 = vmul.f32 %v6565_v60, %v5775_v0  ;;  %v2447_v51 = vmul.f32 %v7705_v47, %v5781_v2  ;;  %v7707_v52 = vld [vmem:[#allocation29_spill] sm:$0xff] }
 0x2bc   : >> { %v5059_v10 = vpop.eup %5058  ;;  %v3153_v30 = vadd.f32 %v3121_v13, %v2985_v55  ;;  %v3460_v29 = vmul.f32 %v6904_v11, %v5853_v38  ;;  %v2347_v62 = vmul.f32 %v6565_v60, %v5778_v1  ;;  %v2515_v54 = vmul.f32 %v7705_v47, %v5784_v3  ;;  %v7708_v55 = vld [vmem:[#allocation23_spill] sm:$0xff] }
 0x2bd   : >> { %v3854_v43 = vadd.f32 1.0, %v5059_v10  ;;  %5062 = vpow2.f32 %v4637_v16  ;;  %v2479_v45 = vadd.f32 %v2447_v51, %v2279_v36  ;;  %v2615_v14 = vmul.f32 %v7706_v9, %v5789_v5 }
 0x2be   : >> { %v3324_v28 = vadd.f32 %v3292_v40, %v3153_v30  ;;  %v3628_v44 = vmul.f32 %v6914_v4, %v5868_v48  ;;  %v2786_v59 = vmul.f32 %v7707_v52, %v5796_v7  ;;  %v3220_v13 = vadd.f32 %v3188_v19, %v3052_v57 }
 0x2bf   : >> { %5064 = vrcp.f32 %v3854_v43  ;;  %v3359_v60 = vmul.f32 %v6851_v22, %v5835_v26  ;;  %v2647_v16 = vadd.f32 %v2615_v14, %v2479_v45  ;;  %v2954_v10 = vmul.f32 %v7708_v55, %v5815_v20 }
 0x2c0   : >> { %v5061_v58 = vpop.eup %5060  ;;  %v3053_v47 = vadd.f32 %v3021_v46, %v2885_v56  ;;  %v3189_v40 = vmul.f32 %v6723_v63, %v5829_v24  ;;  %v3492_v51 = vadd.f32 %v3460_v29, %v3324_v28  ;;  %v2547_v43 = vadd.f32 %v2515_v54, %v2347_v62  ;;  %v6939_v46 = vld [vmem:[%s5770_s21 + $0x167] sm:$0xff] }
 0x2c1   : >> { %v3983_v36 = vmul.f32 %v5061_v58, %v3951_v53  ;;  %v2683_v30 = vmul.f32 %v7706_v9, %v5793_v6  ;;  %v2818_v19 = vadd.f32 %v2786_v59, %v2647_v16  ;;  %v3122_v57 = vmul.f32 %v6771_v39, %v5825_v23  ;;  %7709 = vst [vmem:[#allocation32_spill] sm:$0xff] %v6939_v46  ;;  %v6952_v28 = vld [vmem:[%s5770_s21 + $0x168] sm:$0xff] }
 0x2c2   : >> { %v3726_v14 = vadd.f32 %v3694_v42, %v3558_v37  ;;  %v3527_v53 = vmul.f32 %v6858_v12, %v5873_v50  ;;  %v3660_v56 = vadd.f32 %v3628_v44, %v3492_v51  ;;  %v3391_v58 = vadd.f32 %v3359_v60, %v3220_v13  ;;  %v6957_v60 = vld [vmem:[%s5770_s21 + $0x169] sm:$0xff] }
 0x2c3   : >> { %v4015_v45 = vadd.f32 %v3983_v36, %v3725_v32  ;;  %v3695_v29 = vmul.f32 %v6867_v34, %v5902_v33  ;;  %v2986_v62 = vadd.f32 %v2954_v10, %v2818_v19  ;;  %v3293_v54 = vmul.f32 %v6939_v46, %v5832_v25  ;;  %7710 = vst [vmem:[#allocation33_spill] sm:$0xff] %v6957_v60  ;;  %v7711_v16 = vld [vmem:[#allocation26_spill] sm:$0xff] }
 0x2c4   : >> { %v3221_v32 = vadd.f32 %v3189_v40, %v3053_v47  ;;  %v3360_v37 = vmul.f32 %v6895_v18, %v5835_v26  ;;  %v4638_v42 = vmul.f32 -1.442695, %v3660_v56  ;;  %v2854_v9 = vmul.f32 %v7707_v52, %v5799_v8  ;;  %v3952_v47 = vld [vmem:[%s6043_s26 + $0x98] sm:$0xff] }
 0x2c5   : >> { %4048 = vst.msk [vmem:[%s6083_s30 + $0x90] sm:$0xff] %vm737_vm0, %v4015_v45  ;;  %v2715_v44 = vadd.f32 %v2683_v30, %v2547_v43  ;;  %v3154_v59 = vadd.f32 %v3122_v57, %v2986_v62  ;;  %v3461_v13 = vmul.f32 %v6952_v28, %v5853_v38  ;;  %v2280_v10 = vmul.f32 %v7711_v16, %v5775_v0  ;;  %v7712_v43 = vld [vmem:[#allocation34_spill] sm:$0xff] }
 0x2c6   : >> { %5066 = vpow2.f32 %v4638_v42  ;;  %v3629_v40 = vmul.f32 %v6957_v60, %v5868_v48  ;;  %v2348_v51 = vmul.f32 %v7711_v16, %v5778_v1  ;;  %v2448_v30 = vmul.f32 %v7712_v43, %v5781_v2 }
 0x2c7   : >> { %v5063_v36 = vpop.eup %5062  ;;  %v3325_v57 = vadd.f32 %v3293_v54, %v3154_v59  ;;  %v2516_v45 = vmul.f32 %v7712_v43, %v5784_v3  ;;  %v2616_v56 = vmul.f32 %v6629_v15, %v5789_v5  ;;  %v3559_v52 = vadd.f32 %v3527_v53, %v3391_v58 }
 0x2c8   : >> { %v3855_v19 = vadd.f32 1.0, %v5063_v36  ;;  %v3528_v42 = vmul.f32 %v6904_v11, %v5873_v50  ;;  %v2480_v60 = vadd.f32 %v2448_v30, %v2280_v10  ;;  %v2787_v16 = vmul.f32 %v6797_v27, %v5796_v7 }
 0x2c9   : >> { %v5065_v62 = vpop.eup %5064  ;;  %v3392_v36 = vadd.f32 %v3360_v37, %v3221_v32  ;;  %v3493_v54 = vadd.f32 %v3461_v13, %v3325_v57  ;;  %v2886_v59 = vadd.f32 %v2854_v9, %v2715_v44  ;;  %v3022_v43 = vmul.f32 %v7708_v55, %v5818_v21 }
 0x2ca   : >> { %v3984_v18 = vmul.f32 %v5065_v62, %v3952_v47  ;;  %5068 = vrcp.f32 %v3855_v19  ;;  %v2648_v63 = vadd.f32 %v2616_v56, %v2480_v60  ;;  %v2955_v53 = vmul.f32 %v6810_v35, %v5815_v20  ;;  %v7715_v19 = vld [vmem:[#allocation27_spill] sm:$0xff] }
 0x2cb   : >> { %v3661_v11 = vadd.f32 %v3629_v40, %v3493_v54  ;;  %v2548_v10 = vadd.f32 %v2516_v45, %v2348_v51  ;;  %v2684_v30 = vmul.f32 %v6629_v15, %v5793_v6  ;;  %v3727_v47 = vadd.f32 %v3695_v29, %v3559_v52  ;;  %v6993_v52 = vld [vmem:[%s5770_s21 + $0x16f] sm:$0xff]  ;;  %v3953_v54 = vld [vmem:[%s6043_s26 + $0xa0] sm:$0xff] }
 0x2cc   : >> { %v4016_v58 = vadd.f32 %v3984_v18, %v3726_v14  ;;  %v3696_v32 = vmul.f32 %v6914_v4, %v5902_v33  ;;  %v2819_v37 = vadd.f32 %v2787_v16, %v2648_v63  ;;  %v3123_v9 = vmul.f32 %v6815_v41, %v5825_v23  ;;  %7713 = vst [vmem:[#allocation25_spill] sm:$0xff] %v6993_v52  ;;  %v7000_v51 = vld [vmem:[%s5770_s21 + $0x170] sm:$0xff] }
 0x2cd   : >> { %v3560_v44 = vadd.f32 %v3528_v42, %v3392_v36  ;;  %v3190_v18 = vmul.f32 %v6771_v39, %v5829_v24  ;;  %v3361_v14 = vmul.f32 %v6939_v46, %v5835_v26  ;;  %v4639_v15 = vmul.f32 -1.442695, %v3661_v11  ;;  %7714 = vst [vmem:[#allocation23_spill] sm:$0xff] %v7000_v51  ;;  %v7009_v42 = vld [vmem:[%s5770_s21 + $0x171] sm:$0xff] }
 0x2ce   : >> { %4049 = vst.msk [vmem:[%s6083_s30 + $0x98] sm:$0xff] %vm737_vm0, %v4016_v58  ;;  %v3054_v29 = vadd.f32 %v3022_v43, %v2886_v59  ;;  %v2855_v63 = vmul.f32 %v6797_v27, %v5799_v8  ;;  %v2987_v13 = vadd.f32 %v2955_v53, %v2819_v37  ;;  %v3294_v60 = vmul.f32 %v6993_v52, %v5832_v25 }
 0x2cf   : >> { %5070 = vpow2.f32 %v4639_v15  ;;  %v2716_v40 = vadd.f32 %v2684_v30, %v2548_v10  ;;  %v2281_v57 = vmul.f32 %v7715_v19, %v5775_v0  ;;  %v2349_v11 = vmul.f32 %v7715_v19, %v5778_v1  ;;  %7716 = vst [vmem:[#allocation26_spill] sm:$0xff] %v7009_v42 }
 0x2d0   : >> { %v5067_v45 = vpop.eup %5066  ;;  %v3155_v56 = vadd.f32 %v3123_v9, %v2987_v13  ;;  %v3462_v62 = vmul.f32 %v7000_v51, %v5853_v38  ;;  %v2449_v16 = vmul.f32 %v6668_v49, %v5781_v2  ;;  %v2517_v36 = vmul.f32 %v6668_v49, %v5784_v3 }
 0x2d1   : >> { %v3856_v59 = vadd.f32 1.0, %v5067_v45  ;;  %v3630_v43 = vmul.f32 %v7009_v42, %v5868_v48  ;;  %v2617_v53 = vmul.f32 %v6673_v17, %v5789_v5  ;;  %v2685_v58 = vmul.f32 %v6673_v17, %v5793_v6 }
 0x2d2   : >> { %v3326_v10 = vadd.f32 %v3294_v60, %v3155_v56  ;;  %v2481_v30 = vadd.f32 %v2449_v16, %v2281_v57  ;;  %v2549_v37 = vadd.f32 %v2517_v36, %v2349_v11  ;;  %v2788_v9 = vmul.f32 %v6851_v22, %v5796_v7  ;;  %v7037_v36 = vld [vmem:[%s5770_s21 + $0x187] sm:$0xff] }
 0x2d3   : >> { %5072 = vrcp.f32 %v3856_v59  ;;  %v3222_v49 = vadd.f32 %v3190_v18, %v3054_v29  ;;  %v2887_v13 = vadd.f32 %v2855_v63, %v2716_v40  ;;  %v3023_v19 = vmul.f32 %v6810_v35, %v5818_v21  ;;  %v7046_v59 = vld [vmem:[%s5770_s21 + $0x188] sm:$0xff] }
 0x2d4   : >> { %v5069_v15 = vpop.eup %5068  ;;  %v3494_v27 = vadd.f32 %v3462_v62, %v3326_v10  ;;  %v2649_v46 = vadd.f32 %v2617_v53, %v2481_v30  ;;  %v2956_v17 = vmul.f32 %v6858_v12, %v5815_v20  ;;  %v2717_v60 = vadd.f32 %v2685_v58, %v2549_v37  ;;  %v7055_v37 = vld [vmem:[%s5770_s21 + $0x189] sm:$0xff] }
 0x2d5   : >> { %v3985_v45 = vmul.f32 %v5069_v15, %v3953_v54  ;;  %v2856_v57 = vmul.f32 %v6851_v22, %v5799_v8  ;;  %v3124_v29 = vmul.f32 %v6867_v34, %v5825_v23  ;;  %v3728_v63 = vadd.f32 %v3696_v32, %v3560_v44 }
 0x2d6   : >> { %v3662_v56 = vadd.f32 %v3630_v43, %v3494_v27  ;;  %v2820_v18 = vadd.f32 %v2788_v9, %v2649_v46  ;;  %v3393_v40 = vadd.f32 %v3361_v14, %v3222_v49  ;;  %v3529_v62 = vmul.f32 %v6952_v28, %v5873_v50  ;;  %v3954_v9 = vld [vmem:[%s6043_s26 + $0xa8] sm:$0xff] }
 0x2d7   : >> { %v4017_v11 = vadd.f32 %v3985_v45, %v3727_v47  ;;  %v3191_v16 = vmul.f32 %v6815_v41, %v5829_v24  ;;  %v3055_v27 = vadd.f32 %v3023_v19, %v2887_v13  ;;  %v3295_v54 = vmul.f32 %v7037_v36, %v5832_v25  ;;  %v7717_v19 = vld [vmem:[#allocation28_spill] sm:$0xff] }
 0x2d8   : >> { %v4640_v47 = vmul.f32 -1.442695, %v3662_v56  ;;  %v2988_v46 = vadd.f32 %v2956_v17, %v2820_v18  ;;  %v2888_v44 = vadd.f32 %v2856_v57, %v2717_v60  ;;  %v3024_v14 = vmul.f32 %v6858_v12, %v5818_v21  ;;  %v7718_v57 = vld [vmem:[#allocation30_spill] sm:$0xff] }
 0x2d9   : >> { %4050 = vst.msk [vmem:[%s6083_s30 + $0xa0] sm:$0xff] %vm737_vm0, %v4017_v11  ;;  %v5071_v32 = vpop.eup %5070  ;;  %v2282_v43 = vmul.f32 %v6707_v61, %v5775_v0  ;;  %v2450_v53 = vmul.f32 %v6714_v31, %v5781_v2  ;;  %v3463_v30 = vmul.f32 %v7046_v59, %v5853_v38  ;;  %v3631_v15 = vmul.f32 %v7055_v37, %v5868_v48 }
 0x2da   : >> { %v3857_v58 = vadd.f32 1.0, %v5071_v32  ;;  %5074 = vpow2.f32 %v4640_v47  ;;  %v3156_v10 = vadd.f32 %v3124_v29, %v2988_v46  ;;  %v2350_v49 = vmul.f32 %v6707_v61, %v5778_v1  ;;  %v7719_v29 = vld [vmem:[#allocation33_spill] sm:$0xff]  ;;  %v7720_v61 = vld [vmem:[#allocation31_spill] sm:$0xff] }
 0x2db   : >> { %v2482_v13 = vadd.f32 %v2450_v53, %v2282_v43  ;;  %v2618_v45 = vmul.f32 %v7717_v19, %v5789_v5  ;;  %v2518_v60 = vmul.f32 %v6714_v31, %v5784_v3  ;;  %v2789_v11 = vmul.f32 %v7718_v57, %v5796_v7 }
 0x2dc   : >> { %5076 = vrcp.f32 %v3857_v58  ;;  %v3327_v17 = vadd.f32 %v3295_v54, %v3156_v10  ;;  %v3561_v18 = vadd.f32 %v3529_v62, %v3393_v40  ;;  %v3697_v47 = vmul.f32 %v7719_v29, %v5902_v33 }
 0x2dd   : >> { %v5073_v56 = vpop.eup %5072  ;;  %v2650_v46 = vadd.f32 %v2618_v45, %v2482_v13  ;;  %v2957_v32 = vmul.f32 %v7720_v61, %v5815_v20  ;;  %v3223_v53 = vadd.f32 %v3191_v16, %v3055_v27  ;;  %v3362_v54 = vmul.f32 %v6993_v52, %v5835_v26  ;;  %v7081_v27 = vld [vmem:[%s5770_s21 + $0x18f] sm:$0xff] }
 0x2de   : >> { %v3986_v43 = vmul.f32 %v5073_v56, %v3954_v9  ;;  %v3495_v31 = vadd.f32 %v3463_v30, %v3327_v17  ;;  %v3056_v58 = vadd.f32 %v3024_v14, %v2888_v44  ;;  %v3192_v10 = vmul.f32 %v6867_v34, %v5829_v24  ;;  %7721 = vst [vmem:[#allocation34_spill] sm:$0xff] %v7081_v27  ;;  %v7094_v17 = vld [vmem:[%s5770_s21 + $0x190] sm:$0xff] }
 0x2df   : >> { %v2821_v40 = vadd.f32 %v2789_v11, %v2650_v46  ;;  %v3125_v62 = vmul.f32 %v6914_v4, %v5825_v23  ;;  %v2550_v12 = vadd.f32 %v2518_v60, %v2350_v49  ;;  %v2686_v16 = vmul.f32 %v7717_v19, %v5793_v6 }
 0x2e0   : >> { %v4018_v13 = vadd.f32 %v3986_v43, %v3728_v63  ;;  %v3663_v45 = vadd.f32 %v3631_v15, %v3495_v31  ;;  %v3729_v9 = vadd.f32 %v3697_v47, %v3561_v18  ;;  %v3530_v44 = vmul.f32 %v7000_v51, %v5873_v50  ;;  %v7722_v18 = vld [vmem:[#allocation29_spill] sm:$0xff] }
 0x2e1   : >> { %v2989_v14 = vadd.f32 %v2957_v32, %v2821_v40  ;;  %v3296_v30 = vmul.f32 %v7081_v27, %v5832_v25  ;;  %v3394_v63 = vadd.f32 %v3362_v54, %v3223_v53  ;;  %v3698_v15 = vmul.f32 %v7009_v42, %v5902_v33  ;;  %v3955_v32 = vld [vmem:[%s6043_s26 + $0xb0] sm:$0xff] }
 0x2e2   : >> { %4051 = vst.msk [vmem:[%s6083_s30 + $0xa8] sm:$0xff] %vm737_vm0, %v4018_v13  ;;  %v3363_v49 = vmul.f32 %v7037_v36, %v5835_v26  ;;  %v4641_v19 = vmul.f32 -1.442695, %v3663_v45  ;;  %v3224_v60 = vadd.f32 %v3192_v10, %v3056_v58  ;;  %v3464_v56 = vmul.f32 %v7094_v17, %v5853_v38  ;;  %v7104_v54 = vld [vmem:[%s5770_s21 + $0x191] sm:$0xff] }
 0x2e3   : >> { %v3157_v11 = vadd.f32 %v3125_v62, %v2989_v14  ;;  %v2283_v47 = vmul.f32 %v7722_v18, %v5775_v0  ;;  %v2718_v43 = vadd.f32 %v2686_v16, %v2550_v12  ;;  %v2857_v53 = vmul.f32 %v7718_v57, %v5799_v8  ;;  %7723 = vst [vmem:[#allocation27_spill] sm:$0xff] %v7104_v54  ;;  %v7724_v14 = vld [vmem:[#allocation32_spill] sm:$0xff] }
 0x2e4   : >> { %v5075_v46 = vpop.eup %5074  ;;  %5078 = vpow2.f32 %v4641_v19  ;;  %v2451_v31 = vmul.f32 %v7708_v55, %v5781_v2  ;;  %v3632_v40 = vmul.f32 %v7104_v54, %v5868_v48  ;;  %v2619_v62 = vmul.f32 %v6771_v39, %v5789_v5 }
 0x2e5   : >> { %v3858_v58 = vadd.f32 1.0, %v5075_v46  ;;  %v3328_v10 = vadd.f32 %v3296_v30, %v3157_v11  ;;  %v3562_v45 = vadd.f32 %v3530_v44, %v3394_v63  ;;  %v2351_v12 = vmul.f32 %v7722_v18, %v5778_v1 }
 0x2e6   : >> { %v5077_v13 = vpop.eup %5076  ;;  %v2483_v16 = vadd.f32 %v2451_v31, %v2283_v47  ;;  %v2790_v19 = vmul.f32 %v7724_v14, %v5796_v7  ;;  %v2519_v30 = vmul.f32 %v7708_v55, %v5784_v3  ;;  %v3395_v11 = vadd.f32 %v3363_v49, %v3224_v60 }
 0x2e7   : >> { %v3987_v57 = vmul.f32 %v5077_v13, %v3955_v32  ;;  %5080 = vrcp.f32 %v3858_v58  ;;  %v3496_v46 = vadd.f32 %v3464_v56, %v3328_v10  ;;  %v3531_v54 = vmul.f32 %v7046_v59, %v5873_v50  ;;  %v7140_v13 = vld [vmem:[%s5770_s21 + $0x198] sm:$0xff] }
 0x2e8   : >> { %v2651_v44 = vadd.f32 %v2619_v62, %v2483_v16  ;;  %v2958_v63 = vmul.f32 %v6952_v28, %v5815_v20  ;;  %v2889_v47 = vadd.f32 %v2857_v53, %v2718_v43  ;;  %v3025_v31 = vmul.f32 %v7720_v61, %v5818_v21 }
 0x2e9   : >> { %v4019_v18 = vadd.f32 %v3987_v57, %v3729_v9  ;;  %v3664_v32 = vadd.f32 %v3632_v40, %v3496_v46  ;;  %v3126_v55 = vmul.f32 %v7719_v29, %v5825_v23  ;;  %v3730_v49 = vadd.f32 %v3698_v15, %v3562_v45  ;;  %v7131_v57 = vld [vmem:[%s5770_s21 + $0x197] sm:$0xff] }
 0x2ea   : >> { %v2822_v56 = vadd.f32 %v2790_v19, %v2651_v44  ;;  %v2551_v58 = vadd.f32 %v2519_v30, %v2351_v12  ;;  %v2687_v10 = vmul.f32 %v6771_v39, %v5793_v6  ;;  %v3563_v9 = vadd.f32 %v3531_v54, %v3395_v11  ;;  %v7725_v39 = vld [vmem:[#allocation24_spill] sm:$0xff] }
 0x2eb   : >> { %4052 = vst.msk [vmem:[%s6083_s30 + $0xb0] sm:$0xff] %vm737_vm0, %v4019_v18  ;;  %v4642_v60 = vmul.f32 -1.442695, %v3664_v32  ;;  %v3699_v43 = vmul.f32 %v7055_v37, %v5902_v33  ;;  %v3297_v40 = vmul.f32 %v7131_v57, %v5832_v25  ;;  %v3057_v62 = vadd.f32 %v3025_v31, %v2889_v47  ;;  %v3956_v30 = vld [vmem:[%s6043_s26 + $0xb8] sm:$0xff] }
 0x2ec   : >> { %v2990_v53 = vadd.f32 %v2958_v63, %v2822_v56  ;;  %v3193_v15 = vmul.f32 %v6914_v4, %v5829_v24  ;;  %v2284_v45 = vmul.f32 %v7725_v39, %v5775_v0  ;;  %v3364_v54 = vmul.f32 %v7081_v27, %v5835_v26  ;;  %v7154_v18 = vld [vmem:[%s5770_s21 + $0x199] sm:$0xff] }
 0x2ed   : >> { %5082 = vpow2.f32 %v4642_v60  ;;  %v3465_v19 = vmul.f32 %v7140_v13, %v5853_v38  ;;  %v2452_v46 = vmul.f32 %v6810_v35, %v5781_v2  ;;  %v2719_v44 = vadd.f32 %v2687_v10, %v2551_v58 }
 0x2ee   : >> { %v5079_v12 = vpop.eup %5078  ;;  %v3158_v16 = vadd.f32 %v3126_v55, %v2990_v53  ;;  %v2858_v63 = vmul.f32 %v7724_v14, %v5799_v8  ;;  %v2620_v47 = vmul.f32 %v6815_v41, %v5789_v5  ;;  %v3633_v32 = vmul.f32 %v7154_v18, %v5868_v48 }
 0x2ef   : >> { %v3859_v11 = vadd.f32 1.0, %v5079_v12  ;;  %v2484_v56 = vadd.f32 %v2452_v46, %v2284_v45  ;;  %v2791_v55 = vmul.f32 %v6993_v52, %v5796_v7  ;;  %v3225_v53 = vadd.f32 %v3193_v15, %v3057_v62 }
 0x2f0   : >> { %v3329_v31 = vadd.f32 %v3297_v40, %v3158_v16  ;;  %v2352_v58 = vmul.f32 %v7725_v39, %v5778_v1  ;;  %v2520_v10 = vmul.f32 %v6810_v35, %v5784_v3  ;;  %v2959_v45 = vmul.f32 %v7000_v51, %v5815_v20 }
 0x2f1   : >> { %v5081_v60 = vpop.eup %5080  ;;  %5084 = vrcp.f32 %v3859_v11  ;;  %v2652_v16 = vadd.f32 %v2620_v47, %v2484_v56  ;;  %v2890_v46 = vadd.f32 %v2858_v63, %v2719_v44  ;;  %v3026_v14 = vmul.f32 %v6952_v28, %v5818_v21  ;;  %v7177_v47 = vld [vmem:[%s5770_s21 + $0x19f] sm:$0xff] }
 0x2f2   : >> { %v3988_v12 = vmul.f32 %v5081_v60, %v3956_v30  ;;  %v3497_v40 = vadd.f32 %v3465_v19, %v3329_v31  ;;  %v3127_v39 = vmul.f32 %v7009_v42, %v5825_v23  ;;  %v3731_v27 = vadd.f32 %v3699_v43, %v3563_v9  ;;  %7726 = vst [vmem:[#allocation28_spill] sm:$0xff] %v7177_v47  ;;  %v7186_v56 = vld [vmem:[%s5770_s21 + $0x1a0] sm:$0xff] }
 0x2f3   : >> { %v2823_v15 = vadd.f32 %v2791_v55, %v2652_v16  ;;  %v3532_v35 = vmul.f32 %v7094_v17, %v5873_v50  ;;  %v2552_v19 = vadd.f32 %v2520_v10, %v2352_v58  ;;  %v2688_v30 = vmul.f32 %v6815_v41, %v5793_v6  ;;  %v7727_v55 = vld [vmem:[#allocation35_spill] sm:$0xff]  ;;  %v3957_v10 = vld [vmem:[%s6043_s26 + $0xc0] sm:$0xff] }
 0x2f4   : >> { %v4020_v11 = vadd.f32 %v3988_v12, %v3730_v49  ;;  %v3665_v62 = vadd.f32 %v3633_v32, %v3497_v40  ;;  %v3396_v49 = vadd.f32 %v3364_v54, %v3225_v53  ;;  %v3298_v31 = vmul.f32 %v7177_v47, %v5832_v25  ;;  %v7198_v40 = vld [vmem:[%s5770_s21 + $0x1a1] sm:$0xff] }
 0x2f5   : >> { %v2991_v63 = vadd.f32 %v2959_v45, %v2823_v15  ;;  %v3058_v43 = vadd.f32 %v3026_v14, %v2890_v46  ;;  %v3194_v32 = vmul.f32 %v7719_v29, %v5829_v24  ;;  %v2285_v41 = vmul.f32 %v6851_v22, %v5775_v0 }
 0x2f6   : >> { %4053 = vst.msk [vmem:[%s6083_s30 + $0xb8] sm:$0xff] %vm737_vm0, %v4020_v11  ;;  %v4643_v44 = vmul.f32 -1.442695, %v3665_v62  ;;  %v2453_v60 = vmul.f32 %v7727_v55, %v5781_v2  ;;  %v3466_v58 = vmul.f32 %v7186_v56, %v5853_v38  ;;  %v2720_v12 = vadd.f32 %v2688_v30, %v2552_v19  ;;  %v7728_v19 = vld [vmem:[#allocation27_spill] sm:$0xff] }
 0x2f7   : >> { %v5083_v9 = vpop.eup %5082  ;;  %v3159_v53 = vadd.f32 %v3127_v39, %v2991_v63  ;;  %v2859_v14 = vmul.f32 %v6993_v52, %v5799_v8  ;;  %v2621_v45 = vmul.f32 %v6867_v34, %v5789_v5  ;;  %v3634_v11 = vmul.f32 %v7198_v40, %v5868_v48 }
 0x2f8   : >> { %v3860_v54 = vadd.f32 1.0, %v5083_v9  ;;  %5086 = vpow2.f32 %v4643_v44  ;;  %v2485_v16 = vadd.f32 %v2453_v60, %v2285_v41  ;;  %v2792_v62 = vmul.f32 %v7037_v36, %v5796_v7 }
 0x2f9   : >> { %v3330_v46 = vadd.f32 %v3298_v31, %v3159_v53  ;;  %v3564_v39 = vadd.f32 %v3532_v35, %v3396_v49  ;;  %v3700_v30 = vmul.f32 %v7728_v19, %v5902_v33  ;;  %v2960_v63 = vmul.f32 %v7046_v59, %v5815_v20 }
 0x2fa   : >> { %5088 = vrcp.f32 %v3860_v54  ;;  %v2653_v44 = vadd.f32 %v2621_v45, %v2485_v16  ;;  %v3226_v41 = vadd.f32 %v3194_v32, %v3058_v43  ;;  %v3365_v31 = vmul.f32 %v7131_v57, %v5835_v26  ;;  %v7213_v54 = vld [vmem:[%s5770_s21 + $0x1b7] sm:$0xff] }
 0x2fb   : >> { %v5085_v15 = vpop.eup %5084  ;;  %v3498_v60 = vadd.f32 %v3466_v58, %v3330_v46  ;;  %v2891_v53 = vadd.f32 %v2859_v14, %v2720_v12  ;;  %v3027_v35 = vmul.f32 %v7000_v51, %v5818_v21  ;;  %v3128_v16 = vmul.f32 %v7055_v37, %v5825_v23  ;;  %v7224_v58 = vld [vmem:[%s5770_s21 + $0x1b8] sm:$0xff] }
 0x2fc   : >> { %v3989_v9 = vmul.f32 %v5085_v15, %v3957_v10  ;;  %v2824_v49 = vadd.f32 %v2792_v62, %v2653_v44  ;;  %v2353_v43 = vmul.f32 %v6851_v22, %v5778_v1  ;;  %v2521_v32 = vmul.f32 %v7727_v55, %v5784_v3  ;;  %7729 = vst [vmem:[#allocation33_spill] sm:$0xff] %v7224_v58  ;;  %v7237_v62 = vld [vmem:[%s5770_s21 + $0x1b9] sm:$0xff]  ;;  %v7731_v44 = vld [vmem:[#allocation30_spill] sm:$0xff] }
 0x2fd   : >> { %v3666_v52 = vadd.f32 %v3634_v11, %v3498_v60  ;;  %v3732_v10 = vadd.f32 %v3700_v30, %v3564_v39  ;;  %v3533_v12 = vmul.f32 %v7140_v13, %v5873_v50  ;;  %v3299_v46 = vmul.f32 %v7213_v54, %v5832_v25  ;;  %7730 = vst [vmem:[#allocation31_spill] sm:$0xff] %v7237_v62  ;;  %v3958_v60 = vld [vmem:[%s6043_s26 + $0xc8] sm:$0xff]  ;;  %v7261_v51 = vld [vmem:[%s5770_s21 + $0x1bf] sm:$0xff] }
 0x2fe   : >> { %v4021_v45 = vadd.f32 %v3989_v9, %v3731_v27  ;;  %v2992_v14 = vadd.f32 %v2960_v63, %v2824_v49  ;;  %v3397_v27 = vadd.f32 %v3365_v31, %v3226_v41  ;;  %v3701_v22 = vmul.f32 %v7154_v18, %v5902_v33 }
 0x2ff   : >> { %v3195_v55 = vmul.f32 %v7009_v42, %v5829_v24  ;;  %v4644_v11 = vmul.f32 -1.442695, %v3666_v52  ;;  %v3059_v15 = vadd.f32 %v3027_v35, %v2891_v53  ;;  %v3467_v30 = vmul.f32 %v7224_v58, %v5853_v38 }
 0x300   : >> { %4054 = vst.msk [vmem:[%s6083_s30 + $0xc0] sm:$0xff] %vm737_vm0, %v4021_v45  ;;  %v3160_v39 = vadd.f32 %v3128_v16, %v2992_v14  ;;  %v2286_v63 = vmul.f32 %v7731_v44, %v5775_v0  ;;  %v2553_v41 = vadd.f32 %v2521_v32, %v2353_v43  ;;  %v2689_v31 = vmul.f32 %v6867_v34, %v5793_v6  ;;  %v7732_v34 = vld [vmem:[#allocation34_spill] sm:$0xff] }
 0x301   : >> { %5090 = vpow2.f32 %v4644_v11  ;;  %v2454_v52 = vmul.f32 %v7720_v61, %v5781_v2  ;;  %v3635_v53 = vmul.f32 %v7237_v62, %v5868_v48  ;;  %v2622_v35 = vmul.f32 %v6914_v4, %v5789_v5 }
 0x302   : >> { %v5087_v9 = vpop.eup %5086  ;;  %v3331_v45 = vadd.f32 %v3299_v46, %v3160_v39  ;;  %v3565_v14 = vadd.f32 %v3533_v12, %v3397_v27  ;;  %v3366_v43 = vmul.f32 %v7177_v47, %v5835_v26  ;;  %v2793_v11 = vmul.f32 %v7732_v34, %v5796_v7 }
 0x303   : >> { %v3861_v49 = vadd.f32 1.0, %v5087_v9  ;;  %v2486_v32 = vadd.f32 %v2454_v52, %v2286_v63  ;;  %v3227_v46 = vadd.f32 %v3195_v55, %v3059_v15  ;;  %v2721_v9 = vadd.f32 %v2689_v31, %v2553_v41  ;;  %v7270_v41 = vld [vmem:[%s5770_s21 + $0x1c0] sm:$0xff] }
 0x304   : >> { %v5089_v16 = vpop.eup %5088  ;;  %v3499_v39 = vadd.f32 %v3467_v30, %v3331_v45  ;;  %v2860_v62 = vmul.f32 %v7037_v36, %v5799_v8  ;;  %v2961_v12 = vmul.f32 %v7094_v17, %v5815_v20  ;;  %v3733_v55 = vadd.f32 %v3701_v22, %v3565_v14 }
 0x305   : >> { %v3990_v58 = vmul.f32 %v5089_v16, %v3958_v60  ;;  %5092 = vrcp.f32 %v3861_v49  ;;  %v2654_v42 = vadd.f32 %v2622_v35, %v2486_v32  ;;  %v3129_v60 = vmul.f32 %v7728_v19, %v5825_v23  ;;  %v7281_v49 = vld [vmem:[%s5770_s21 + $0x1c1] sm:$0xff] }
 0x306   : >> { %v3667_v47 = vadd.f32 %v3635_v53, %v3499_v39  ;;  %v3398_v15 = vadd.f32 %v3366_v43, %v3227_v46  ;;  %v3534_v36 = vmul.f32 %v7186_v56, %v5873_v50  ;;  %v2354_v22 = vmul.f32 %v7731_v44, %v5778_v1  ;;  %v3959_v44 = vld [vmem:[%s6043_s26 + $0xd0] sm:$0xff] }
 0x307   : >> { %v4022_v27 = vadd.f32 %v3990_v58, %v3732_v10  ;;  %v2825_v63 = vadd.f32 %v2793_v11, %v2654_v42  ;;  %v2892_v58 = vadd.f32 %v2860_v62, %v2721_v9  ;;  %v3028_v10 = vmul.f32 %v7046_v59, %v5818_v21 }
 0x308   : >> { %v4645_v30 = vmul.f32 -1.442695, %v3667_v47  ;;  %v3300_v42 = vmul.f32 %v7261_v51, %v5832_v25  ;;  %v2522_v52 = vmul.f32 %v7720_v61, %v5784_v3  ;;  %v7733_v47 = vld [vmem:[#allocation32_spill] sm:$0xff]  ;;  %v3702_v59 = vmul.f32 %v7198_v40, %v5902_v33 }
 0x309   : >> { %4055 = vst.msk [vmem:[%s6083_s30 + $0xc8] sm:$0xff] %vm737_vm0, %v4022_v27  ;;  %v2993_v31 = vadd.f32 %v2961_v12, %v2825_v63  ;;  %v2287_v45 = vmul.f32 %v7733_v47, %v5775_v0  ;;  %v3468_v35 = vmul.f32 %v7270_v41, %v5853_v38  ;;  %v2455_v16 = vmul.f32 %v6952_v28, %v5781_v2 }
 0x30a   : >> { %5094 = vpow2.f32 %v4645_v30  ;;  %v3566_v14 = vadd.f32 %v3534_v36, %v3398_v15  ;;  %v3196_v61 = vmul.f32 %v7055_v37, %v5829_v24  ;;  %v2623_v32 = vmul.f32 %v7719_v29, %v5789_v5 }
 0x30b   : >> { %v5091_v62 = vpop.eup %5090  ;;  %v3161_v53 = vadd.f32 %v3129_v60, %v2993_v31  ;;  %v3636_v46 = vmul.f32 %v7281_v49, %v5868_v48  ;;  %v2487_v39 = vadd.f32 %v2455_v16, %v2287_v45  ;;  %v2794_v9 = vmul.f32 %v7131_v57, %v5796_v7  ;;  %v7305_v31 = vld [vmem:[%s5770_s21 + $0x1c7] sm:$0xff] }
 0x30c   : >> { %v3862_v43 = vadd.f32 1.0, %v5091_v62  ;;  %v3060_v27 = vadd.f32 %v3028_v10, %v2892_v58  ;;  %v2554_v63 = vadd.f32 %v2522_v52, %v2354_v22  ;;  %v2690_v37 = vmul.f32 %v6914_v4, %v5793_v6 }
 0x30d   : >> { %v3332_v11 = vadd.f32 %v3300_v42, %v3161_v53  ;;  %v2655_v36 = vadd.f32 %v2623_v32, %v2487_v39  ;;  %v2962_v30 = vmul.f32 %v7140_v13, %v5815_v20  ;;  %v3130_v58 = vmul.f32 %v7154_v18, %v5825_v23  ;;  %v7314_v53 = vld [vmem:[%s5770_s21 + $0x1c8] sm:$0xff] }
 0x30e   : >> { %5096 = vrcp.f32 %v3862_v43  ;;  %v3734_v10 = vadd.f32 %v3702_v59, %v3566_v14  ;;  %v3367_v22 = vmul.f32 %v7213_v54, %v5835_v26  ;;  %v2722_v4 = vadd.f32 %v2690_v37, %v2554_v63  ;;  %v7325_v14 = vld [vmem:[%s5770_s21 + $0x1c9] sm:$0xff] }
 0x30f   : >> { %v5093_v12 = vpop.eup %5092  ;;  %v3500_v15 = vadd.f32 %v3468_v35, %v3332_v11  ;;  %v2826_v62 = vadd.f32 %v2794_v9, %v2655_v36  ;;  %v2861_v52 = vmul.f32 %v7732_v34, %v5799_v8  ;;  %v2355_v59 = vmul.f32 %v7733_v47, %v5778_v1  ;;  %v7734_v34 = vld [vmem:[#allocation25_spill] sm:$0xff]  ;;  %v7735_v11 = vld [vmem:[#allocation23_spill] sm:$0xff]  ;;  %v7736_v63 = vld [vmem:[#allocation26_spill] sm:$0xff] }
 0x310   : >> { %v3991_v60 = vmul.f32 %v5093_v12, %v3959_v44  ;;  %v3301_v44 = vmul.f32 %v7305_v31, %v5832_v25  ;;  %v2523_v54 = vmul.f32 %v6952_v28, %v5784_v3  ;;  %v2288_v32 = vmul.f32 %v7734_v34, %v5775_v0  ;;  %v3960_v12 = vld [vmem:[%s6043_s26 + $0xd8] sm:$0xff] }
 0x311   : >> { %v3668_v45 = vadd.f32 %v3636_v46, %v3500_v15  ;;  %v2994_v16 = vadd.f32 %v2962_v30, %v2826_v62  ;;  %v3469_v9 = vmul.f32 %v7314_v53, %v5853_v38  ;;  %v3029_v47 = vmul.f32 %v7094_v17, %v5818_v21 }
 0x312   : >> { %v4023_v42 = vadd.f32 %v3991_v60, %v3733_v55  ;;  %v3228_v55 = vadd.f32 %v3196_v61, %v3060_v27  ;;  %v2456_v61 = vmul.f32 %v7735_v11, %v5781_v2  ;;  %v2893_v27 = vadd.f32 %v2861_v52, %v2722_v4  ;;  %v7737_v60 = vld [vmem:[#allocation28_spill] sm:$0xff] }
 0x313   : >> { %v4646_v35 = vmul.f32 -1.442695, %v3668_v45  ;;  %v3162_v39 = vadd.f32 %v3130_v58, %v2994_v16  ;;  %v2624_v37 = vmul.f32 %v7736_v63, %v5789_v5  ;;  %v3637_v2 = vmul.f32 %v7325_v14, %v5868_v48 }
 0x314   : >> { %4056 = vst.msk [vmem:[%s6083_s30 + $0xd0] sm:$0xff] %vm737_vm0, %v4023_v42  ;;  %v5095_v43 = vpop.eup %5094  ;;  %v2488_v28 = vadd.f32 %v2456_v61, %v2288_v32  ;;  %v2795_v15 = vmul.f32 %v7737_v60, %v5796_v7  ;;  %v3399_v30 = vadd.f32 %v3367_v22, %v3228_v55  ;;  %v7738_v42 = vld [vmem:[#allocation33_spill] sm:$0xff]  ;;  %v2963_v62 = vmul.f32 %v7186_v56, %v5815_v20 }
 0x315   : >> { %v3863_v46 = vadd.f32 1.0, %v5095_v43  ;;  %5098 = vpow2.f32 %v4646_v35  ;;  %v3333_v0 = vadd.f32 %v3301_v44, %v3162_v39  ;;  %v3535_v45 = vmul.f32 %v7738_v42, %v5873_v50  ;;  %v7349_v35 = vld [vmem:[%s5770_s21 + $0x1cf] sm:$0xff] }
 0x316   : >> { %v2656_v17 = vadd.f32 %v2624_v37, %v2488_v28  ;;  %v2555_v5 = vadd.f32 %v2523_v54, %v2355_v59  ;;  %v2691_v4 = vmul.f32 %v7719_v29, %v5793_v6  ;;  %v3131_v22 = vmul.f32 %v7198_v40, %v5825_v23  ;;  %v7356_v43 = vld [vmem:[%s5770_s21 + $0x1d0] sm:$0xff] }
 0x317   : >> { %5100 = vrcp.f32 %v3863_v46  ;;  %v3501_v52 = vadd.f32 %v3469_v9, %v3333_v0  ;;  %v3061_v16 = vadd.f32 %v3029_v47, %v2893_v27  ;;  %v3197_v44 = vmul.f32 %v7728_v19, %v5829_v24  ;;  %v7739_v29 = vld [vmem:[#allocation31_spill] sm:$0xff]  ;;  %v3961_v47 = vld [vmem:[%s6043_s26 + $0xe0] sm:$0xff] }
 0x318   : >> { %v5097_v36 = vpop.eup %5096  ;;  %v2827_v7 = vadd.f32 %v2795_v15, %v2656_v17  ;;  %v3567_v59 = vadd.f32 %v3535_v45, %v3399_v30  ;;  %v3703_v54 = vmul.f32 %v7739_v29, %v5902_v33  ;;  %v3302_v61 = vmul.f32 %v7349_v35, %v5832_v25  ;;  %v7367_v19 = vld [vmem:[%s5770_s21 + $0x1d1] sm:$0xff] }
 0x319   : >> { %v3992_v58 = vmul.f32 %v5097_v36, %v3960_v12  ;;  %v3669_v20 = vadd.f32 %v3637_v2, %v3501_v52  ;;  %v2723_v23 = vadd.f32 %v2691_v4, %v2555_v5  ;;  %v2356_v39 = vmul.f32 %v7734_v34, %v5778_v1 }
 0x31a   : >> { %v2995_v32 = vadd.f32 %v2963_v62, %v2827_v7  ;;  %v2524_v9 = vmul.f32 %v7735_v11, %v5784_v3  ;;  %v3470_v27 = vmul.f32 %v7356_v43, %v5853_v38  ;;  %v3229_v28 = vadd.f32 %v3197_v44, %v3061_v16  ;;  %v3962_v7 = vld [vmem:[%s6043_s26 + $0xe8] sm:$0xff] }
 0x31b   : >> { %v4024_v55 = vadd.f32 %v3992_v58, %v3734_v10  ;;  %v2862_v10 = vmul.f32 %v7131_v57, %v5799_v8  ;;  %v4647_v46 = vmul.f32 -1.442695, %v3669_v20  ;;  %v3368_v37 = vmul.f32 %v7261_v51, %v5835_v26 }
 0x31c   : >> { %v3163_v12 = vadd.f32 %v3131_v22, %v2995_v32  ;;  %v3735_v57 = vadd.f32 %v3703_v54, %v3567_v59  ;;  %v3638_v1 = vmul.f32 %v7367_v19, %v5868_v48  ;;  %v3030_v11 = vmul.f32 %v7140_v13, %v5818_v21 }
 0x31d   : >> { %4057 = vst.msk [vmem:[%s6083_s30 + $0xd8] sm:$0xff] %vm737_vm0, %v4024_v55  ;;  %5102 = vpow2.f32 %v4647_v46  ;;  %v2894_v3 = vadd.f32 %v2862_v10, %v2723_v23  ;;  %v2692_v38 = vmul.f32 %v7736_v63, %v5793_v6  ;;  %v2556_v36 = vadd.f32 %v2524_v9, %v2356_v39 }
 0x31e   : >> { %v3334_v2 = vadd.f32 %v3302_v61, %v3163_v12  ;;  %v3400_v30 = vadd.f32 %v3368_v37, %v3229_v28  ;;  %v3536_v42 = vmul.f32 %v7270_v41, %v5873_v50  ;;  %v3198_v62 = vmul.f32 %v7154_v18, %v5829_v24  ;;  %v3964_v12 = vld [vmem:[%s6043_s26 + $0xf8] sm:$0xff] }
 0x31f   : >> { %v5099_v25 = vpop.eup %5098  ;;  %v3062_v48 = vadd.f32 %v3030_v11, %v2894_v3  ;;  %v2724_v13 = vadd.f32 %v2692_v38, %v2556_v36  ;;  %v2863_v6 = vmul.f32 %v7737_v60, %v5799_v8  ;;  %v3704_v5 = vmul.f32 %v7281_v49, %v5902_v33 }
 0x320   : >> { %v3864_v0 = vadd.f32 1.0, %v5099_v25  ;;  %v3502_v51 = vadd.f32 %v3470_v27, %v3334_v2  ;;  %v3568_v58 = vadd.f32 %v3536_v42, %v3400_v30  ;;  %v3369_v52 = vmul.f32 %v7305_v31, %v5835_v26 }
 0x321   : >> { %v5101_v34 = vpop.eup %5100  ;;  %v3230_v41 = vadd.f32 %v3198_v62, %v3062_v48  ;;  %v2895_v22 = vadd.f32 %v2863_v6, %v2724_v13  ;;  %v3031_v55 = vmul.f32 %v7186_v56, %v5818_v21  ;;  %v3537_v49 = vmul.f32 %v7314_v53, %v5873_v50  ;;  %v3963_v53 = vld [vmem:[%s6043_s26 + $0xf0] sm:$0xff] }
 0x322   : >> { %v3993_v15 = vmul.f32 %v5101_v34, %v3961_v47  ;;  %5104 = vrcp.f32 %v3864_v0  ;;  %v3670_v17 = vadd.f32 %v3638_v1, %v3502_v51  ;;  %v3736_v16 = vadd.f32 %v3704_v5, %v3568_v58 }
 0x323   : >> { %v3401_v44 = vadd.f32 %v3369_v52, %v3230_v41  ;;  %v3063_v20 = vadd.f32 %v3031_v55, %v2895_v22  ;;  %v3199_v59 = vmul.f32 %v7198_v40, %v5829_v24  ;;  %v3705_v21 = vmul.f32 %v7325_v14, %v5902_v33 }
 0x324   : >> { %v4025_v45 = vadd.f32 %v3993_v15, %v3735_v57  ;;  %v4648_v63 = vmul.f32 -1.442695, %v3670_v17  ;;  %v3370_v32 = vmul.f32 %v7349_v35, %v5835_v26  ;;  %v3538_v10 = vmul.f32 %v7356_v43, %v5873_v50 }
 0x325   : >> { %v3569_v29 = vadd.f32 %v3537_v49, %v3401_v44  ;;  %v3231_v54 = vadd.f32 %v3199_v59, %v3063_v20  ;;  %v3706_v14 = vmul.f32 %v7367_v19, %v5902_v33 }
 0x326   : >> { %4058 = vst.msk [vmem:[%s6083_s30 + $0xe0] sm:$0xff] %vm737_vm0, %v4025_v45  ;;  %5106 = vpow2.f32 %v4648_v63 }
 0x327   : >> { %v5103_v4 = vpop.eup %5102  ;;  %v3737_v23 = vadd.f32 %v3705_v21, %v3569_v29  ;;  %v3402_v40 = vadd.f32 %v3370_v32, %v3231_v54 }
 0x328   : >> { %v3865_v18 = vadd.f32 1.0, %v5103_v4 }
 0x329   : >> { %v3570_v9 = vadd.f32 %v3538_v10, %v3402_v40 }
 0x32a   : >> { %5108 = vrcp.f32 %v3865_v18 }
 0x32b   : >> { %v3738_v26 = vadd.f32 %v3706_v14, %v3570_v9 }
 0x32c   : >> { %v5105_v8 = vpop.eup %5104 }
 0x32d   : >> { %v3994_v60 = vmul.f32 %v5105_v8, %v3962_v7 }
 0x32f   : >> { %v4026_v31 = vadd.f32 %v3994_v60, %v3736_v16 }
 0x330   : >> { %v5107_v56 = vpop.eup %5106 }
 0x331   : >> { %4059 = vst.msk [vmem:[%s6083_s30 + $0xe8] sm:$0xff] %vm737_vm0, %v4026_v31  ;;  %v3866_v61 = vadd.f32 1.0, %v5107_v56 }
 0x333   : >> { %5110 = vrcp.f32 %v3866_v61 }
 0x334   : >> { %v5109_v24 = vpop.eup %5108 }
 0x335   : >> { %v3995_v46 = vmul.f32 %v5109_v24, %v3963_v53 }
 0x337   : >> { %v4027_v39 = vadd.f32 %v3995_v46, %v3737_v23 }
 0x339   : >> { %4060 = vst.msk [vmem:[%s6083_s30 + $0xf0] sm:$0xff] %vm737_vm0, %v4027_v39 }
 0x33c   : > { %2216 = sbr.rel (!%p2214_p9) target bundleno = 479 (0x1df), region = 134 }
 0x33d   : >> { %v5111_v35 = vpop.eup %5110 }
 0x33e   : >> { %v3996_v27 = vmul.f32 %v5111_v35, %v3964_v12 }
 0x340   : >> { %v4028_v25 = vadd.f32 %v3996_v27, %v3738_v26 }
 0x342   : >> { %4061 = vst.msk [vmem:[%s6083_s30 + $0xf8] sm:$0xff] %vm737_vm0, %v4028_v25 }
 0x343   : > { %5125 = shalt.err (!%p5122_p2)
}
 0x344   : > { %s5126_s13 = scalar_lea.hbm %s7431_s29, 8192  ;;  %s5130_s25 = scalar_lea.hbm %s7742_s22, 32768 }
 0x345   : > { %p5127_p4 = scmp.ne.s32.totalorder %s7431_s29, %s5126_s13  ;;  %p5131_p7 = scmp.lt.u32.totalorder %s7431_s29, %s7742_s22 }
 0x346   : > { %p5132_p9 = scmp.lt.u32.totalorder %s5130_s25, %s5126_s13  ;;  %p5134_p11 = scmp.lt.u32.totalorder %s5126_s13, %s7431_s29 }
 0x347   : > { %p5128_p5 = pnand %p5127_p4, %p5329_p3 }
 0x348   : > { %p5133_p10 = por %p5132_p9, %p5131_p7 }
 0x349   : > { %p5129_p6 = pneg %p5128_p5 }
 0x34a   : > { %p5135_p12 = por %p5134_p11, %p5133_p10 }
 0x34c   : > { %p5136_p13 = pnand %p5135_p12, %p5129_p6 }
 0x34e   : > { %5139 = shalt.err (!%p5136_p13)
}
 0x34f   : > { %s5221_s16 = smov 128   ;;  %s5222_s27 = smov 8  }
 0x350   : > { %4819 = dma.vmem_to_hbm [thread:$0]  (%p5329_p3), %s7426_s18, 8192, %s7431_s29, %s7435_s2, %s5221_s16, %s5221_s16, %s5222_s27  }
 0x351 PF: > { %s7743_s20 = sld [smem:[#allocation11_spill]]  ;;  %s7744_s28 = sld [smem:[#allocation7_spill]] }
 0x357   : > { %p4825_p0 = scmp.ge.s32.totalorder %s7743_s20, 2  ;;  %s4094_s19 = sand.u32 1, %s7744_s28  }
 0x358   : > { %s4095_s24 = scalar_lea.sflag [#allocation5], %s4094_s19 }
 0x359   : > { %p4822_p1 = pnand %p4825_p0, %p5338_p8 }
 0x35b   : > { %5177 = dma.done.wait (!%p4822_p1), %s4095_s24, 8192  }
 0x35c   : > { %5179 = vsyncadd (!%p4822_p1), %s4095_s24, 4294959104  ;;  %s23_s20 = sadd.s32 1, %s7743_s20   ;;  %s7746_s17 = sld [smem:[#allocation8_spill]] }
 0x35d   : > { %p20_p2 = scmp.ge.s32.totalorder %s23_s20, 6   ;;  %s7747_s15 = sld [smem:[#allocation16_spill]] }
 0x35e   : > { %s7748_s16 = sld [smem:[#allocation9_spill]]  ;;  %s7749_s12 = sld [smem:[#allocation10_spill]] }
 0x35f   : > { %s7750_s18 = sld [smem:[#allocation12_spill]]  ;;  %s7751_s19 = sld [smem:[#allocation14_spill]] }
 0x360   : > { %s7752_s13 = smov %s5186_s14  ;;  %22 = sbr.rel (!%p20_p2) target bundleno = 8 (0x8), region = 145 }
 0x362   : > { %s7753_s14 = smov %s7746_s17 }
 0x364   : > { %s7754_s17 = smov %s7749_s12 }
 0x367   :  { %4100 = vsyncpa [#allocation5], 1 }
 0x368   :  { %4102 = vsyncpa [#allocation5 + $0x1], 1 }

</bundles_post_ra>
